<compile_context>
chip_gen: v6e
topology: v6e:2x2x1
jax: 0.10.0
libtpu: 0.0.40
codegen_flags: <defaults>
</compile_context>

<pallas_src>
import numpy as np
from functools import partial, lru_cache

import jax
import jax.numpy as jnp
from jax.experimental import pallas as pl
from jax.experimental.pallas import tpu as pltpu

# MXU operand dtype (accumulation is always f32).  bf16 targets the v6e/v7x MXU fast path
# as requested in the perf review; switch to jnp.float32 for bit-closer-to-PyTorch numerics.
MXU_DTYPE = jnp.bfloat16


# ---------------------------- in-kernel helpers ----------------------------

def _mm(a, b):
    """MXU matmul: (bf16|f32) operands, f32 accumulation."""
    return jnp.dot(a.astype(MXU_DTYPE), b.astype(MXU_DTYPE),
                   preferred_element_type=jnp.float32)


def _ln(x, g, b, eps):
    mu = jnp.mean(x, axis=-1, keepdims=True)
    xc = x - mu
    var = jnp.mean(xc * xc, axis=-1, keepdims=True)
    return xc * jax.lax.rsqrt(var + eps) * g + b


def _hswish(x):
    return x * jnp.clip(x + 3.0, 0.0, 6.0) * (1.0 / 6.0)


def _c2(i):
    return (0, 0)


def _c3(i):
    return (0, 0, 0)


# ---------------------------- Pallas kernels ----------------------------

def _patch_embed_kernel(p_ref, w_ref, b_ref, g_ref, bn_ref, o_ref):
    # fused: conv3x3/s2 (as im2col matmul) + bias + LayerNorm(eps=1e-5)
    y = _mm(p_ref[0], w_ref[...]) + b_ref[...]
    o_ref[0] = _ln(y, g_ref[...], bn_ref[...], 1e-5)


def _attn_block_kernel(x_ref, a_ref, wt_ref, bd_ref,
                       g1_ref, b1_ref, gp_ref, bp_ref,
                       qw_ref, qb_ref, kw_ref, kb_ref, vw_ref, vb_ref,
                       pw_ref, pjb_ref, o_ref):
    x = x_ref[0]                                     # (N, C) tokens of this batch element
    num_heads, _, hd = qw_ref.shape
    scale = float(hd) ** -0.5

    xn = _ln(x, g1_ref[...], b1_ref[...], 1e-6)      # norm1

    # adaptive-avg-pool (4 ratios) + shared depthwise-3x3 residual:
    #   pools = pool(xn) + dwconv3x3(pool(xn))
    # using precomputed tap matrices a_ref[t] = shift_t @ pool_mat (exact 0/1 selections
    # times bin averages -> kept f32).  a_ref[4] is the centre tap == the pooling matrix,
    # which also supplies the residual term.  No padded/9x im2col tensor is materialized.
    pools = jnp.dot(a_ref[4], xn, preferred_element_type=jnp.float32) + bd_ref[...]
    for t in range(9):
        pools = pools + jnp.dot(a_ref[t], xn,
                                preferred_element_type=jnp.float32) * wt_ref[t]

    pn = _ln(pools, gp_ref[...], bp_ref[...], 1e-5)  # attn.norm over pooled tokens

    # per-head attention; output projection folded into the head loop, residual added
    # before the single lane-contiguous store (no head concat / transposes).
    out = x + pjb_ref[...]
    for h in range(num_heads):
        qh = _mm(xn, qw_ref[h]) + qb_ref[h]          # (N, hd)
        kh = _mm(pn, kw_ref[h]) + kb_ref[h]          # (Pt, hd)
        vh = _mm(pn, vw_ref[h]) + vb_ref[h]          # (Pt, hd)
        s = jax.lax.dot_general(qh.astype(MXU_DTYPE), kh.astype(MXU_DTYPE),
                                (((1,), (1,)), ((), ())),
                                preferred_element_type=jnp.float32) * scale
        m = jnp.max(s, axis=-1, keepdims=True)
        p = jnp.exp(s - m)
        # reciprocal on the EUP slot instead of a VALU divide
        p = p * pl.reciprocal(jnp.sum(p, axis=-1, keepdims=True), approx=True)
        out = out + _mm(_mm(p, vh), pw_ref[h])       # head h's contribution through proj
    o_ref[0] = out                                   # x + attn(...)


def _irb_block_kernel(x_ref, s_ref, g2_ref, b2_ref,
                      w1_ref, fb1_ref, cw_ref, cb_ref, w2_ref, fb2_ref, o_ref):
    x = x_ref[0]                                     # (N, C)
    xn = _ln(x, g2_ref[...], b2_ref[...], 1e-6)      # norm2
    h = _hswish(_mm(xn, w1_ref[...]) + fb1_ref[...])  # fc1 (1x1 conv) + hardswish, (N, hidden)
    # depthwise 3x3 (stride 1, pad 1) via 9 precomputed 0/1 shift matrices (exact, f32);
    # boundary zero-padding is encoded in the matrices, so no padded tensor in HBM.
    acc = jnp.dot(s_ref[0], h, preferred_element_type=jnp.float32) * cw_ref[0]
    for t in range(1, 9):
        acc = acc + jnp.dot(s_ref[t], h, preferred_element_type=jnp.float32) * cw_ref[t]
    acc = _hswish(acc + cb_ref[...])
    o_ref[0] = x + _mm(acc, w2_ref[...]) + fb2_ref[...]   # fc2 + residual


# ---------------------------- pallas_call wrappers ----------------------------

def patch_embed_call(patches, w, b, g, bn):
    B, M, K = patches.shape
    D = w.shape[1]
    return pl.pallas_call(
        _patch_embed_kernel,
        out_shape=jax.ShapeDtypeStruct((B, M, D), jnp.float32),
        grid=(B,),
        in_specs=[pl.BlockSpec((1, M, K), lambda i: (i, 0, 0)),
                  pl.BlockSpec((K, D), _c2),
                  pl.BlockSpec((1, D), _c2),
                  pl.BlockSpec((1, D), _c2),
                  pl.BlockSpec((1, D), _c2)],
        out_specs=pl.BlockSpec((1, M, D), lambda i: (i, 0, 0)),
        compiler_params=pltpu.CompilerParams(dimension_semantics=("parallel",)),
    )(patches, w, b.reshape(1, D), g.reshape(1, D), bn.reshape(1, D))


def attn_block_call(x, A, Wtap, Bd, g1, b1, ap, num_heads):
    B, N, C = x.shape
    assert C % num_heads == 0
    Pt = A.shape[1]
    hd = C // num_heads
    # pre-split per-head weights (tiny XLA reshapes, done once per trace) so the kernel
    # only indexes the leading "head" dim.
    qw = ap["q_w"].reshape(C, num_heads, hd).transpose(1, 0, 2)       # (H, C, hd)
    qb = ap["q_b"].reshape(num_heads, 1, hd)
    kw = ap["kv_w"][:, :C].reshape(C, num_heads, hd).transpose(1, 0, 2)
    vw = ap["kv_w"][:, C:].reshape(C, num_heads, hd).transpose(1, 0, 2)
    kb = ap["kv_b"][:C].reshape(num_heads, 1, hd)
    vb = ap["kv_b"][C:].reshape(num_heads, 1, hd)
    pw = ap["proj_w"].reshape(num_heads, hd, C)                       # (H, hd, C)
    pjb = ap["proj_b"].reshape(1, C)

    return pl.pallas_call(
        _attn_block_kernel,
        out_shape=jax.ShapeDtypeStruct((B, N, C), jnp.float32),
        grid=(B,),
        in_specs=[pl.BlockSpec((1, N, C), lambda i: (i, 0, 0)),   # x
                  pl.BlockSpec((9, Pt, N), _c3),                  # pool+shift tap matrices
                  pl.BlockSpec((9, Pt, C), _c3),                  # per-row dconv tap weights
                  pl.BlockSpec((Pt, C), _c2),                     # per-row dconv bias
                  pl.BlockSpec((1, C), _c2),                      # norm1 gamma
                  pl.BlockSpec((1, C), _c2),                      # norm1 beta
                  pl.BlockSpec((1, C), _c2),                      # pool-norm gamma
                  pl.BlockSpec((1, C), _c2),                      # pool-norm beta
                  pl.BlockSpec((num_heads, C, hd), _c3),          # q weight / head
                  pl.BlockSpec((num_heads, 1, hd), _c3),          # q bias / head
                  pl.BlockSpec((num_heads, C, hd), _c3),          # k weight / head
                  pl.BlockSpec((num_heads, 1, hd), _c3),          # k bias / head
                  pl.BlockSpec((num_heads, C, hd), _c3),          # v weight / head
                  pl.BlockSpec((num_heads, 1, hd), _c3),          # v bias / head
                  pl.BlockSpec((num_heads, hd, C), _c3),          # proj weight / head
                  pl.BlockSpec((1, C), _c2)],                     # proj bias
        out_specs=pl.BlockSpec((1, N, C), lambda i: (i, 0, 0)),
        compiler_params=pltpu.CompilerParams(dimension_semantics=("parallel",)),
    )(x, A, Wtap, Bd,
      g1.reshape(1, C), b1.reshape(1, C),
      ap["norm_w"].reshape(1, C), ap["norm_b"].reshape(1, C),
      qw, qb, kw, kb, vw, vb, pw, pjb)


def irb_block_call(x, S, g2, b2, mp):
    B, N, C = x.shape
    hidden = mp["fc1_w"].shape[1]
    return pl.pallas_call(
        _irb_block_kernel,
        out_shape=jax.ShapeDtypeStruct((B, N, C), jnp.float32),
        grid=(B,),
        in_specs=[pl.BlockSpec((1, N, C), lambda i: (i, 0, 0)),   # x
                  pl.BlockSpec((9, N, N), _c3),                   # 0/1 shift matrices
                  pl.BlockSpec((1, C), _c2),                      # norm2 gamma
                  pl.BlockSpec((1, C), _c2),                      # norm2 beta
                  pl.BlockSpec((C, hidden), _c2),                 # fc1 w
                  pl.BlockSpec((1, hidden), _c2),                 # fc1 b
                  pl.BlockSpec((9, 1, hidden), _c3),              # dwconv tap weights
                  pl.BlockSpec((1, hidden), _c2),                 # dwconv bias
                  pl.BlockSpec((hidden, C), _c2),                 # fc2 w
                  pl.BlockSpec((1, C), _c2)],                     # fc2 b
        out_specs=pl.BlockSpec((1, N, C), lambda i: (i, 0, 0)),
        compiler_params=pltpu.CompilerParams(dimension_semantics=("parallel",)),
    )(x, S, g2.reshape(1, C), b2.reshape(1, C),
      mp["fc1_w"], mp["fc1_b"].reshape(1, hidden),
      mp["conv_w"].reshape(9, 1, hidden), mp["conv_b"].reshape(1, hidden),
      mp["fc2_w"], mp["fc2_b"].reshape(1, C))


# ---------------------------- static (host-side) matrices ----------------------------

def _pool_matrix(H, W, oh, ow):
    """adaptive_avg_pool2d (H,W)->(oh,ow) as an (oh*ow, H*W) averaging matrix
    (PyTorch bin rule: start=floor(i*H/oh), end=ceil((i+1)*H/oh))."""
    m = np.zeros((oh * ow, H * W), np.float64)
    for i in range(oh):
        hs, he = (i * H) // oh, -(-((i + 1) * H) // oh)
        for j in range(ow):
            ws, we = (j * W) // ow, -(-((j + 1) * W) // ow)
            val = 1.0 / ((he - hs) * (we - ws))
            for hh in range(hs, he):
                for ww in range(ws, we):
                    m[i * ow + j, hh * W + ww] = val
    return m


def _shift_matrix(oh, ow, dh, dw):
    """3x3 tap (dh,dw), stride 1, zero pad 1, as an (oh*ow, oh*ow) 0/1 selection matrix."""
    s = np.zeros((oh * ow, oh * ow), np.float64)
    for i in range(oh):
        for j in range(ow):
            i2, j2 = i + dh - 1, j + dw - 1
            if 0 <= i2 < oh and 0 <= j2 < ow:
                s[i * ow + j, i2 * ow + j2] = 1.0
    return s


@lru_cache(maxsize=None)
def _static_matrices(H, W, pool_ratios):
    # Python round() (banker's rounding) matches the reference forward's
    # `round(H / pool_ratio)` exactly (addresses the rounding-rule review note).
    sizes = tuple((round(H / r), round(W / r)) for r in pool_ratios)
    A = []
    for t in range(9):
        dh, dw = divmod(t, 3)
        A.append(np.concatenate(
            [_shift_matrix(oh, ow, dh, dw) @ _pool_matrix(H, W, oh, ow)
             for (oh, ow) in sizes], axis=0))
    A = np.stack(A, axis=0).astype(np.float32)                          # (9, Pt, H*W)
    S = np.stack([_shift_matrix(H, W, *divmod(t, 3)) for t in range(9)],
                 axis=0).astype(np.float32)                             # (9, N, N)
    return A, S, sizes


# ---------------------------- model forward (jitted glue) ----------------------------

@partial(jax.jit, static_argnums=(2, 3))
def _forward_impl(params, x_nchw, num_heads, pool_ratios):
    B, D, Hin, Win = x_nchw.shape

    # ---- PatchEmbed: conv3x3 stride 2 pad 1 via im2col (tiny XLA glue) + fused matmul+LN
    Ho = (Hin + 2 - 3) // 2 + 1
    Wo = (Win + 2 - 3) // 2 + 1
    x_nhwc = jnp.transpose(x_nchw, (0, 2, 3, 1))
    xp = jnp.pad(x_nhwc, ((0, 0), (1, 1), (1, 1), (0, 0)))
    taps = [xp[:, kh:kh + 2 * Ho:2, kw:kw + 2 * Wo:2, :]
            for kh in range(3) for kw in range(3)]
    patches = jnp.stack(taps, axis=3).reshape(B, Ho * Wo, 9 * D)
    pe = params["patch_embed"]
    x = patch_embed_call(patches, pe["proj_w"], pe["proj_b"], pe["norm_w"], pe["norm_b"])
    H, W = Ho, Wo

    # ---- constants shared by both Blocks (built once, hoisted out of the block loop)
    A_np, S_np, sizes = _static_matrices(H, W, tuple(pool_ratios))
    A = jnp.asarray(A_np)
    S = jnp.asarray(S_np)
    # expand the 4 shared depthwise convs into per-pooled-row tap weights / bias
    Wtap = jnp.concatenate(
        [jnp.broadcast_to(dc["w"].reshape(9, 1, D), (9, oh * ow, D))
         for (oh, ow), dc in zip(sizes, params["dconvs"])], axis=1)     # (9, Pt, D)
    Bd = jnp.concatenate(
        [jnp.broadcast_to(dc["b"].reshape(1, D), (oh * ow, D))
         for (oh, ow), dc in zip(sizes, params["dconvs"])], axis=0)     # (Pt, D)

    # ---- 2 transformer Blocks (drop / drop_path = 0.0 -> identity); one kernel per branch
    for bp in params["cblock"]:
        x = attn_block_call(x, A, Wtap, Bd, bp["norm1_w"], bp["norm1_b"],
                            bp["attn"], num_heads)
        x = irb_block_call(x, S, bp["norm2_w"], bp["norm2_b"], bp["mlp"])

    # ---- back to NCHW.
    # TODO(synk): fold this tiny (B,N,C)->NCHW permute into the last IRB kernel once the
    # in-kernel small-shape transpose path is verified on all target chips; it moves ~9 KB.
    return x.reshape(B, H, W, D).transpose(0, 3, 1, 2)


def fifth_block_forward(params, x_nchw, num_heads, pool_ratios=(1, 2, 3, 4)):
    return _forward_impl(params, x_nchw, num_heads, tuple(pool_ratios))


# ---------------------------- deterministic params ----------------------------

def init_params(key, dim, num_heads):
    hidden = 4 * dim
    ks = iter(jax.random.split(key, 128))

    def w(shape, std=0.02):
        return (std * jax.random.normal(next(ks), shape)).astype(jnp.float32)

    def zeros(shape):
        return jnp.zeros(shape, jnp.float32)

    def ones(shape):
        return jnp.ones(shape, jnp.float32)

    params = {
        "patch_embed": {
            # conv3x3 weight stored as (kh*kw*cin, cout) matching the im2col order
            "proj_w": w((9 * dim, dim)), "proj_b": w((dim,)),
            "norm_w": ones((dim,)), "norm_b": zeros((dim,)),
        },
        # the 4 shared depthwise convs (self.block), weight (3,3,C), bias (C,)
        "dconvs": [{"w": w((3, 3, dim)), "b": w((dim,))} for _ in range(4)],
        "cblock": [],
    }
    for _ in range(2):
        params["cblock"].append({
            "norm1_w": ones((dim,)), "norm1_b": zeros((dim,)),
            "norm2_w": ones((dim,)), "norm2_b": zeros((dim,)),
            "attn": {
                "q_w": w((dim, dim)), "q_b": zeros((dim,)),
                "kv_w": w((dim, 2 * dim)), "kv_b": zeros((2 * dim,)),
                "proj_w": w((dim, dim)), "proj_b": zeros((dim,)),
                "norm_w": ones((dim,)), "norm_b": zeros((dim,)),
            },
            "mlp": {
                "fc1_w": w((dim, hidden)), "fc1_b": w((hidden,)),
                "conv_w": w((3, 3, hidden)), "conv_b": w((hidden,)),
                "fc2_w": w((hidden, dim)), "fc2_b": w((dim,)),
            },
        })
    return params


if __name__ == "__main__":
    dim, num_heads = 32, 2
    B, Hin, Win = 2, 12, 12            # PatchEmbed(img_size=384//32=12, patch_size=2)

    key = jax.random.PRNGKey(0)
    kx, kp = jax.random.split(key)
    x = jax.random.normal(kx, (B, dim, Hin, Win), jnp.float32)
    params = init_params(kp, dim, num_heads)

    out = fifth_block_forward(params, x, num_heads)
    out = jax.block_until_ready(out)
    assert out.shape == (B, dim, Hin // 2, Win // 2), out.shape
    assert bool(jnp.all(jnp.isfinite(out)))
    print("KERNEL_OK")
</pallas_src>

<mosaic_0001>
module attributes {stable_mosaic.version = 11 : i64} {
  func.func @_patch_embed_kernel(%arg0: i32, %arg1: memref<1x36x288xf32, #tpu.memory_space<vmem>>, %arg2: memref<288x32xf32, #tpu.memory_space<vmem>>, %arg3: memref<1x32xf32, #tpu.memory_space<vmem>>, %arg4: memref<1x32xf32, #tpu.memory_space<vmem>>, %arg5: memref<1x32xf32, #tpu.memory_space<vmem>>, %arg6: memref<1x36x32xf32, #tpu.memory_space<vmem>>) attributes {dimension_semantics = [#tpu.dimension_semantics<parallel>], iteration_bounds = array<i64: 2>, scalar_prefetch = 0 : i64, scratch_operands = 0 : i64, tpu.core_type = #tpu.core_type<tc>, window_params = [{transform_indices = @transform_0, window_bounds = array<i64: 1, 36, 288>}, {pipeline_mode = #tpu.pipeline_mode<synchronous>, transform_indices = @transform_1, window_bounds = array<i64: 288, 32>}, {pipeline_mode = #tpu.pipeline_mode<synchronous>, transform_indices = @transform_2, window_bounds = array<i64: 1, 32>}, {pipeline_mode = #tpu.pipeline_mode<synchronous>, transform_indices = @transform_3, window_bounds = array<i64: 1, 32>}, {pipeline_mode = #tpu.pipeline_mode<synchronous>, transform_indices = @transform_4, window_bounds = array<i64: 1, 32>}, {transform_indices = @transform_5, window_bounds = array<i64: 1, 36, 32>}]} {
    %c0 = arith.constant 0 : index
    %c0_0 = arith.constant 0 : index
    %c0_1 = arith.constant 0 : index
    %0 = vector.load %arg1[%c0, %c0_0, %c0_1] : memref<1x36x288xf32, #tpu.memory_space<vmem>>, vector<1x36x288xf32>
    %1 = vector.shape_cast %0 : vector<1x36x288xf32> to vector<36x288xf32>
    %c0_2 = arith.constant 0 : index
    %c0_3 = arith.constant 0 : index
    %2 = vector.load %arg2[%c0_2, %c0_3] : memref<288x32xf32, #tpu.memory_space<vmem>>, vector<288x32xf32>
    %3 = arith.truncf %1 : vector<36x288xf32> to vector<36x288xbf16>
    %4 = arith.truncf %2 : vector<288x32xf32> to vector<288x32xbf16>
    %cst = arith.constant dense<0.000000e+00> : vector<36x32xf32>
    %5 = tpu.matmul %3, %4, %cst {dimension_numbers = #tpu.dot_dimension_numbers<[1], [0], [0], [1], [0, 0, 1, 1], [], []>} : vector<36x288xbf16>, vector<288x32xbf16>, vector<36x32xf32> -> vector<36x32xf32>
    %c0_4 = arith.constant 0 : index
    %c0_5 = arith.constant 0 : index
    %6 = vector.load %arg3[%c0_4, %c0_5] : memref<1x32xf32, #tpu.memory_space<vmem>>, vector<1x32xf32>
    %7 = vector.broadcast %6 : vector<1x32xf32> to vector<36x32xf32>
    %8 = arith.addf %5, %7 : vector<36x32xf32>
    %c0_6 = arith.constant 0 : index
    %c0_7 = arith.constant 0 : index
    %9 = vector.load %arg4[%c0_6, %c0_7] : memref<1x32xf32, #tpu.memory_space<vmem>>, vector<1x32xf32>
    %c0_8 = arith.constant 0 : index
    %c0_9 = arith.constant 0 : index
    %10 = vector.load %arg5[%c0_8, %c0_9] : memref<1x32xf32, #tpu.memory_space<vmem>>, vector<1x32xf32>
    %cst_10 = arith.constant dense<0.000000e+00> : vector<36xf32>
    %11 = vector.multi_reduction <add>, %8, %cst_10 [1] : vector<36x32xf32> to vector<36xf32>
    %12 = vector.shape_cast %11 : vector<36xf32> to vector<36x1xf32>
    %cst_11 = arith.constant 3.200000e+01 : f32
    %13 = vector.broadcast %cst_11 : f32 to vector<36x1xf32>
    %14 = arith.divf %12, %13 : vector<36x1xf32>
    %15 = vector.broadcast %14 : vector<36x1xf32> to vector<36x32xf32>
    %16 = arith.subf %8, %15 : vector<36x32xf32>
    %17 = arith.mulf %16, %16 : vector<36x32xf32>
    %cst_12 = arith.constant dense<0.000000e+00> : vector<36xf32>
    %18 = vector.multi_reduction <add>, %17, %cst_12 [1] : vector<36x32xf32> to vector<36xf32>
    %19 = vector.shape_cast %18 : vector<36xf32> to vector<36x1xf32>
    %cst_13 = arith.constant 3.200000e+01 : f32
    %20 = vector.broadcast %cst_13 : f32 to vector<36x1xf32>
    %21 = arith.divf %19, %20 : vector<36x1xf32>
    %cst_14 = arith.constant 9.99999974E-6 : f32
    %22 = vector.broadcast %cst_14 : f32 to vector<36x1xf32>
    %23 = arith.addf %21, %22 : vector<36x1xf32>
    %24 = math.rsqrt %23 : vector<36x1xf32>
    %25 = vector.broadcast %24 : vector<36x1xf32> to vector<36x32xf32>
    %26 = arith.mulf %16, %25 : vector<36x32xf32>
    %27 = vector.broadcast %9 : vector<1x32xf32> to vector<36x32xf32>
    %28 = arith.mulf %26, %27 : vector<36x32xf32>
    %29 = vector.broadcast %10 : vector<1x32xf32> to vector<36x32xf32>
    %30 = arith.addf %28, %29 : vector<36x32xf32>
    %c0_15 = arith.constant 0 : index
    %c0_16 = arith.constant 0 : index
    %c0_17 = arith.constant 0 : index
    %31 = vector.load %arg6[%c0_15, %c0_16, %c0_17] : memref<1x36x32xf32, #tpu.memory_space<vmem>>, vector<1x36x32xf32>
    %32 = vector.shape_cast %31 : vector<1x36x32xf32> to vector<36x32xf32>
    %33 = vector.shape_cast %30 : vector<36x32xf32> to vector<1x36x32xf32>
    tpu.vector_store %arg6[%c0_15, %c0_16, %c0_17], %33 {strides = array<i32>} : memref<1x36x32xf32, #tpu.memory_space<vmem>>, vector<1x36x32xf32>,
    return
  }
  func.func @transform_0(%arg0: i32) -> (i32, i32, i32) {
    %c0_i32 = arith.constant 0 : i32
    %c0_i32_0 = arith.constant 0 : i32
    %c0_i32_1 = arith.constant 0 : i32
    return %arg0, %c0_i32, %c0_i32_0 : i32, i32, i32
  }
  func.func @transform_1(%arg0: i32) -> (i32, i32) {
    %c0_i32 = arith.constant 0 : i32
    %c0_i32_0 = arith.constant 0 : i32
    %c0_i32_1 = arith.constant 0 : i32
    return %c0_i32, %c0_i32_0 : i32, i32
  }
  func.func @transform_2(%arg0: i32) -> (i32, i32) {
    %c0_i32 = arith.constant 0 : i32
    %c0_i32_0 = arith.constant 0 : i32
    %c0_i32_1 = arith.constant 0 : i32
    return %c0_i32, %c0_i32_0 : i32, i32
  }
  func.func @transform_3(%arg0: i32) -> (i32, i32) {
    %c0_i32 = arith.constant 0 : i32
    %c0_i32_0 = arith.constant 0 : i32
    %c0_i32_1 = arith.constant 0 : i32
    return %c0_i32, %c0_i32_0 : i32, i32
  }
  func.func @transform_4(%arg0: i32) -> (i32, i32) {
    %c0_i32 = arith.constant 0 : i32
    %c0_i32_0 = arith.constant 0 : i32
    %c0_i32_1 = arith.constant 0 : i32
    return %c0_i32, %c0_i32_0 : i32, i32
  }
  func.func @transform_5(%arg0: i32) -> (i32, i32, i32) {
    %c0_i32 = arith.constant 0 : i32
    %c0_i32_0 = arith.constant 0 : i32
    %c0_i32_1 = arith.constant 0 : i32
    return %arg0, %c0_i32, %c0_i32_0 : i32, i32, i32
  }
}

module attributes {stable_mosaic.version = 11 : i64} {
  func.func @_attn_block_kernel(%arg0: i32, %arg1: memref<1x36x32xf32, #tpu.memory_space<vmem>>, %arg2: memref<9x53x36xf32, #tpu.memory_space<vmem>>, %arg3: memref<9x53x32xf32, #tpu.memory_space<vmem>>, %arg4: memref<53x32xf32, #tpu.memory_space<vmem>>, %arg5: memref<1x32xf32, #tpu.memory_space<vmem>>, %arg6: memref<1x32xf32, #tpu.memory_space<vmem>>, %arg7: memref<1x32xf32, #tpu.memory_space<vmem>>, %arg8: memref<1x32xf32, #tpu.memory_space<vmem>>, %arg9: memref<2x32x16xf32, #tpu.memory_space<vmem>>, %arg10: memref<2x1x16xf32, #tpu.memory_space<vmem>>, %arg11: memref<2x32x16xf32, #tpu.memory_space<vmem>>, %arg12: memref<2x1x16xf32, #tpu.memory_space<vmem>>, %arg13: memref<2x32x16xf32, #tpu.memory_space<vmem>>, %arg14: memref<2x1x16xf32, #tpu.memory_space<vmem>>, %arg15: memref<2x16x32xf32, #tpu.memory_space<vmem>>, %arg16: memref<1x32xf32, #tpu.memory_space<vmem>>, %arg17: memref<1x36x32xf32, #tpu.memory_space<vmem>>) attributes {dimension_semantics = [#tpu.dimension_semantics<parallel>], iteration_bounds = array<i64: 2>, scalar_prefetch = 0 : i64, scratch_operands = 0 : i64, tpu.core_type = #tpu.core_type<tc>, window_params = [{transform_indices = @transform_0, window_bounds = array<i64: 1, 36, 32>}, {pipeline_mode = #tpu.pipeline_mode<synchronous>, transform_indices = @transform_1, window_bounds = array<i64: 9, 53, 36>}, {pipeline_mode = #tpu.pipeline_mode<synchronous>, transform_indices = @transform_2, window_bounds = array<i64: 9, 53, 32>}, {pipeline_mode = #tpu.pipeline_mode<synchronous>, transform_indices = @transform_3, window_bounds = array<i64: 53, 32>}, {pipeline_mode = #tpu.pipeline_mode<synchronous>, transform_indices = @transform_4, window_bounds = array<i64: 1, 32>}, {pipeline_mode = #tpu.pipeline_mode<synchronous>, transform_indices = @transform_5, window_bounds = array<i64: 1, 32>}, {pipeline_mode = #tpu.pipeline_mode<synchronous>, transform_indices = @transform_6, window_bounds = array<i64: 1, 32>}, {pipeline_mode = #tpu.pipeline_mode<synchronous>, transform_indices = @transform_7, window_bounds = array<i64: 1, 32>}, {pipeline_mode = #tpu.pipeline_mode<synchronous>, transform_indices = @transform_8, window_bounds = array<i64: 2, 32, 16>}, {pipeline_mode = #tpu.pipeline_mode<synchronous>, transform_indices = @transform_9, window_bounds = array<i64: 2, 1, 16>}, {pipeline_mode = #tpu.pipeline_mode<synchronous>, transform_indices = @transform_10, window_bounds = array<i64: 2, 32, 16>}, {pipeline_mode = #tpu.pipeline_mode<synchronous>, transform_indices = @transform_11, window_bounds = array<i64: 2, 1, 16>}, {pipeline_mode = #tpu.pipeline_mode<synchronous>, transform_indices = @transform_12, window_bounds = array<i64: 2, 32, 16>}, {pipeline_mode = #tpu.pipeline_mode<synchronous>, transform_indices = @transform_13, window_bounds = array<i64: 2, 1, 16>}, {pipeline_mode = #tpu.pipeline_mode<synchronous>, transform_indices = @transform_14, window_bounds = array<i64: 2, 16, 32>}, {pipeline_mode = #tpu.pipeline_mode<synchronous>, transform_indices = @transform_15, window_bounds = array<i64: 1, 32>}, {transform_indices = @transform_16, window_bounds = array<i64: 1, 36, 32>}]} {
    %c0 = arith.constant 0 : index
    %c0_0 = arith.constant 0 : index
    %c0_1 = arith.constant 0 : index
    %0 = vector.load %arg1[%c0, %c0_0, %c0_1] : memref<1x36x32xf32, #tpu.memory_space<vmem>>, vector<1x36x32xf32>
    %1 = vector.shape_cast %0 : vector<1x36x32xf32> to vector<36x32xf32>
    %c0_2 = arith.constant 0 : index
    %c0_3 = arith.constant 0 : index
    %2 = vector.load %arg5[%c0_2, %c0_3] : memref<1x32xf32, #tpu.memory_space<vmem>>, vector<1x32xf32>
    %c0_4 = arith.constant 0 : index
    %c0_5 = arith.constant 0 : index
    %3 = vector.load %arg6[%c0_4, %c0_5] : memref<1x32xf32, #tpu.memory_space<vmem>>, vector<1x32xf32>
    %cst = arith.constant dense<0.000000e+00> : vector<36xf32>
    %4 = vector.multi_reduction <add>, %1, %cst [1] : vector<36x32xf32> to vector<36xf32>
    %5 = vector.shape_cast %4 : vector<36xf32> to vector<36x1xf32>
    %cst_6 = arith.constant 3.200000e+01 : f32
    %6 = vector.broadcast %cst_6 : f32 to vector<36x1xf32>
    %7 = arith.divf %5, %6 : vector<36x1xf32>
    %8 = vector.broadcast %7 : vector<36x1xf32> to vector<36x32xf32>
    %9 = arith.subf %1, %8 : vector<36x32xf32>
    %10 = arith.mulf %9, %9 : vector<36x32xf32>
    %cst_7 = arith.constant dense<0.000000e+00> : vector<36xf32>
    %11 = vector.multi_reduction <add>, %10, %cst_7 [1] : vector<36x32xf32> to vector<36xf32>
    %12 = vector.shape_cast %11 : vector<36xf32> to vector<36x1xf32>
    %cst_8 = arith.constant 3.200000e+01 : f32
    %13 = vector.broadcast %cst_8 : f32 to vector<36x1xf32>
    %14 = arith.divf %12, %13 : vector<36x1xf32>
    %cst_9 = arith.constant 9.99999997E-7 : f32
    %15 = vector.broadcast %cst_9 : f32 to vector<36x1xf32>
    %16 = arith.addf %14, %15 : vector<36x1xf32>
    %17 = math.rsqrt %16 : vector<36x1xf32>
    %18 = vector.broadcast %17 : vector<36x1xf32> to vector<36x32xf32>
    %19 = arith.mulf %9, %18 : vector<36x32xf32>
    %20 = vector.broadcast %2 : vector<1x32xf32> to vector<36x32xf32>
    %21 = arith.mulf %19, %20 : vector<36x32xf32>
    %22 = vector.broadcast %3 : vector<1x32xf32> to vector<36x32xf32>
    %23 = arith.addf %21, %22 : vector<36x32xf32>
    %c4 = arith.constant 4 : index
    %c0_10 = arith.constant 0 : index
    %c0_11 = arith.constant 0 : index
    %24 = vector.load %arg2[%c4, %c0_10, %c0_11] : memref<9x53x36xf32, #tpu.memory_space<vmem>>, vector<1x53x36xf32>
    %25 = vector.shape_cast %24 : vector<1x53x36xf32> to vector<53x36xf32>
    %cst_12 = arith.constant dense<0.000000e+00> : vector<53x32xf32>
    %26 = tpu.matmul %25, %23, %cst_12 {dimension_numbers = #tpu.dot_dimension_numbers<[1], [0], [0], [1], [0, 0, 1, 1], [], []>} : vector<53x36xf32>, vector<36x32xf32>, vector<53x32xf32> -> vector<53x32xf32>
    %c0_13 = arith.constant 0 : index
    %c0_14 = arith.constant 0 : index
    %27 = vector.load %arg4[%c0_13, %c0_14] : memref<53x32xf32, #tpu.memory_space<vmem>>, vector<53x32xf32>
    %28 = arith.addf %26, %27 : vector<53x32xf32>
    %c0_15 = arith.constant 0 : index
    %c0_16 = arith.constant 0 : index
    %c0_17 = arith.constant 0 : index
    %29 = vector.load %arg2[%c0_15, %c0_16, %c0_17] : memref<9x53x36xf32, #tpu.memory_space<vmem>>, vector<1x53x36xf32>
    %30 = vector.shape_cast %29 : vector<1x53x36xf32> to vector<53x36xf32>
    %cst_18 = arith.constant dense<0.000000e+00> : vector<53x32xf32>
    %31 = tpu.matmul %30, %23, %cst_18 {dimension_numbers = #tpu.dot_dimension_numbers<[1], [0], [0], [1], [0, 0, 1, 1], [], []>} : vector<53x36xf32>, vector<36x32xf32>, vector<53x32xf32> -> vector<53x32xf32>
    %c0_19 = arith.constant 0 : index
    %c0_20 = arith.constant 0 : index
    %c0_21 = arith.constant 0 : index
    %32 = vector.load %arg3[%c0_19, %c0_20, %c0_21] : memref<9x53x32xf32, #tpu.memory_space<vmem>>, vector<1x53x32xf32>
    %33 = vector.shape_cast %32 : vector<1x53x32xf32> to vector<53x32xf32>
    %34 = arith.mulf %31, %33 : vector<53x32xf32>
    %35 = arith.addf %28, %34 : vector<53x32xf32>
    %c1 = arith.constant 1 : index
    %c0_22 = arith.constant 0 : index
    %c0_23 = arith.constant 0 : index
    %36 = vector.load %arg2[%c1, %c0_22, %c0_23] : memref<9x53x36xf32, #tpu.memory_space<vmem>>, vector<1x53x36xf32>
    %37 = vector.shape_cast %36 : vector<1x53x36xf32> to vector<53x36xf32>
    %cst_24 = arith.constant dense<0.000000e+00> : vector<53x32xf32>
    %38 = tpu.matmul %37, %23, %cst_24 {dimension_numbers = #tpu.dot_dimension_numbers<[1], [0], [0], [1], [0, 0, 1, 1], [], []>} : vector<53x36xf32>, vector<36x32xf32>, vector<53x32xf32> -> vector<53x32xf32>
    %c1_25 = arith.constant 1 : index
    %c0_26 = arith.constant 0 : index
    %c0_27 = arith.constant 0 : index
    %39 = vector.load %arg3[%c1_25, %c0_26, %c0_27] : memref<9x53x32xf32, #tpu.memory_space<vmem>>, vector<1x53x32xf32>
    %40 = vector.shape_cast %39 : vector<1x53x32xf32> to vector<53x32xf32>
    %41 = arith.mulf %38, %40 : vector<53x32xf32>
    %42 = arith.addf %35, %41 : vector<53x32xf32>
    %c2 = arith.constant 2 : index
    %c0_28 = arith.constant 0 : index
    %c0_29 = arith.constant 0 : index
    %43 = vector.load %arg2[%c2, %c0_28, %c0_29] : memref<9x53x36xf32, #tpu.memory_space<vmem>>, vector<1x53x36xf32>
    %44 = vector.shape_cast %43 : vector<1x53x36xf32> to vector<53x36xf32>
    %cst_30 = arith.constant dense<0.000000e+00> : vector<53x32xf32>
    %45 = tpu.matmul %44, %23, %cst_30 {dimension_numbers = #tpu.dot_dimension_numbers<[1], [0], [0], [1], [0, 0, 1, 1], [], []>} : vector<53x36xf32>, vector<36x32xf32>, vector<53x32xf32> -> vector<53x32xf32>
    %c2_31 = arith.constant 2 : index
    %c0_32 = arith.constant 0 : index
    %c0_33 = arith.constant 0 : index
    %46 = vector.load %arg3[%c2_31, %c0_32, %c0_33] : memref<9x53x32xf32, #tpu.memory_space<vmem>>, vector<1x53x32xf32>
    %47 = vector.shape_cast %46 : vector<1x53x32xf32> to vector<53x32xf32>
    %48 = arith.mulf %45, %47 : vector<53x32xf32>
    %49 = arith.addf %42, %48 : vector<53x32xf32>
    %c3 = arith.constant 3 : index
    %c0_34 = arith.constant 0 : index
    %c0_35 = arith.constant 0 : index
    %50 = vector.load %arg2[%c3, %c0_34, %c0_35] : memref<9x53x36xf32, #tpu.memory_space<vmem>>, vector<1x53x36xf32>
    %51 = vector.shape_cast %50 : vector<1x53x36xf32> to vector<53x36xf32>
    %cst_36 = arith.constant dense<0.000000e+00> : vector<53x32xf32>
    %52 = tpu.matmul %51, %23, %cst_36 {dimension_numbers = #tpu.dot_dimension_numbers<[1], [0], [0], [1], [0, 0, 1, 1], [], []>} : vector<53x36xf32>, vector<36x32xf32>, vector<53x32xf32> -> vector<53x32xf32>
    %c3_37 = arith.constant 3 : index
    %c0_38 = arith.constant 0 : index
    %c0_39 = arith.constant 0 : index
    %53 = vector.load %arg3[%c3_37, %c0_38, %c0_39] : memref<9x53x32xf32, #tpu.memory_space<vmem>>, vector<1x53x32xf32>
    %54 = vector.shape_cast %53 : vector<1x53x32xf32> to vector<53x32xf32>
    %55 = arith.mulf %52, %54 : vector<53x32xf32>
    %56 = arith.addf %49, %55 : vector<53x32xf32>
    %c4_40 = arith.constant 4 : index
    %c0_41 = arith.constant 0 : index
    %c0_42 = arith.constant 0 : index
    %57 = vector.load %arg2[%c4_40, %c0_41, %c0_42] : memref<9x53x36xf32, #tpu.memory_space<vmem>>, vector<1x53x36xf32>
    %58 = vector.shape_cast %57 : vector<1x53x36xf32> to vector<53x36xf32>
    %cst_43 = arith.constant dense<0.000000e+00> : vector<53x32xf32>
    %59 = tpu.matmul %58, %23, %cst_43 {dimension_numbers = #tpu.dot_dimension_numbers<[1], [0], [0], [1], [0, 0, 1, 1], [], []>} : vector<53x36xf32>, vector<36x32xf32>, vector<53x32xf32> -> vector<53x32xf32>
    %c4_44 = arith.constant 4 : index
    %c0_45 = arith.constant 0 : index
    %c0_46 = arith.constant 0 : index
    %60 = vector.load %arg3[%c4_44, %c0_45, %c0_46] : memref<9x53x32xf32, #tpu.memory_space<vmem>>, vector<1x53x32xf32>
    %61 = vector.shape_cast %60 : vector<1x53x32xf32> to vector<53x32xf32>
    %62 = arith.mulf %59, %61 : vector<53x32xf32>
    %63 = arith.addf %56, %62 : vector<53x32xf32>
    %c5 = arith.constant 5 : index
    %c0_47 = arith.constant 0 : index
    %c0_48 = arith.constant 0 : index
    %64 = vector.load %arg2[%c5, %c0_47, %c0_48] : memref<9x53x36xf32, #tpu.memory_space<vmem>>, vector<1x53x36xf32>
    %65 = vector.shape_cast %64 : vector<1x53x36xf32> to vector<53x36xf32>
    %cst_49 = arith.constant dense<0.000000e+00> : vector<53x32xf32>
    %66 = tpu.matmul %65, %23, %cst_49 {dimension_numbers = #tpu.dot_dimension_numbers<[1], [0], [0], [1], [0, 0, 1, 1], [], []>} : vector<53x36xf32>, vector<36x32xf32>, vector<53x32xf32> -> vector<53x32xf32>
    %c5_50 = arith.constant 5 : index
    %c0_51 = arith.constant 0 : index
    %c0_52 = arith.constant 0 : index
    %67 = vector.load %arg3[%c5_50, %c0_51, %c0_52] : memref<9x53x32xf32, #tpu.memory_space<vmem>>, vector<1x53x32xf32>
    %68 = vector.shape_cast %67 : vector<1x53x32xf32> to vector<53x32xf32>
    %69 = arith.mulf %66, %68 : vector<53x32xf32>
    %70 = arith.addf %63, %69 : vector<53x32xf32>
    %c6 = arith.constant 6 : index
    %c0_53 = arith.constant 0 : index
    %c0_54 = arith.constant 0 : index
    %71 = vector.load %arg2[%c6, %c0_53, %c0_54] : memref<9x53x36xf32, #tpu.memory_space<vmem>>, vector<1x53x36xf32>
    %72 = vector.shape_cast %71 : vector<1x53x36xf32> to vector<53x36xf32>
    %cst_55 = arith.constant dense<0.000000e+00> : vector<53x32xf32>
    %73 = tpu.matmul %72, %23, %cst_55 {dimension_numbers = #tpu.dot_dimension_numbers<[1], [0], [0], [1], [0, 0, 1, 1], [], []>} : vector<53x36xf32>, vector<36x32xf32>, vector<53x32xf32> -> vector<53x32xf32>
    %c6_56 = arith.constant 6 : index
    %c0_57 = arith.constant 0 : index
    %c0_58 = arith.constant 0 : index
    %74 = vector.load %arg3[%c6_56, %c0_57, %c0_58] : memref<9x53x32xf32, #tpu.memory_space<vmem>>, vector<1x53x32xf32>
    %75 = vector.shape_cast %74 : vector<1x53x32xf32> to vector<53x32xf32>
    %76 = arith.mulf %73, %75 : vector<53x32xf32>
    %77 = arith.addf %70, %76 : vector<53x32xf32>
    %c7 = arith.constant 7 : index
    %c0_59 = arith.constant 0 : index
    %c0_60 = arith.constant 0 : index
    %78 = vector.load %arg2[%c7, %c0_59, %c0_60] : memref<9x53x36xf32, #tpu.memory_space<vmem>>, vector<1x53x36xf32>
    %79 = vector.shape_cast %78 : vector<1x53x36xf32> to vector<53x36xf32>
    %cst_61 = arith.constant dense<0.000000e+00> : vector<53x32xf32>
    %80 = tpu.matmul %79, %23, %cst_61 {dimension_numbers = #tpu.dot_dimension_numbers<[1], [0], [0], [1], [0, 0, 1, 1], [], []>} : vector<53x36xf32>, vector<36x32xf32>, vector<53x32xf32> -> vector<53x32xf32>
    %c7_62 = arith.constant 7 : index
    %c0_63 = arith.constant 0 : index
    %c0_64 = arith.constant 0 : index
    %81 = vector.load %arg3[%c7_62, %c0_63, %c0_64] : memref<9x53x32xf32, #tpu.memory_space<vmem>>, vector<1x53x32xf32>
    %82 = vector.shape_cast %81 : vector<1x53x32xf32> to vector<53x32xf32>
    %83 = arith.mulf %80, %82 : vector<53x32xf32>
    %84 = arith.addf %77, %83 : vector<53x32xf32>
    %c8 = arith.constant 8 : index
    %c0_65 = arith.constant 0 : index
    %c0_66 = arith.constant 0 : index
    %85 = vector.load %arg2[%c8, %c0_65, %c0_66] : memref<9x53x36xf32, #tpu.memory_space<vmem>>, vector<1x53x36xf32>
    %86 = vector.shape_cast %85 : vector<1x53x36xf32> to vector<53x36xf32>
    %cst_67 = arith.constant dense<0.000000e+00> : vector<53x32xf32>
    %87 = tpu.matmul %86, %23, %cst_67 {dimension_numbers = #tpu.dot_dimension_numbers<[1], [0], [0], [1], [0, 0, 1, 1], [], []>} : vector<53x36xf32>, vector<36x32xf32>, vector<53x32xf32> -> vector<53x32xf32>
    %c8_68 = arith.constant 8 : index
    %c0_69 = arith.constant 0 : index
    %c0_70 = arith.constant 0 : index
    %88 = vector.load %arg3[%c8_68, %c0_69, %c0_70] : memref<9x53x32xf32, #tpu.memory_space<vmem>>, vector<1x53x32xf32>
    %89 = vector.shape_cast %88 : vector<1x53x32xf32> to vector<53x32xf32>
    %90 = arith.mulf %87, %89 : vector<53x32xf32>
    %91 = arith.addf %84, %90 : vector<53x32xf32>
    %c0_71 = arith.constant 0 : index
    %c0_72 = arith.constant 0 : index
    %92 = vector.load %arg7[%c0_71, %c0_72] : memref<1x32xf32, #tpu.memory_space<vmem>>, vector<1x32xf32>
    %c0_73 = arith.constant 0 : index
    %c0_74 = arith.constant 0 : index
    %93 = vector.load %arg8[%c0_73, %c0_74] : memref<1x32xf32, #tpu.memory_space<vmem>>, vector<1x32xf32>
    %cst_75 = arith.constant dense<0.000000e+00> : vector<53xf32>
    %94 = vector.multi_reduction <add>, %91, %cst_75 [1] : vector<53x32xf32> to vector<53xf32>
    %95 = vector.shape_cast %94 : vector<53xf32> to vector<53x1xf32>
    %cst_76 = arith.constant 3.200000e+01 : f32
    %96 = vector.broadcast %cst_76 : f32 to vector<53x1xf32>
    %97 = arith.divf %95, %96 : vector<53x1xf32>
    %98 = vector.broadcast %97 : vector<53x1xf32> to vector<53x32xf32>
    %99 = arith.subf %91, %98 : vector<53x32xf32>
    %100 = arith.mulf %99, %99 : vector<53x32xf32>
    %cst_77 = arith.constant dense<0.000000e+00> : vector<53xf32>
    %101 = vector.multi_reduction <add>, %100, %cst_77 [1] : vector<53x32xf32> to vector<53xf32>
    %102 = vector.shape_cast %101 : vector<53xf32> to vector<53x1xf32>
    %cst_78 = arith.constant 3.200000e+01 : f32
    %103 = vector.broadcast %cst_78 : f32 to vector<53x1xf32>
    %104 = arith.divf %102, %103 : vector<53x1xf32>
    %cst_79 = arith.constant 9.99999974E-6 : f32
    %105 = vector.broadcast %cst_79 : f32 to vector<53x1xf32>
    %106 = arith.addf %104, %105 : vector<53x1xf32>
    %107 = math.rsqrt %106 : vector<53x1xf32>
    %108 = vector.broadcast %107 : vector<53x1xf32> to vector<53x32xf32>
    %109 = arith.mulf %99, %108 : vector<53x32xf32>
    %110 = vector.broadcast %92 : vector<1x32xf32> to vector<53x32xf32>
    %111 = arith.mulf %109, %110 : vector<53x32xf32>
    %112 = vector.broadcast %93 : vector<1x32xf32> to vector<53x32xf32>
    %113 = arith.addf %111, %112 : vector<53x32xf32>
    %c0_80 = arith.constant 0 : index
    %c0_81 = arith.constant 0 : index
    %114 = vector.load %arg16[%c0_80, %c0_81] : memref<1x32xf32, #tpu.memory_space<vmem>>, vector<1x32xf32>
    %115 = vector.broadcast %114 : vector<1x32xf32> to vector<36x32xf32>
    %116 = arith.addf %1, %115 : vector<36x32xf32>
    %c0_82 = arith.constant 0 : index
    %c0_83 = arith.constant 0 : index
    %c0_84 = arith.constant 0 : index
    %117 = vector.load %arg9[%c0_82, %c0_83, %c0_84] : memref<2x32x16xf32, #tpu.memory_space<vmem>>, vector<1x32x16xf32>
    %118 = vector.shape_cast %117 : vector<1x32x16xf32> to vector<32x16xf32>
    %119 = arith.truncf %23 : vector<36x32xf32> to vector<36x32xbf16>
    %120 = arith.truncf %118 : vector<32x16xf32> to vector<32x16xbf16>
    %cst_85 = arith.constant dense<0.000000e+00> : vector<36x16xf32>
    %121 = tpu.matmul %119, %120, %cst_85 {dimension_numbers = #tpu.dot_dimension_numbers<[1], [0], [0], [1], [0, 0, 1, 1], [], []>} : vector<36x32xbf16>, vector<32x16xbf16>, vector<36x16xf32> -> vector<36x16xf32>
    %c0_86 = arith.constant 0 : index
    %c0_87 = arith.constant 0 : index
    %c0_88 = arith.constant 0 : index
    %122 = vector.load %arg10[%c0_86, %c0_87, %c0_88] : memref<2x1x16xf32, #tpu.memory_space<vmem>>, vector<1x1x16xf32>
    %123 = vector.shape_cast %122 : vector<1x1x16xf32> to vector<1x16xf32>
    %124 = vector.broadcast %123 : vector<1x16xf32> to vector<36x16xf32>
    %125 = arith.addf %121, %124 : vector<36x16xf32>
    %c0_89 = arith.constant 0 : index
    %c0_90 = arith.constant 0 : index
    %c0_91 = arith.constant 0 : index
    %126 = vector.load %arg11[%c0_89, %c0_90, %c0_91] : memref<2x32x16xf32, #tpu.memory_space<vmem>>, vector<1x32x16xf32>
    %127 = vector.shape_cast %126 : vector<1x32x16xf32> to vector<32x16xf32>
    %128 = arith.truncf %113 : vector<53x32xf32> to vector<53x32xbf16>
    %129 = arith.truncf %127 : vector<32x16xf32> to vector<32x16xbf16>
    %cst_92 = arith.constant dense<0.000000e+00> : vector<53x16xf32>
    %130 = tpu.matmul %128, %129, %cst_92 {dimension_numbers = #tpu.dot_dimension_numbers<[1], [0], [0], [1], [0, 0, 1, 1], [], []>} : vector<53x32xbf16>, vector<32x16xbf16>, vector<53x16xf32> -> vector<53x16xf32>
    %c0_93 = arith.constant 0 : index
    %c0_94 = arith.constant 0 : index
    %c0_95 = arith.constant 0 : index
    %131 = vector.load %arg12[%c0_93, %c0_94, %c0_95] : memref<2x1x16xf32, #tpu.memory_space<vmem>>, vector<1x1x16xf32>
    %132 = vector.shape_cast %131 : vector<1x1x16xf32> to vector<1x16xf32>
    %133 = vector.broadcast %132 : vector<1x16xf32> to vector<53x16xf32>
    %134 = arith.addf %130, %133 : vector<53x16xf32>
    %c0_96 = arith.constant 0 : index
    %c0_97 = arith.constant 0 : index
    %c0_98 = arith.constant 0 : index
    %135 = vector.load %arg13[%c0_96, %c0_97, %c0_98] : memref<2x32x16xf32, #tpu.memory_space<vmem>>, vector<1x32x16xf32>
    %136 = vector.shape_cast %135 : vector<1x32x16xf32> to vector<32x16xf32>
    %137 = arith.truncf %113 : vector<53x32xf32> to vector<53x32xbf16>
    %138 = arith.truncf %136 : vector<32x16xf32> to vector<32x16xbf16>
    %cst_99 = arith.constant dense<0.000000e+00> : vector<53x16xf32>
    %139 = tpu.matmul %137, %138, %cst_99 {dimension_numbers = #tpu.dot_dimension_numbers<[1], [0], [0], [1], [0, 0, 1, 1], [], []>} : vector<53x32xbf16>, vector<32x16xbf16>, vector<53x16xf32> -> vector<53x16xf32>
    %c0_100 = arith.constant 0 : index
    %c0_101 = arith.constant 0 : index
    %c0_102 = arith.constant 0 : index
    %140 = vector.load %arg14[%c0_100, %c0_101, %c0_102] : memref<2x1x16xf32, #tpu.memory_space<vmem>>, vector<1x1x16xf32>
    %141 = vector.shape_cast %140 : vector<1x1x16xf32> to vector<1x16xf32>
    %142 = vector.broadcast %141 : vector<1x16xf32> to vector<53x16xf32>
    %143 = arith.addf %139, %142 : vector<53x16xf32>
    %144 = arith.truncf %125 : vector<36x16xf32> to vector<36x16xbf16>
    %145 = arith.truncf %134 : vector<53x16xf32> to vector<53x16xbf16>
    %cst_103 = arith.constant dense<0.000000e+00> : vector<36x53xf32>
    %146 = tpu.matmul %144, %145, %cst_103 {dimension_numbers = #tpu.dot_dimension_numbers<[1], [1], [0], [0], [0, 0, 1, 0], [], []>} : vector<36x16xbf16>, vector<53x16xbf16>, vector<36x53xf32> -> vector<36x53xf32>
    %cst_104 = arith.constant 2.500000e-01 : f32
    %147 = vector.broadcast %cst_104 : f32 to vector<36x53xf32>
    %148 = arith.mulf %146, %147 : vector<36x53xf32>
    %cst_105 = arith.constant dense<0xFF800000> : vector<36xf32>
    %149 = vector.multi_reduction <maximumf>, %148, %cst_105 [1] : vector<36x53xf32> to vector<36xf32>
    %150 = vector.shape_cast %149 : vector<36xf32> to vector<36x1xf32>
    %151 = vector.broadcast %150 : vector<36x1xf32> to vector<36x53xf32>
    %152 = arith.subf %148, %151 : vector<36x53xf32>
    %153 = math.exp %152 : vector<36x53xf32>
    %cst_106 = arith.constant dense<0.000000e+00> : vector<36xf32>
    %154 = vector.multi_reduction <add>, %153, %cst_106 [1] : vector<36x53xf32> to vector<36xf32>
    %155 = vector.shape_cast %154 : vector<36xf32> to vector<36x1xf32>
    %156 = tpu.reciprocal %155 {approx = true} : vector<36x1xf32> -> vector<36x1xf32>
    %157 = vector.broadcast %156 : vector<36x1xf32> to vector<36x53xf32>
    %158 = arith.mulf %153, %157 : vector<36x53xf32>
    %159 = arith.truncf %158 : vector<36x53xf32> to vector<36x53xbf16>
    %160 = arith.truncf %143 : vector<53x16xf32> to vector<53x16xbf16>
    %cst_107 = arith.constant dense<0.000000e+00> : vector<36x16xf32>
    %161 = tpu.matmul %159, %160, %cst_107 {dimension_numbers = #tpu.dot_dimension_numbers<[1], [0], [0], [1], [0, 0, 1, 1], [], []>} : vector<36x53xbf16>, vector<53x16xbf16>, vector<36x16xf32> -> vector<36x16xf32>
    %c0_108 = arith.constant 0 : index
    %c0_109 = arith.constant 0 : index
    %c0_110 = arith.constant 0 : index
    %162 = vector.load %arg15[%c0_108, %c0_109, %c0_110] : memref<2x16x32xf32, #tpu.memory_space<vmem>>, vector<1x16x32xf32>
    %163 = vector.shape_cast %162 : vector<1x16x32xf32> to vector<16x32xf32>
    %164 = arith.truncf %161 : vector<36x16xf32> to vector<36x16xbf16>
    %165 = arith.truncf %163 : vector<16x32xf32> to vector<16x32xbf16>
    %cst_111 = arith.constant dense<0.000000e+00> : vector<36x32xf32>
    %166 = tpu.matmul %164, %165, %cst_111 {dimension_numbers = #tpu.dot_dimension_numbers<[1], [0], [0], [1], [0, 0, 1, 1], [], []>} : vector<36x16xbf16>, vector<16x32xbf16>, vector<36x32xf32> -> vector<36x32xf32>
    %167 = arith.addf %116, %166 : vector<36x32xf32>
    %c1_112 = arith.constant 1 : index
    %c0_113 = arith.constant 0 : index
    %c0_114 = arith.constant 0 : index
    %168 = vector.load %arg9[%c1_112, %c0_113, %c0_114] : memref<2x32x16xf32, #tpu.memory_space<vmem>>, vector<1x32x16xf32>
    %169 = vector.shape_cast %168 : vector<1x32x16xf32> to vector<32x16xf32>
    %170 = arith.truncf %23 : vector<36x32xf32> to vector<36x32xbf16>
    %171 = arith.truncf %169 : vector<32x16xf32> to vector<32x16xbf16>
    %cst_115 = arith.constant dense<0.000000e+00> : vector<36x16xf32>
    %172 = tpu.matmul %170, %171, %cst_115 {dimension_numbers = #tpu.dot_dimension_numbers<[1], [0], [0], [1], [0, 0, 1, 1], [], []>} : vector<36x32xbf16>, vector<32x16xbf16>, vector<36x16xf32> -> vector<36x16xf32>
    %c1_116 = arith.constant 1 : index
    %c0_117 = arith.constant 0 : index
    %c0_118 = arith.constant 0 : index
    %173 = vector.load %arg10[%c1_116, %c0_117, %c0_118] : memref<2x1x16xf32, #tpu.memory_space<vmem>>, vector<1x1x16xf32>
    %174 = vector.shape_cast %173 : vector<1x1x16xf32> to vector<1x16xf32>
    %175 = vector.broadcast %174 : vector<1x16xf32> to vector<36x16xf32>
    %176 = arith.addf %172, %175 : vector<36x16xf32>
    %c1_119 = arith.constant 1 : index
    %c0_120 = arith.constant 0 : index
    %c0_121 = arith.constant 0 : index
    %177 = vector.load %arg11[%c1_119, %c0_120, %c0_121] : memref<2x32x16xf32, #tpu.memory_space<vmem>>, vector<1x32x16xf32>
    %178 = vector.shape_cast %177 : vector<1x32x16xf32> to vector<32x16xf32>
    %179 = arith.truncf %113 : vector<53x32xf32> to vector<53x32xbf16>
    %180 = arith.truncf %178 : vector<32x16xf32> to vector<32x16xbf16>
    %cst_122 = arith.constant dense<0.000000e+00> : vector<53x16xf32>
    %181 = tpu.matmul %179, %180, %cst_122 {dimension_numbers = #tpu.dot_dimension_numbers<[1], [0], [0], [1], [0, 0, 1, 1], [], []>} : vector<53x32xbf16>, vector<32x16xbf16>, vector<53x16xf32> -> vector<53x16xf32>
    %c1_123 = arith.constant 1 : index
    %c0_124 = arith.constant 0 : index
    %c0_125 = arith.constant 0 : index
    %182 = vector.load %arg12[%c1_123, %c0_124, %c0_125] : memref<2x1x16xf32, #tpu.memory_space<vmem>>, vector<1x1x16xf32>
    %183 = vector.shape_cast %182 : vector<1x1x16xf32> to vector<1x16xf32>
    %184 = vector.broadcast %183 : vector<1x16xf32> to vector<53x16xf32>
    %185 = arith.addf %181, %184 : vector<53x16xf32>
    %c1_126 = arith.constant 1 : index
    %c0_127 = arith.constant 0 : index
    %c0_128 = arith.constant 0 : index
    %186 = vector.load %arg13[%c1_126, %c0_127, %c0_128] : memref<2x32x16xf32, #tpu.memory_space<vmem>>, vector<1x32x16xf32>
    %187 = vector.shape_cast %186 : vector<1x32x16xf32> to vector<32x16xf32>
    %188 = arith.truncf %113 : vector<53x32xf32> to vector<53x32xbf16>
    %189 = arith.truncf %187 : vector<32x16xf32> to vector<32x16xbf16>
    %cst_129 = arith.constant dense<0.000000e+00> : vector<53x16xf32>
    %190 = tpu.matmul %188, %189, %cst_129 {dimension_numbers = #tpu.dot_dimension_numbers<[1], [0], [0], [1], [0, 0, 1, 1], [], []>} : vector<53x32xbf16>, vector<32x16xbf16>, vector<53x16xf32> -> vector<53x16xf32>
    %c1_130 = arith.constant 1 : index
    %c0_131 = arith.constant 0 : index
    %c0_132 = arith.constant 0 : index
    %191 = vector.load %arg14[%c1_130, %c0_131, %c0_132] : memref<2x1x16xf32, #tpu.memory_space<vmem>>, vector<1x1x16xf32>
    %192 = vector.shape_cast %191 : vector<1x1x16xf32> to vector<1x16xf32>
    %193 = vector.broadcast %192 : vector<1x16xf32> to vector<53x16xf32>
    %194 = arith.addf %190, %193 : vector<53x16xf32>
    %195 = arith.truncf %176 : vector<36x16xf32> to vector<36x16xbf16>
    %196 = arith.truncf %185 : vector<53x16xf32> to vector<53x16xbf16>
    %cst_133 = arith.constant dense<0.000000e+00> : vector<36x53xf32>
    %197 = tpu.matmul %195, %196, %cst_133 {dimension_numbers = #tpu.dot_dimension_numbers<[1], [1], [0], [0], [0, 0, 1, 0], [], []>} : vector<36x16xbf16>, vector<53x16xbf16>, vector<36x53xf32> -> vector<36x53xf32>
    %cst_134 = arith.constant 2.500000e-01 : f32
    %198 = vector.broadcast %cst_134 : f32 to vector<36x53xf32>
    %199 = arith.mulf %197, %198 : vector<36x53xf32>
    %cst_135 = arith.constant dense<0xFF800000> : vector<36xf32>
    %200 = vector.multi_reduction <maximumf>, %199, %cst_135 [1] : vector<36x53xf32> to vector<36xf32>
    %201 = vector.shape_cast %200 : vector<36xf32> to vector<36x1xf32>
    %202 = vector.broadcast %201 : vector<36x1xf32> to vector<36x53xf32>
    %203 = arith.subf %199, %202 : vector<36x53xf32>
    %204 = math.exp %203 : vector<36x53xf32>
    %cst_136 = arith.constant dense<0.000000e+00> : vector<36xf32>
    %205 = vector.multi_reduction <add>, %204, %cst_136 [1] : vector<36x53xf32> to vector<36xf32>
    %206 = vector.shape_cast %205 : vector<36xf32> to vector<36x1xf32>
    %207 = tpu.reciprocal %206 {approx = true} : vector<36x1xf32> -> vector<36x1xf32>
    %208 = vector.broadcast %207 : vector<36x1xf32> to vector<36x53xf32>
    %209 = arith.mulf %204, %208 : vector<36x53xf32>
    %210 = arith.truncf %209 : vector<36x53xf32> to vector<36x53xbf16>
    %211 = arith.truncf %194 : vector<53x16xf32> to vector<53x16xbf16>
    %cst_137 = arith.constant dense<0.000000e+00> : vector<36x16xf32>
    %212 = tpu.matmul %210, %211, %cst_137 {dimension_numbers = #tpu.dot_dimension_numbers<[1], [0], [0], [1], [0, 0, 1, 1], [], []>} : vector<36x53xbf16>, vector<53x16xbf16>, vector<36x16xf32> -> vector<36x16xf32>
    %c1_138 = arith.constant 1 : index
    %c0_139 = arith.constant 0 : index
    %c0_140 = arith.constant 0 : index
    %213 = vector.load %arg15[%c1_138, %c0_139, %c0_140] : memref<2x16x32xf32, #tpu.memory_space<vmem>>, vector<1x16x32xf32>
    %214 = vector.shape_cast %213 : vector<1x16x32xf32> to vector<16x32xf32>
    %215 = arith.truncf %212 : vector<36x16xf32> to vector<36x16xbf16>
    %216 = arith.truncf %214 : vector<16x32xf32> to vector<16x32xbf16>
    %cst_141 = arith.constant dense<0.000000e+00> : vector<36x32xf32>
    %217 = tpu.matmul %215, %216, %cst_141 {dimension_numbers = #tpu.dot_dimension_numbers<[1], [0], [0], [1], [0, 0, 1, 1], [], []>} : vector<36x16xbf16>, vector<16x32xbf16>, vector<36x32xf32> -> vector<36x32xf32>
    %218 = arith.addf %167, %217 : vector<36x32xf32>
    %c0_142 = arith.constant 0 : index
    %c0_143 = arith.constant 0 : index
    %c0_144 = arith.constant 0 : index
    %219 = vector.load %arg17[%c0_142, %c0_143, %c0_144] : memref<1x36x32xf32, #tpu.memory_space<vmem>>, vector<1x36x32xf32>
    %220 = vector.shape_cast %219 : vector<1x36x32xf32> to vector<36x32xf32>
    %221 = vector.shape_cast %218 : vector<36x32xf32> to vector<1x36x32xf32>
    tpu.vector_store %arg17[%c0_142, %c0_143, %c0_144], %221 {strides = array<i32>} : memref<1x36x32xf32, #tpu.memory_space<vmem>>, vector<1x36x32xf32>,
    return
  }
  func.func @transform_0(%arg0: i32) -> (i32, i32, i32) {
    %c0_i32 = arith.constant 0 : i32
    %c0_i32_0 = arith.constant 0 : i32
    %c0_i32_1 = arith.constant 0 : i32
    return %arg0, %c0_i32, %c0_i32_0 : i32, i32, i32
  }
  func.func @transform_1(%arg0: i32) -> (i32, i32, i32) {
    %c0_i32 = arith.constant 0 : i32
    %c0_i32_0 = arith.constant 0 : i32
    %c0_i32_1 = arith.constant 0 : i32
    %c0_i32_2 = arith.constant 0 : i32
    return %c0_i32, %c0_i32_0, %c0_i32_1 : i32, i32, i32
  }
  func.func @transform_2(%arg0: i32) -> (i32, i32, i32) {
    %c0_i32 = arith.constant 0 : i32
    %c0_i32_0 = arith.constant 0 : i32
    %c0_i32_1 = arith.constant 0 : i32
    %c0_i32_2 = arith.constant 0 : i32
    return %c0_i32, %c0_i32_0, %c0_i32_1 : i32, i32, i32
  }
  func.func @transform_3(%arg0: i32) -> (i32, i32) {
    %c0_i32 = arith.constant 0 : i32
    %c0_i32_0 = arith.constant 0 : i32
    %c0_i32_1 = arith.constant 0 : i32
    return %c0_i32, %c0_i32_0 : i32, i32
  }
  func.func @transform_4(%arg0: i32) -> (i32, i32) {
    %c0_i32 = arith.constant 0 : i32
    %c0_i32_0 = arith.constant 0 : i32
    %c0_i32_1 = arith.constant 0 : i32
    return %c0_i32, %c0_i32_0 : i32, i32
  }
  func.func @transform_5(%arg0: i32) -> (i32, i32) {
    %c0_i32 = arith.constant 0 : i32
    %c0_i32_0 = arith.constant 0 : i32
    %c0_i32_1 = arith.constant 0 : i32
    return %c0_i32, %c0_i32_0 : i32, i32
  }
  func.func @transform_6(%arg0: i32) -> (i32, i32) {
    %c0_i32 = arith.constant 0 : i32
    %c0_i32_0 = arith.constant 0 : i32
    %c0_i32_1 = arith.constant 0 : i32
    return %c0_i32, %c0_i32_0 : i32, i32
  }
  func.func @transform_7(%arg0: i32) -> (i32, i32) {
    %c0_i32 = arith.constant 0 : i32
    %c0_i32_0 = arith.constant 0 : i32
    %c0_i32_1 = arith.constant 0 : i32
    return %c0_i32, %c0_i32_0 : i32, i32
  }
  func.func @transform_8(%arg0: i32) -> (i32, i32, i32) {
    %c0_i32 = arith.constant 0 : i32
    %c0_i32_0 = arith.constant 0 : i32
    %c0_i32_1 = arith.constant 0 : i32
    %c0_i32_2 = arith.constant 0 : i32
    return %c0_i32, %c0_i32_0, %c0_i32_1 : i32, i32, i32
  }
  func.func @transform_9(%arg0: i32) -> (i32, i32, i32) {
    %c0_i32 = arith.constant 0 : i32
    %c0_i32_0 = arith.constant 0 : i32
    %c0_i32_1 = arith.constant 0 : i32
    %c0_i32_2 = arith.constant 0 : i32
    return %c0_i32, %c0_i32_0, %c0_i32_1 : i32, i32, i32
  }
  func.func @transform_10(%arg0: i32) -> (i32, i32, i32) {
    %c0_i32 = arith.constant 0 : i32
    %c0_i32_0 = arith.constant 0 : i32
    %c0_i32_1 = arith.constant 0 : i32
    %c0_i32_2 = arith.constant 0 : i32
    return %c0_i32, %c0_i32_0, %c0_i32_1 : i32, i32, i32
  }
  func.func @transform_11(%arg0: i32) -> (i32, i32, i32) {
    %c0_i32 = arith.constant 0 : i32
    %c0_i32_0 = arith.constant 0 : i32
    %c0_i32_1 = arith.constant 0 : i32
    %c0_i32_2 = arith.constant 0 : i32
    return %c0_i32, %c0_i32_0, %c0_i32_1 : i32, i32, i32
  }
  func.func @transform_12(%arg0: i32) -> (i32, i32, i32) {
    %c0_i32 = arith.constant 0 : i32
    %c0_i32_0 = arith.constant 0 : i32
    %c0_i32_1 = arith.constant 0 : i32
    %c0_i32_2 = arith.constant 0 : i32
    return %c0_i32, %c0_i32_0, %c0_i32_1 : i32, i32, i32
  }
  func.func @transform_13(%arg0: i32) -> (i32, i32, i32) {
    %c0_i32 = arith.constant 0 : i32
    %c0_i32_0 = arith.constant 0 : i32
    %c0_i32_1 = arith.constant 0 : i32
    %c0_i32_2 = arith.constant 0 : i32
    return %c0_i32, %c0_i32_0, %c0_i32_1 : i32, i32, i32
  }
  func.func @transform_14(%arg0: i32) -> (i32, i32, i32) {
    %c0_i32 = arith.constant 0 : i32
    %c0_i32_0 = arith.constant 0 : i32
    %c0_i32_1 = arith.constant 0 : i32
    %c0_i32_2 = arith.constant 0 : i32
    return %c0_i32, %c0_i32_0, %c0_i32_1 : i32, i32, i32
  }
  func.func @transform_15(%arg0: i32) -> (i32, i32) {
    %c0_i32 = arith.constant 0 : i32
    %c0_i32_0 = arith.constant 0 : i32
    %c0_i32_1 = arith.constant 0 : i32
    return %c0_i32, %c0_i32_0 : i32, i32
  }
  func.func @transform_16(%arg0: i32) -> (i32, i32, i32) {
    %c0_i32 = arith.constant 0 : i32
    %c0_i32_0 = arith.constant 0 : i32
    %c0_i32_1 = arith.constant 0 : i32
    return %arg0, %c0_i32, %c0_i32_0 : i32, i32, i32
  }
}

module attributes {stable_mosaic.version = 11 : i64} {
  func.func @_irb_block_kernel(%arg0: i32, %arg1: memref<1x36x32xf32, #tpu.memory_space<vmem>>, %arg2: memref<9x36x36xf32, #tpu.memory_space<vmem>>, %arg3: memref<1x32xf32, #tpu.memory_space<vmem>>, %arg4: memref<1x32xf32, #tpu.memory_space<vmem>>, %arg5: memref<32x128xf32, #tpu.memory_space<vmem>>, %arg6: memref<1x128xf32, #tpu.memory_space<vmem>>, %arg7: memref<9x1x128xf32, #tpu.memory_space<vmem>>, %arg8: memref<1x128xf32, #tpu.memory_space<vmem>>, %arg9: memref<128x32xf32, #tpu.memory_space<vmem>>, %arg10: memref<1x32xf32, #tpu.memory_space<vmem>>, %arg11: memref<1x36x32xf32, #tpu.memory_space<vmem>>) attributes {dimension_semantics = [#tpu.dimension_semantics<parallel>], iteration_bounds = array<i64: 2>, scalar_prefetch = 0 : i64, scratch_operands = 0 : i64, tpu.core_type = #tpu.core_type<tc>, window_params = [{transform_indices = @transform_0, window_bounds = array<i64: 1, 36, 32>}, {pipeline_mode = #tpu.pipeline_mode<synchronous>, transform_indices = @transform_1, window_bounds = array<i64: 9, 36, 36>}, {pipeline_mode = #tpu.pipeline_mode<synchronous>, transform_indices = @transform_2, window_bounds = array<i64: 1, 32>}, {pipeline_mode = #tpu.pipeline_mode<synchronous>, transform_indices = @transform_3, window_bounds = array<i64: 1, 32>}, {pipeline_mode = #tpu.pipeline_mode<synchronous>, transform_indices = @transform_4, window_bounds = array<i64: 32, 128>}, {pipeline_mode = #tpu.pipeline_mode<synchronous>, transform_indices = @transform_5, window_bounds = array<i64: 1, 128>}, {pipeline_mode = #tpu.pipeline_mode<synchronous>, transform_indices = @transform_6, window_bounds = array<i64: 9, 1, 128>}, {pipeline_mode = #tpu.pipeline_mode<synchronous>, transform_indices = @transform_7, window_bounds = array<i64: 1, 128>}, {pipeline_mode = #tpu.pipeline_mode<synchronous>, transform_indices = @transform_8, window_bounds = array<i64: 128, 32>}, {pipeline_mode = #tpu.pipeline_mode<synchronous>, transform_indices = @transform_9, window_bounds = array<i64: 1, 32>}, {transform_indices = @transform_10, window_bounds = array<i64: 1, 36, 32>}]} {
    %c0 = arith.constant 0 : index
    %c0_0 = arith.constant 0 : index
    %c0_1 = arith.constant 0 : index
    %0 = vector.load %arg1[%c0, %c0_0, %c0_1] : memref<1x36x32xf32, #tpu.memory_space<vmem>>, vector<1x36x32xf32>
    %1 = vector.shape_cast %0 : vector<1x36x32xf32> to vector<36x32xf32>
    %c0_2 = arith.constant 0 : index
    %c0_3 = arith.constant 0 : index
    %2 = vector.load %arg3[%c0_2, %c0_3] : memref<1x32xf32, #tpu.memory_space<vmem>>, vector<1x32xf32>
    %c0_4 = arith.constant 0 : index
    %c0_5 = arith.constant 0 : index
    %3 = vector.load %arg4[%c0_4, %c0_5] : memref<1x32xf32, #tpu.memory_space<vmem>>, vector<1x32xf32>
    %cst = arith.constant dense<0.000000e+00> : vector<36xf32>
    %4 = vector.multi_reduction <add>, %1, %cst [1] : vector<36x32xf32> to vector<36xf32>
    %5 = vector.shape_cast %4 : vector<36xf32> to vector<36x1xf32>
    %cst_6 = arith.constant 3.200000e+01 : f32
    %6 = vector.broadcast %cst_6 : f32 to vector<36x1xf32>
    %7 = arith.divf %5, %6 : vector<36x1xf32>
    %8 = vector.broadcast %7 : vector<36x1xf32> to vector<36x32xf32>
    %9 = arith.subf %1, %8 : vector<36x32xf32>
    %10 = arith.mulf %9, %9 : vector<36x32xf32>
    %cst_7 = arith.constant dense<0.000000e+00> : vector<36xf32>
    %11 = vector.multi_reduction <add>, %10, %cst_7 [1] : vector<36x32xf32> to vector<36xf32>
    %12 = vector.shape_cast %11 : vector<36xf32> to vector<36x1xf32>
    %cst_8 = arith.constant 3.200000e+01 : f32
    %13 = vector.broadcast %cst_8 : f32 to vector<36x1xf32>
    %14 = arith.divf %12, %13 : vector<36x1xf32>
    %cst_9 = arith.constant 9.99999997E-7 : f32
    %15 = vector.broadcast %cst_9 : f32 to vector<36x1xf32>
    %16 = arith.addf %14, %15 : vector<36x1xf32>
    %17 = math.rsqrt %16 : vector<36x1xf32>
    %18 = vector.broadcast %17 : vector<36x1xf32> to vector<36x32xf32>
    %19 = arith.mulf %9, %18 : vector<36x32xf32>
    %20 = vector.broadcast %2 : vector<1x32xf32> to vector<36x32xf32>
    %21 = arith.mulf %19, %20 : vector<36x32xf32>
    %22 = vector.broadcast %3 : vector<1x32xf32> to vector<36x32xf32>
    %23 = arith.addf %21, %22 : vector<36x32xf32>
    %c0_10 = arith.constant 0 : index
    %c0_11 = arith.constant 0 : index
    %24 = vector.load %arg5[%c0_10, %c0_11] : memref<32x128xf32, #tpu.memory_space<vmem>>, vector<32x128xf32>
    %25 = arith.truncf %23 : vector<36x32xf32> to vector<36x32xbf16>
    %26 = arith.truncf %24 : vector<32x128xf32> to vector<32x128xbf16>
    %cst_12 = arith.constant dense<0.000000e+00> : vector<36x128xf32>
    %27 = tpu.matmul %25, %26, %cst_12 {dimension_numbers = #tpu.dot_dimension_numbers<[1], [0], [0], [1], [0, 0, 1, 1], [], []>} : vector<36x32xbf16>, vector<32x128xbf16>, vector<36x128xf32> -> vector<36x128xf32>
    %c0_13 = arith.constant 0 : index
    %c0_14 = arith.constant 0 : index
    %28 = vector.load %arg6[%c0_13, %c0_14] : memref<1x128xf32, #tpu.memory_space<vmem>>, vector<1x128xf32>
    %29 = vector.broadcast %28 : vector<1x128xf32> to vector<36x128xf32>
    %30 = arith.addf %27, %29 : vector<36x128xf32>
    %cst_15 = arith.constant 3.000000e+00 : f32
    %31 = vector.broadcast %cst_15 : f32 to vector<36x128xf32>
    %32 = arith.addf %30, %31 : vector<36x128xf32>
    %cst_16 = arith.constant 0.000000e+00 : f32
    %cst_17 = arith.constant 6.000000e+00 : f32
    %33 = vector.broadcast %cst_16 : f32 to vector<36x128xf32>
    %34 = arith.maximumf %33, %32 : vector<36x128xf32>
    %35 = vector.broadcast %cst_17 : f32 to vector<36x128xf32>
    %36 = arith.minimumf %35, %34 : vector<36x128xf32>
    %37 = arith.mulf %30, %36 : vector<36x128xf32>
    %cst_18 = arith.constant 0.166666672 : f32
    %38 = vector.broadcast %cst_18 : f32 to vector<36x128xf32>
    %39 = arith.mulf %37, %38 : vector<36x128xf32>
    %c0_19 = arith.constant 0 : index
    %c0_20 = arith.constant 0 : index
    %c0_21 = arith.constant 0 : index
    %40 = vector.load %arg2[%c0_19, %c0_20, %c0_21] : memref<9x36x36xf32, #tpu.memory_space<vmem>>, vector<1x36x36xf32>
    %41 = vector.shape_cast %40 : vector<1x36x36xf32> to vector<36x36xf32>
    %cst_22 = arith.constant dense<0.000000e+00> : vector<36x128xf32>
    %42 = tpu.matmul %41, %39, %cst_22 {dimension_numbers = #tpu.dot_dimension_numbers<[1], [0], [0], [1], [0, 0, 1, 1], [], []>} : vector<36x36xf32>, vector<36x128xf32>, vector<36x128xf32> -> vector<36x128xf32>
    %c0_23 = arith.constant 0 : index
    %c0_24 = arith.constant 0 : index
    %c0_25 = arith.constant 0 : index
    %43 = vector.load %arg7[%c0_23, %c0_24, %c0_25] : memref<9x1x128xf32, #tpu.memory_space<vmem>>, vector<1x1x128xf32>
    %44 = vector.shape_cast %43 : vector<1x1x128xf32> to vector<1x128xf32>
    %45 = vector.broadcast %44 : vector<1x128xf32> to vector<36x128xf32>
    %46 = arith.mulf %42, %45 : vector<36x128xf32>
    %c1 = arith.constant 1 : index
    %c0_26 = arith.constant 0 : index
    %c0_27 = arith.constant 0 : index
    %47 = vector.load %arg2[%c1, %c0_26, %c0_27] : memref<9x36x36xf32, #tpu.memory_space<vmem>>, vector<1x36x36xf32>
    %48 = vector.shape_cast %47 : vector<1x36x36xf32> to vector<36x36xf32>
    %cst_28 = arith.constant dense<0.000000e+00> : vector<36x128xf32>
    %49 = tpu.matmul %48, %39, %cst_28 {dimension_numbers = #tpu.dot_dimension_numbers<[1], [0], [0], [1], [0, 0, 1, 1], [], []>} : vector<36x36xf32>, vector<36x128xf32>, vector<36x128xf32> -> vector<36x128xf32>
    %c1_29 = arith.constant 1 : index
    %c0_30 = arith.constant 0 : index
    %c0_31 = arith.constant 0 : index
    %50 = vector.load %arg7[%c1_29, %c0_30, %c0_31] : memref<9x1x128xf32, #tpu.memory_space<vmem>>, vector<1x1x128xf32>
    %51 = vector.shape_cast %50 : vector<1x1x128xf32> to vector<1x128xf32>
    %52 = vector.broadcast %51 : vector<1x128xf32> to vector<36x128xf32>
    %53 = arith.mulf %49, %52 : vector<36x128xf32>
    %54 = arith.addf %46, %53 : vector<36x128xf32>
    %c2 = arith.constant 2 : index
    %c0_32 = arith.constant 0 : index
    %c0_33 = arith.constant 0 : index
    %55 = vector.load %arg2[%c2, %c0_32, %c0_33] : memref<9x36x36xf32, #tpu.memory_space<vmem>>, vector<1x36x36xf32>
    %56 = vector.shape_cast %55 : vector<1x36x36xf32> to vector<36x36xf32>
    %cst_34 = arith.constant dense<0.000000e+00> : vector<36x128xf32>
    %57 = tpu.matmul %56, %39, %cst_34 {dimension_numbers = #tpu.dot_dimension_numbers<[1], [0], [0], [1], [0, 0, 1, 1], [], []>} : vector<36x36xf32>, vector<36x128xf32>, vector<36x128xf32> -> vector<36x128xf32>
    %c2_35 = arith.constant 2 : index
    %c0_36 = arith.constant 0 : index
    %c0_37 = arith.constant 0 : index
    %58 = vector.load %arg7[%c2_35, %c0_36, %c0_37] : memref<9x1x128xf32, #tpu.memory_space<vmem>>, vector<1x1x128xf32>
    %59 = vector.shape_cast %58 : vector<1x1x128xf32> to vector<1x128xf32>
    %60 = vector.broadcast %59 : vector<1x128xf32> to vector<36x128xf32>
    %61 = arith.mulf %57, %60 : vector<36x128xf32>
    %62 = arith.addf %54, %61 : vector<36x128xf32>
    %c3 = arith.constant 3 : index
    %c0_38 = arith.constant 0 : index
    %c0_39 = arith.constant 0 : index
    %63 = vector.load %arg2[%c3, %c0_38, %c0_39] : memref<9x36x36xf32, #tpu.memory_space<vmem>>, vector<1x36x36xf32>
    %64 = vector.shape_cast %63 : vector<1x36x36xf32> to vector<36x36xf32>
    %cst_40 = arith.constant dense<0.000000e+00> : vector<36x128xf32>
    %65 = tpu.matmul %64, %39, %cst_40 {dimension_numbers = #tpu.dot_dimension_numbers<[1], [0], [0], [1], [0, 0, 1, 1], [], []>} : vector<36x36xf32>, vector<36x128xf32>, vector<36x128xf32> -> vector<36x128xf32>
    %c3_41 = arith.constant 3 : index
    %c0_42 = arith.constant 0 : index
    %c0_43 = arith.constant 0 : index
    %66 = vector.load %arg7[%c3_41, %c0_42, %c0_43] : memref<9x1x128xf32, #tpu.memory_space<vmem>>, vector<1x1x128xf32>
    %67 = vector.shape_cast %66 : vector<1x1x128xf32> to vector<1x128xf32>
    %68 = vector.broadcast %67 : vector<1x128xf32> to vector<36x128xf32>
    %69 = arith.mulf %65, %68 : vector<36x128xf32>
    %70 = arith.addf %62, %69 : vector<36x128xf32>
    %c4 = arith.constant 4 : index
    %c0_44 = arith.constant 0 : index
    %c0_45 = arith.constant 0 : index
    %71 = vector.load %arg2[%c4, %c0_44, %c0_45] : memref<9x36x36xf32, #tpu.memory_space<vmem>>, vector<1x36x36xf32>
    %72 = vector.shape_cast %71 : vector<1x36x36xf32> to vector<36x36xf32>
    %cst_46 = arith.constant dense<0.000000e+00> : vector<36x128xf32>
    %73 = tpu.matmul %72, %39, %cst_46 {dimension_numbers = #tpu.dot_dimension_numbers<[1], [0], [0], [1], [0, 0, 1, 1], [], []>} : vector<36x36xf32>, vector<36x128xf32>, vector<36x128xf32> -> vector<36x128xf32>
    %c4_47 = arith.constant 4 : index
    %c0_48 = arith.constant 0 : index
    %c0_49 = arith.constant 0 : index
    %74 = vector.load %arg7[%c4_47, %c0_48, %c0_49] : memref<9x1x128xf32, #tpu.memory_space<vmem>>, vector<1x1x128xf32>
    %75 = vector.shape_cast %74 : vector<1x1x128xf32> to vector<1x128xf32>
    %76 = vector.broadcast %75 : vector<1x128xf32> to vector<36x128xf32>
    %77 = arith.mulf %73, %76 : vector<36x128xf32>
    %78 = arith.addf %70, %77 : vector<36x128xf32>
    %c5 = arith.constant 5 : index
    %c0_50 = arith.constant 0 : index
    %c0_51 = arith.constant 0 : index
    %79 = vector.load %arg2[%c5, %c0_50, %c0_51] : memref<9x36x36xf32, #tpu.memory_space<vmem>>, vector<1x36x36xf32>
    %80 = vector.shape_cast %79 : vector<1x36x36xf32> to vector<36x36xf32>
    %cst_52 = arith.constant dense<0.000000e+00> : vector<36x128xf32>
    %81 = tpu.matmul %80, %39, %cst_52 {dimension_numbers = #tpu.dot_dimension_numbers<[1], [0], [0], [1], [0, 0, 1, 1], [], []>} : vector<36x36xf32>, vector<36x128xf32>, vector<36x128xf32> -> vector<36x128xf32>
    %c5_53 = arith.constant 5 : index
    %c0_54 = arith.constant 0 : index
    %c0_55 = arith.constant 0 : index
    %82 = vector.load %arg7[%c5_53, %c0_54, %c0_55] : memref<9x1x128xf32, #tpu.memory_space<vmem>>, vector<1x1x128xf32>
    %83 = vector.shape_cast %82 : vector<1x1x128xf32> to vector<1x128xf32>
    %84 = vector.broadcast %83 : vector<1x128xf32> to vector<36x128xf32>
    %85 = arith.mulf %81, %84 : vector<36x128xf32>
    %86 = arith.addf %78, %85 : vector<36x128xf32>
    %c6 = arith.constant 6 : index
    %c0_56 = arith.constant 0 : index
    %c0_57 = arith.constant 0 : index
    %87 = vector.load %arg2[%c6, %c0_56, %c0_57] : memref<9x36x36xf32, #tpu.memory_space<vmem>>, vector<1x36x36xf32>
    %88 = vector.shape_cast %87 : vector<1x36x36xf32> to vector<36x36xf32>
    %cst_58 = arith.constant dense<0.000000e+00> : vector<36x128xf32>
    %89 = tpu.matmul %88, %39, %cst_58 {dimension_numbers = #tpu.dot_dimension_numbers<[1], [0], [0], [1], [0, 0, 1, 1], [], []>} : vector<36x36xf32>, vector<36x128xf32>, vector<36x128xf32> -> vector<36x128xf32>
    %c6_59 = arith.constant 6 : index
    %c0_60 = arith.constant 0 : index
    %c0_61 = arith.constant 0 : index
    %90 = vector.load %arg7[%c6_59, %c0_60, %c0_61] : memref<9x1x128xf32, #tpu.memory_space<vmem>>, vector<1x1x128xf32>
    %91 = vector.shape_cast %90 : vector<1x1x128xf32> to vector<1x128xf32>
    %92 = vector.broadcast %91 : vector<1x128xf32> to vector<36x128xf32>
    %93 = arith.mulf %89, %92 : vector<36x128xf32>
    %94 = arith.addf %86, %93 : vector<36x128xf32>
    %c7 = arith.constant 7 : index
    %c0_62 = arith.constant 0 : index
    %c0_63 = arith.constant 0 : index
    %95 = vector.load %arg2[%c7, %c0_62, %c0_63] : memref<9x36x36xf32, #tpu.memory_space<vmem>>, vector<1x36x36xf32>
    %96 = vector.shape_cast %95 : vector<1x36x36xf32> to vector<36x36xf32>
    %cst_64 = arith.constant dense<0.000000e+00> : vector<36x128xf32>
    %97 = tpu.matmul %96, %39, %cst_64 {dimension_numbers = #tpu.dot_dimension_numbers<[1], [0], [0], [1], [0, 0, 1, 1], [], []>} : vector<36x36xf32>, vector<36x128xf32>, vector<36x128xf32> -> vector<36x128xf32>
    %c7_65 = arith.constant 7 : index
    %c0_66 = arith.constant 0 : index
    %c0_67 = arith.constant 0 : index
    %98 = vector.load %arg7[%c7_65, %c0_66, %c0_67] : memref<9x1x128xf32, #tpu.memory_space<vmem>>, vector<1x1x128xf32>
    %99 = vector.shape_cast %98 : vector<1x1x128xf32> to vector<1x128xf32>
    %100 = vector.broadcast %99 : vector<1x128xf32> to vector<36x128xf32>
    %101 = arith.mulf %97, %100 : vector<36x128xf32>
    %102 = arith.addf %94, %101 : vector<36x128xf32>
    %c8 = arith.constant 8 : index
    %c0_68 = arith.constant 0 : index
    %c0_69 = arith.constant 0 : index
    %103 = vector.load %arg2[%c8, %c0_68, %c0_69] : memref<9x36x36xf32, #tpu.memory_space<vmem>>, vector<1x36x36xf32>
    %104 = vector.shape_cast %103 : vector<1x36x36xf32> to vector<36x36xf32>
    %cst_70 = arith.constant dense<0.000000e+00> : vector<36x128xf32>
    %105 = tpu.matmul %104, %39, %cst_70 {dimension_numbers = #tpu.dot_dimension_numbers<[1], [0], [0], [1], [0, 0, 1, 1], [], []>} : vector<36x36xf32>, vector<36x128xf32>, vector<36x128xf32> -> vector<36x128xf32>
    %c8_71 = arith.constant 8 : index
    %c0_72 = arith.constant 0 : index
    %c0_73 = arith.constant 0 : index
    %106 = vector.load %arg7[%c8_71, %c0_72, %c0_73] : memref<9x1x128xf32, #tpu.memory_space<vmem>>, vector<1x1x128xf32>
    %107 = vector.shape_cast %106 : vector<1x1x128xf32> to vector<1x128xf32>
    %108 = vector.broadcast %107 : vector<1x128xf32> to vector<36x128xf32>
    %109 = arith.mulf %105, %108 : vector<36x128xf32>
    %110 = arith.addf %102, %109 : vector<36x128xf32>
    %c0_74 = arith.constant 0 : index
    %c0_75 = arith.constant 0 : index
    %111 = vector.load %arg8[%c0_74, %c0_75] : memref<1x128xf32, #tpu.memory_space<vmem>>, vector<1x128xf32>
    %112 = vector.broadcast %111 : vector<1x128xf32> to vector<36x128xf32>
    %113 = arith.addf %110, %112 : vector<36x128xf32>
    %cst_76 = arith.constant 3.000000e+00 : f32
    %114 = vector.broadcast %cst_76 : f32 to vector<36x128xf32>
    %115 = arith.addf %113, %114 : vector<36x128xf32>
    %cst_77 = arith.constant 0.000000e+00 : f32
    %cst_78 = arith.constant 6.000000e+00 : f32
    %116 = vector.broadcast %cst_77 : f32 to vector<36x128xf32>
    %117 = arith.maximumf %116, %115 : vector<36x128xf32>
    %118 = vector.broadcast %cst_78 : f32 to vector<36x128xf32>
    %119 = arith.minimumf %118, %117 : vector<36x128xf32>
    %120 = arith.mulf %113, %119 : vector<36x128xf32>
    %cst_79 = arith.constant 0.166666672 : f32
    %121 = vector.broadcast %cst_79 : f32 to vector<36x128xf32>
    %122 = arith.mulf %120, %121 : vector<36x128xf32>
    %c0_80 = arith.constant 0 : index
    %c0_81 = arith.constant 0 : index
    %123 = vector.load %arg9[%c0_80, %c0_81] : memref<128x32xf32, #tpu.memory_space<vmem>>, vector<128x32xf32>
    %124 = arith.truncf %122 : vector<36x128xf32> to vector<36x128xbf16>
    %125 = arith.truncf %123 : vector<128x32xf32> to vector<128x32xbf16>
    %cst_82 = arith.constant dense<0.000000e+00> : vector<36x32xf32>
    %126 = tpu.matmul %124, %125, %cst_82 {dimension_numbers = #tpu.dot_dimension_numbers<[1], [0], [0], [1], [0, 0, 1, 1], [], []>} : vector<36x128xbf16>, vector<128x32xbf16>, vector<36x32xf32> -> vector<36x32xf32>
    %127 = arith.addf %1, %126 : vector<36x32xf32>
    %c0_83 = arith.constant 0 : index
    %c0_84 = arith.constant 0 : index
    %128 = vector.load %arg10[%c0_83, %c0_84] : memref<1x32xf32, #tpu.memory_space<vmem>>, vector<1x32xf32>
    %129 = vector.broadcast %128 : vector<1x32xf32> to vector<36x32xf32>
    %130 = arith.addf %127, %129 : vector<36x32xf32>
    %c0_85 = arith.constant 0 : index
    %c0_86 = arith.constant 0 : index
    %c0_87 = arith.constant 0 : index
    %131 = vector.load %arg11[%c0_85, %c0_86, %c0_87] : memref<1x36x32xf32, #tpu.memory_space<vmem>>, vector<1x36x32xf32>
    %132 = vector.shape_cast %131 : vector<1x36x32xf32> to vector<36x32xf32>
    %133 = vector.shape_cast %130 : vector<36x32xf32> to vector<1x36x32xf32>
    tpu.vector_store %arg11[%c0_85, %c0_86, %c0_87], %133 {strides = array<i32>} : memref<1x36x32xf32, #tpu.memory_space<vmem>>, vector<1x36x32xf32>,
    return
  }
  func.func @transform_0(%arg0: i32) -> (i32, i32, i32) {
    %c0_i32 = arith.constant 0 : i32
    %c0_i32_0 = arith.constant 0 : i32
    %c0_i32_1 = arith.constant 0 : i32
    return %arg0, %c0_i32, %c0_i32_0 : i32, i32, i32
  }
  func.func @transform_1(%arg0: i32) -> (i32, i32, i32) {
    %c0_i32 = arith.constant 0 : i32
    %c0_i32_0 = arith.constant 0 : i32
    %c0_i32_1 = arith.constant 0 : i32
    %c0_i32_2 = arith.constant 0 : i32
    return %c0_i32, %c0_i32_0, %c0_i32_1 : i32, i32, i32
  }
  func.func @transform_2(%arg0: i32) -> (i32, i32) {
    %c0_i32 = arith.constant 0 : i32
    %c0_i32_0 = arith.constant 0 : i32
    %c0_i32_1 = arith.constant 0 : i32
    return %c0_i32, %c0_i32_0 : i32, i32
  }
  func.func @transform_3(%arg0: i32) -> (i32, i32) {
    %c0_i32 = arith.constant 0 : i32
    %c0_i32_0 = arith.constant 0 : i32
    %c0_i32_1 = arith.constant 0 : i32
    return %c0_i32, %c0_i32_0 : i32, i32
  }
  func.func @transform_4(%arg0: i32) -> (i32, i32) {
    %c0_i32 = arith.constant 0 : i32
    %c0_i32_0 = arith.constant 0 : i32
    %c0_i32_1 = arith.constant 0 : i32
    return %c0_i32, %c0_i32_0 : i32, i32
  }
  func.func @transform_5(%arg0: i32) -> (i32, i32) {
    %c0_i32 = arith.constant 0 : i32
    %c0_i32_0 = arith.constant 0 : i32
    %c0_i32_1 = arith.constant 0 : i32
    return %c0_i32, %c0_i32_0 : i32, i32
  }
  func.func @transform_6(%arg0: i32) -> (i32, i32, i32) {
    %c0_i32 = arith.constant 0 : i32
    %c0_i32_0 = arith.constant 0 : i32
    %c0_i32_1 = arith.constant 0 : i32
    %c0_i32_2 = arith.constant 0 : i32
    return %c0_i32, %c0_i32_0, %c0_i32_1 : i32, i32, i32
  }
  func.func @transform_7(%arg0: i32) -> (i32, i32) {
    %c0_i32 = arith.constant 0 : i32
    %c0_i32_0 = arith.constant 0 : i32
    %c0_i32_1 = arith.constant 0 : i32
    return %c0_i32, %c0_i32_0 : i32, i32
  }
  func.func @transform_8(%arg0: i32) -> (i32, i32) {
    %c0_i32 = arith.constant 0 : i32
    %c0_i32_0 = arith.constant 0 : i32
    %c0_i32_1 = arith.constant 0 : i32
    return %c0_i32, %c0_i32_0 : i32, i32
  }
  func.func @transform_9(%arg0: i32) -> (i32, i32) {
    %c0_i32 = arith.constant 0 : i32
    %c0_i32_0 = arith.constant 0 : i32
    %c0_i32_1 = arith.constant 0 : i32
    return %c0_i32, %c0_i32_0 : i32, i32
  }
  func.func @transform_10(%arg0: i32) -> (i32, i32, i32) {
    %c0_i32 = arith.constant 0 : i32
    %c0_i32_0 = arith.constant 0 : i32
    %c0_i32_1 = arith.constant 0 : i32
    return %arg0, %c0_i32, %c0_i32_0 : i32, i32, i32
  }
}

</mosaic_0001>

<bundles_post_ra>
// kernel: _forward_impl.5
= control target key start
LH: loop header
LB: loop body
LE: loop exit
PB: predicated region body
PF: predicated region fallthrough
CT: control target
= control target key end

     0   :  { %s716_s18 = smov 0   ;;  %s903_s0 = inlined_call_operand.vmem [shape: f32[2,36,288], index: 0, kind: input, shape index: {}]   ;;  %s904_s1 = inlined_call_operand.vmem [shape: f32[288,32], index: 1, kind: input, shape index: {}]   ;;  %s905_s2 = inlined_call_operand.vmem [shape: f32[1,32], index: 2, kind: input, shape index: {}]   ;;  %s906_s3 = inlined_call_operand.vmem [shape: f32[1,32], index: 3, kind: input, shape index: {}]   ;;  %s907_s4 = inlined_call_operand.vmem [shape: f32[1,32], index: 4, kind: input, shape index: {}]   ;;  %s908_s5 = inlined_call_operand.vmem [shape: f32[2,36,32], index: 5, kind: output, shape index: {}]  }
   0x1 LB: > { %s584_s19 = sadd.s32 4294967295, %s682_s18   ;;  %p588_p0 = scmp.ge.s32.totalorder %s682_s18, 1  ;;  %s682_s18 = sphi %s716_s18, %s15_s18  }
   0x2   : > { %p187_p1 = scmp.lt.s32.totalorder %s682_s18, 3 }
   0x4   : > { %p188_p2 = pnand %p588_p0, %p187_p1 }
   0x5   : > { %p733_p3 = scmp.lt.s32.totalorder (!%p188_p2), %s584_s19, 1 }
   0x6   : > { %191 = sbr.rel (%p188_p2) target bundleno = 572 (0x23c), region = 40 }
   0xb   : > { %v271_v0 = vld [vmem:[%s904_s1 + $0xf0] sm:$0xff]  ;;  %v272_v1 = vld [vmem:[%s904_s1 + $0xf8] sm:$0xff]  ;;  %v269_v5 = vld [vmem:[%s904_s1 + $0xe0] sm:$0xff]  ;;  %v684_v7 = vmov 0.0   ;;  %vm685_vm0 = vmmov 0   ;;  %s911_s19 = smov (!%p733_p3, %s584_s19), 1 }
   0xc   : > { %v255_v2 = vld [vmem:[%s904_s1 + $0x70] sm:$0xff]  ;;  %v301_v3 = vpack.c.bf16 %v272_v1, %v271_v0  ;;  %v256_v4 = vld [vmem:[%s904_s1 + $0x78] sm:$0xff]  ;;  %v270_v6 = vld [vmem:[%s904_s1 + $0xe8] sm:$0xff]  ;;  %638 = vmatprep.subr.bf16.mxu1 %v684_v7  ;;  %642 = vmatprep.mubr.msk.bf16.mxu1 %vm685_vm0, %v684_v7  ;;  %s654_s22 = smul.u32 120, %s911_s19  ;;  %vm311_vm1 = vcmask 261120   ;;  %vm447_vm2 = vcmask 257024  }
   0xd   : > { %v293_v8 = vpack.c.bf16 %v256_v4, %v255_v2  ;;  %v300_v9 = vpack.c.bf16 %v270_v6, %v269_v5  ;;  %v253_v10 = vld [vmem:[%s904_s1 + $0x60] sm:$0xff]  ;;  %v254_v11 = vld [vmem:[%s904_s1 + $0x68] sm:$0xff]  ;;  %v267_v12 = vld [vmem:[%s904_s1 + $0xd0] sm:$0xff] }
   0xe   : > { %599 = vmatprep.subr.bf16.mxu0 %v301_v3  ;;  %v268_v13 = vld [vmem:[%s904_s1 + $0xd8] sm:$0xff]  ;;  %v292_v14 = vpack.c.bf16 %v254_v11, %v253_v10  ;;  %v251_v16 = vld [vmem:[%s904_s1 + $0x50] sm:$0xff]  ;;  %v265_v18 = vld [vmem:[%s904_s1 + $0xc0] sm:$0xff]  ;;  %s793_s12 = scalar_lea.vmem %s903_s0, %s654_s22 }
   0xf   : > { %600 = vmatpush3.bf16.msra.mxu0 %v293_v8  ;;  %v299_v15 = vpack.c.bf16 %v268_v13, %v267_v12  ;;  %v252_v17 = vld [vmem:[%s904_s1 + $0x58] sm:$0xff]  ;;  %v266_v19 = vld [vmem:[%s904_s1 + $0xc8] sm:$0xff]  ;;  %v249_v21 = vld [vmem:[%s904_s1 + $0x40] sm:$0xff] }
  0x10   : > { %601 = vmatprep.subr.bf16.mxu0 %v300_v9  ;;  %v291_v20 = vpack.c.bf16 %v252_v17, %v251_v16  ;;  %v298_v22 = vpack.c.bf16 %v266_v19, %v265_v18  ;;  %v250_v23 = vld [vmem:[%s904_s1 + $0x48] sm:$0xff]  ;;  %v275_v24 = vld [vmem:[%s904_s1 + $0x110] sm:$0xff]  ;;  %v276_v25 = vld [vmem:[%s904_s1 + $0x118] sm:$0xff] }
  0x11   : > { %v263_v26 = vld [vmem:[%s904_s1 + $0xb0] sm:$0xff]  ;;  %v264_v27 = vld [vmem:[%s904_s1 + $0xb8] sm:$0xff]  ;;  %v303_v28 = vpack.c.bf16 %v276_v25, %v275_v24  ;;  %v273_v29 = vld [vmem:[%s904_s1 + $0x100] sm:$0xff]  ;;  %v290_v31 = vpack.c.bf16 %v250_v23, %v249_v21 }
  0x12   : > { %v274_v30 = vld [vmem:[%s904_s1 + $0x108] sm:$0xff]  ;;  %v247_v32 = vld [vmem:[%s904_s1 + $0x30] sm:$0xff]  ;;  %v230_v35 = vld [vmem:[%s793_s12 + $0x20] sm:$0xff]  ;;  %v297_v36 = vpack.c.bf16 %v264_v27, %v263_v26 }
  0x13   : > { %602 = vmatpush3.bf16.msra.mxu0 %v292_v14  ;;  %639 = vmatpush3.bf16.msra.mxu1 %v303_v28  ;;  %v302_v33 = vpack.c.bf16 %v274_v30, %v273_v29  ;;  %v227_v34 = vld [vmem:[%s793_s12 + $0x8] sm:$0xff]  ;;  %v248_v37 = vld [vmem:[%s904_s1 + $0x38] sm:$0xff]  ;;  %v228_v39 = vld [vmem:[%s793_s12 + $0x10] sm:$0xff] }
  0x14   : > { %603 = vmatprep.subr.bf16.mxu0 %v299_v15  ;;  %640 = vmatprep.subr.bf16.mxu1 %v684_v7  ;;  %v278_v38 = vpack.c.bf16 %v230_v35, %v227_v34  ;;  %v231_v40 = vld [vmem:[%s793_s12 + $0x28] sm:$0xff]  ;;  %v261_v41 = vld [vmem:[%s904_s1 + $0xa0] sm:$0xff]  ;;  %v289_v44 = vpack.c.bf16 %v248_v37, %v247_v32  ;;  %v259_v48 = vld [vmem:[%s904_s1 + $0x90] sm:$0xff] }
  0x15   : > { %v262_v42 = vld [vmem:[%s904_s1 + $0xa8] sm:$0xff]  ;;  %v279_v43 = vpack.c.bf16 %v231_v40, %v228_v39  ;;  %v245_v46 = vld [vmem:[%s904_s1 + $0x20] sm:$0xff]  ;;  %v260_v49 = vld [vmem:[%s904_s1 + $0x98] sm:$0xff] }
  0x16   : > { %353 = vmatprep.mubr.bf16.mxu0 %v278_v38  ;;  %v296_v45 = vpack.c.bf16 %v262_v42, %v261_v41  ;;  %v246_v47 = vld [vmem:[%s904_s1 + $0x28] sm:$0xff]  ;;  %v234_v51 = vld [vmem:[%s793_s12 + $0x40] sm:$0xff]  ;;  %v237_v52 = vld [vmem:[%s793_s12 + $0x58] sm:$0xff]  ;;  %v295_v53 = vpack.c.bf16 %v260_v49, %v259_v48 }
  0x17   : > { %604 = vmatpush3.bf16.msra.mxu0 %v291_v20  ;;  %641 = vmatpush3.bf16.msra.mxu1 %v302_v33  ;;  %v288_v50 = vpack.c.bf16 %v246_v47, %v245_v46  ;;  %v243_v54 = vld [vmem:[%s904_s1 + $0x10] sm:$0xff]  ;;  %v244_v55 = vld [vmem:[%s904_s1 + $0x18] sm:$0xff]  ;;  %v257_v56 = vld [vmem:[%s904_s1 + $0x80] sm:$0xff]  ;;  %v282_v58 = vpack.c.bf16 %v237_v52, %v234_v51 }
  0x18   : > { %605 = vmatprep.subr.bf16.mxu0 %v298_v22  ;;  %v258_v57 = vld [vmem:[%s904_s1 + $0x88] sm:$0xff]  ;;  %v287_v59 = vpack.c.bf16 %v244_v55, %v243_v54  ;;  %v241_v61 = vld [vmem:[%s904_s1] sm:$0xff]  ;;  %v229_v1 = vld [vmem:[%s793_s12 + $0x18] sm:$0xff] }
  0x19   : > { %v294_v60 = vpack.c.bf16 %v258_v57, %v257_v56  ;;  %v242_v62 = vld [vmem:[%s904_s1 + $0x8] sm:$0xff]  ;;  %v226_v0 = vld [vmem:[%s793_s12] sm:$0xff]  ;;  %v240_v2 = vld [vmem:[%s793_s12 + $0x70] sm:$0xf] }
  0x1a   : > { %643 = vmatmul.mubr.msk.bf16.vlgmr.msra.gmra.mxu1 %vm311_vm1, %v279_v43  ;;  %v286_v63 = vpack.c.bf16 %v242_v62, %v241_v61  ;;  %v233_v3 = vld [vmem:[%s793_s12 + $0x38] sm:$0xff]  ;;  %v236_v4 = vld [vmem:[%s793_s12 + $0x50] sm:$0xff]  ;;  %v277_v5 = vpack.c.bf16 %v229_v1, %v226_v0  ;;  %v285_v6 = vpack.c.bf16 %v240_v2, %v240_v2  ;;  %v235_v10 = vld [vmem:[%s793_s12 + $0x48] sm:$0xff] }
  0x1b   : > { %606 = vmatpush3.bf16.msra.mxu0 %v290_v31  ;;  %646 = vmatprep.mubr.msk.bf16.mxu1 %vm685_vm0, %v684_v7  ;;  %v281_v8 = vpack.c.bf16 %v236_v4, %v233_v3  ;;  %v232_v9 = vld [vmem:[%s793_s12 + $0x30] sm:$0xff]  ;;  %v239_v11 = vld [vmem:[%s793_s12 + $0x68] sm:$0xf]  ;;  %v591_v25 = vld [vmem:[%s905_s2] ss:$0 sm:$0xff] }
  0x1c   : > { %607 = vmatprep.subr.bf16.mxu0 %v297_v36  ;;  %v280_v12 = vpack.c.bf16 %v235_v10, %v232_v9  ;;  %v284_v13 = vpack.c.bf16 %v239_v11, %v239_v11 }
  0x1f   : > { %608 = vmatpush3.bf16.msra.mxu0 %v289_v44 }
  0x20   : > { %609 = vmatprep.subr.bf16.mxu0 %v296_v45 }
  0x22   : > { %647 = vmatmul.mubr.msk.bf16.gmra.mxu1 %vm311_vm1, %v282_v58 }
  0x23   : > { %610 = vmatpush3.bf16.msra.mxu0 %v288_v50  ;;  %650 = vmatprep.mubr.msk.bf16.mxu1 %vm685_vm0, %v684_v7  ;;  %v238_v7 = vld [vmem:[%s793_s12 + $0x60] sm:$0xf]  ;;  %s655_s12 = smul.u32 40, %s911_s19 }
  0x24   : > { %611 = vmatprep.subr.bf16.mxu0 %v295_v53  ;;  %v283_v14 = vpack.c.bf16 %v238_v7, %v238_v7 }
  0x25   : > { %s224_s13 = scalar_lea.vmem %s908_s5, %s655_s12 }
  0x27   : > { %612 = vmatpush3.bf16.msra.mxu0 %v287_v59 }
  0x28   : > { %613 = vmatprep.subr.bf16.mxu0 %v294_v60 }
  0x2a   : > { %651 = vmatmul.mubr.msk.bf16.gmra.mxu1 %vm311_vm1, %v285_v6 }
  0x2b   : > { %614 = vmatpush3.bf16.msra.mxu0 %v286_v63 }
  0x2e   : > { %354 = vmatmul.mubr.bf16.vlgmr.msra.gmra.mxu0 %v277_v5 }
  0x2f   : > { %361 = vmatprep.mubr.bf16.mxu0 %v281_v8 }
  0x36   : > { %362 = vmatmul.mubr.bf16.gmra.mxu0 %v280_v12 }
  0x37   : > { %369 = vmatprep.mubr.bf16.mxu0 %v284_v13 }
  0x3e   : > { %370 = vmatmul.mubr.bf16.gmra.mxu0 %v283_v14 }
  0xda   : > { %v411_v15 = vpop.f32.mrf.mxu1 }
  0xdc   : > { %v644_v16 = vpop.f32.mrf.mxu1 }
  0xde   : > { %v414_v17 = vpop.f32.mrf.mxu1 }
  0xe0   : > { %v645_v18 = vpop.f32.mrf.mxu1 }
  0xe2   : > { %v419_v19 = vpop.f32.mrf.mxu1 }
  0xe4   : > { %v648_v20 = vpop.f32.mrf.mxu1 }
  0xe6   : > { %v422_v21 = vpop.f32.mrf.mxu1 }
  0xe8   : > { %v649_v22 = vpop.f32.mrf.mxu1 }
  0xea   : > { %v427_v24 = vpop.f32.mrf.mxu1 }
  0xec   : > { %v652_v27 = vpop.f32.mrf.mxu1 }
  0xee   : > { %v615_v23 = vpop.f32.mrf.mxu0  ;;  %v430_v30 = vpop.f32.mrf.mxu1 }
  0xf0   : > { %v616_v26 = vpop.f32.mrf.mxu0  ;;  %v653_v33 = vpop.f32.mrf.mxu1 }
  0xf1   : > { %v617_v28 = vadd.f32 %v616_v26, %v615_v23 }
  0xf2   : > { %v618_v29 = vpop.f32.mrf.mxu0 }
  0xf3   : > { %v356_v31 = vadd.f32 %v617_v28, %v591_v25 }
  0xf4   : > { %v619_v32 = vpop.f32.mrf.mxu0 }
  0xf5   : > { %v620_v34 = vadd.f32 %v619_v32, %v618_v29  ;;  %v412_v35 = vadd.f32 %v411_v15, %v356_v31 }
  0xf6   : > { %v621_v36 = vpop.f32.mrf.mxu0 }
  0xf7   : > { %v359_v37 = vadd.f32 %v620_v34, %v591_v25  ;;  %v435_v38 = vsel %vm311_vm1, %v412_v35, 0.0 }
  0xf8   : > { %v622_v39 = vpop.f32.mrf.mxu0  ;;  %436 = vadd.xlane.f32.xlu0 %v435_v38 }
  0xf9   : > { %v623_v40 = vadd.f32 %v622_v39, %v621_v36  ;;  %v415_v41 = vadd.f32 %v414_v17, %v359_v37  ;;  %v595_v36 = vld [vmem:[%s906_s3] ss:$0 sm:$0xff] }
  0xfa   : > { %v624_v42 = vpop.f32.mrf.mxu0  ;;  %v596_v39 = vld [vmem:[%s907_s4] ss:$0 sm:$0xff] }
  0xfb   : > { %v364_v43 = vadd.f32 %v623_v40, %v591_v25  ;;  %v438_v44 = vsel %vm311_vm1, %v415_v41, 0.0 }
  0xfc   : > { %v625_v45 = vpop.f32.mrf.mxu0  ;;  %439 = vadd.xlane.f32.xlu0 %v438_v44 }
  0xfd   : > { %v626_v46 = vadd.f32 %v625_v45, %v624_v42  ;;  %v420_v47 = vadd.f32 %v419_v19, %v364_v43 }
  0xfe   : > { %v627_v48 = vpop.f32.mrf.mxu0 }
  0xff   : > { %v367_v49 = vadd.f32 %v626_v46, %v591_v25  ;;  %v441_v50 = vsel %vm311_vm1, %v420_v47, 0.0 }
 0x100   : > { %v628_v51 = vpop.f32.mrf.mxu0  ;;  %442 = vadd.xlane.f32.xlu1 %v441_v50 }
 0x101   : > { %v629_v52 = vadd.f32 %v628_v51, %v627_v48  ;;  %v423_v53 = vadd.f32 %v422_v21, %v367_v49 }
 0x102   : > { %v630_v54 = vpop.f32.mrf.mxu0 }
 0x103   : > { %v372_v55 = vadd.f32 %v629_v52, %v591_v25  ;;  %v444_v56 = vsel %vm311_vm1, %v423_v53, 0.0 }
 0x104   : > { %v631_v57 = vpop.f32.mrf.mxu0  ;;  %445 = vadd.xlane.f32.xlu1 %v444_v56 }
 0x105   : > { %v428_v58 = vadd.f32 %v427_v24, %v372_v55 }
 0x107   : > { %v448_v59 = vsel %vm447_vm2, %v428_v58, 0.0 }
 0x108   : > { %449 = vadd.xlane.f32.xlu0 %v448_v59 }
 0x181   : > { %v437_v60 = vpop.xlane.xlu0 %436 }
 0x182   : > { %v452_v61 = vmul.f32 0.03125, %v437_v60 }
 0x184   : > { %v457_v62 = vsub.f32 %v412_v35, %v452_v61 }
 0x185   : > { %v440_v63 = vpop.xlane.xlu0 %439 }
 0x186   : > { %v453_v0 = vmul.f32 0.03125, %v440_v63  ;;  %v462_v1 = vmul.f32 %v457_v62, %v457_v62 }
 0x188   : > { %v458_v2 = vsub.f32 %v415_v41, %v453_v0  ;;  %v467_v3 = vsel %vm311_vm1, %v462_v1, 0.0 }
 0x189   : > { %v443_v4 = vpop.xlane.xlu1 %442  ;;  %468 = vadd.xlane.f32.xlu1 %v467_v3 }
 0x18a   : > { %v454_v5 = vmul.f32 0.03125, %v443_v4  ;;  %v463_v6 = vmul.f32 %v458_v2, %v458_v2 }
 0x18c   : > { %v459_v8 = vsub.f32 %v420_v47, %v454_v5  ;;  %v470_v9 = vsel %vm311_vm1, %v463_v6, 0.0 }
 0x18d   : > { %v446_v10 = vpop.xlane.xlu1 %445  ;;  %471 = vadd.xlane.f32.xlu0 %v470_v9 }
 0x18e   : > { %v455_v11 = vmul.f32 0.03125, %v446_v10  ;;  %v464_v12 = vmul.f32 %v459_v8, %v459_v8 }
 0x190   : > { %v460_v13 = vsub.f32 %v423_v53, %v455_v11  ;;  %v473_v7 = vsel %vm311_vm1, %v464_v12, 0.0 }
 0x191   : > { %474 = vadd.xlane.f32.xlu1 %v473_v7  ;;  %v450_v14 = vpop.xlane.xlu0 %449 }
 0x192   : > { %v456_v15 = vmul.f32 0.03125, %v450_v14  ;;  %v465_v16 = vmul.f32 %v460_v13, %v460_v13 }
 0x194   : > { %v461_v17 = vsub.f32 %v428_v58, %v456_v15  ;;  %v476_v18 = vsel %vm311_vm1, %v465_v16, 0.0 }
 0x195   : > { %477 = vadd.xlane.f32.xlu0 %v476_v18 }
 0x196   : > { %v466_v19 = vmul.f32 %v461_v17, %v461_v17 }
 0x198   : > { %v479_v20 = vsel %vm447_vm2, %v466_v19, 0.0 }
 0x199   : > { %480 = vadd.xlane.f32.xlu1 %v479_v20 }
 0x212   : > { %v469_v21 = vpop.xlane.xlu1 %468 }
 0x213   : > { %v482_v22 = vmul.f32 0.03125, %v469_v21 }
 0x215   : > { %v487_v23 = vadd.f32 1e-05, %v482_v22 }
 0x216   : > { %v472_v24 = vpop.xlane.xlu0 %471 }
 0x217   : > { %666 = vrsqrt.f32 %v487_v23  ;;  %v483_v25 = vmul.f32 0.03125, %v472_v24 }
 0x219   : > { %v488_v26 = vadd.f32 1e-05, %v483_v25 }
 0x21a   : > { %v475_v27 = vpop.xlane.xlu1 %474 }
 0x21b   : > { %668 = vrsqrt.f32 %v488_v26  ;;  %v484_v28 = vmul.f32 0.03125, %v475_v27 }
 0x21d   : > { %v489_v29 = vadd.f32 1e-05, %v484_v28 }
 0x21e   : > { %v478_v30 = vpop.xlane.xlu0 %477 }
 0x21f   : > { %670 = vrsqrt.f32 %v489_v29  ;;  %v485_v31 = vmul.f32 0.03125, %v478_v30 }
 0x221   : > { %v490_v32 = vadd.f32 1e-05, %v485_v31 }
 0x222   : > { %v481_v33 = vpop.xlane.xlu1 %480 }
 0x223   : > { %672 = vrsqrt.f32 %v490_v32  ;;  %v486_v34 = vmul.f32 0.03125, %v481_v33 }
 0x224   : > { %v667_v35 = vpop.eup %666 }
 0x225   : > { %v497_v37 = vmul.f32 %v667_v35, %v457_v62  ;;  %v491_v38 = vadd.f32 1e-05, %v486_v34 }
 0x227   : > { %v508_v40 = vmul.f32 %v595_v36, %v497_v37  ;;  %674 = vrsqrt.f32 %v491_v38 }
 0x228   : > { %v669_v41 = vpop.eup %668 }
 0x229   : > { %v519_v42 = vadd.f32 %v596_v39, %v508_v40  ;;  %v498_v43 = vmul.f32 %v669_v41, %v458_v2 }
 0x22b   : > { %524 = vst.msk [vmem:[%s224_s13] sm:$0xff] %vm311_vm1, %v519_v42  ;;  %v509_v44 = vmul.f32 %v595_v36, %v498_v43 }
 0x22c   : > { %v671_v45 = vpop.eup %670 }
 0x22d   : > { %v520_v46 = vadd.f32 %v596_v39, %v509_v44  ;;  %v499_v47 = vmul.f32 %v671_v45, %v459_v8 }
 0x22f   : > { %525 = vst.msk [vmem:[%s224_s13 + $0x8] sm:$0xff] %vm311_vm1, %v520_v46  ;;  %v510_v48 = vmul.f32 %v595_v36, %v499_v47 }
 0x230   : > { %v673_v49 = vpop.eup %672 }
 0x231   : > { %v521_v50 = vadd.f32 %v596_v39, %v510_v48  ;;  %v500_v51 = vmul.f32 %v673_v49, %v460_v13 }
 0x233   : > { %526 = vst.msk [vmem:[%s224_s13 + $0x10] sm:$0xff] %vm311_vm1, %v521_v50  ;;  %v511_v52 = vmul.f32 %v595_v36, %v500_v51 }
 0x234   : > { %v675_v53 = vpop.eup %674 }
 0x235   : > { %v522_v54 = vadd.f32 %v596_v39, %v511_v52  ;;  %v501_v55 = vmul.f32 %v675_v53, %v461_v17 }
 0x237   : > { %527 = vst.msk [vmem:[%s224_s13 + $0x18] sm:$0xff] %vm311_vm1, %v522_v54  ;;  %v512_v56 = vmul.f32 %v595_v36, %v501_v55 }
 0x239   : > { %v523_v57 = vadd.f32 %v596_v39, %v512_v56 }
 0x23b   : > { %528 = vst.msk [vmem:[%s224_s13 + $0x20] sm:$0xf] %vm447_vm2, %v523_v57 }
 0x23c PF: > { %s15_s18 = sadd.s32 1, %s682_s18  }
 0x23d   : > { %p12_p4 = scmp.ge.s32.totalorder %s15_s18, 4  }
 0x23f   :  { %14 = sbr.rel (!%p12_p4) target bundleno = 1 (0x1), region = 70 }

// kernel: _forward_impl.7
= control target key start
LH: loop header
LB: loop body
LE: loop exit
PB: predicated region body
PF: predicated region fallthrough
CT: control target
= control target key end

     0   :  { %s2514_s13 = smov 0   ;;  %s3159_s0 = inlined_call_operand.vmem [shape: f32[2,36,32], index: 0, kind: input, shape index: {}]   ;;  %s3160_s1 = inlined_call_operand.vmem [shape: f32[9,36,36], index: 1, kind: input, shape index: {}]   ;;  %s3161_s2 = inlined_call_operand.vmem [shape: f32[1,32], index: 2, kind: input, shape index: {}]   ;;  %s3162_s3 = inlined_call_operand.vmem [shape: f32[1,32], index: 3, kind: input, shape index: {}]   ;;  %s3163_s4 = inlined_call_operand.vmem [shape: f32[32,128], index: 4, kind: input, shape index: {}]   ;;  %s3164_s5 = inlined_call_operand.vmem [shape: f32[1,128], index: 5, kind: input, shape index: {}]   ;;  %s3165_s6 = inlined_call_operand.vmem [shape: f32[9,1,128], index: 6, kind: input, shape index: {}]   ;;  %s3166_s7 = inlined_call_operand.vmem [shape: f32[1,128], index: 7, kind: input, shape index: {}]   ;;  %s3167_s8 = inlined_call_operand.vmem [shape: f32[128,32], index: 8, kind: input, shape index: {}]   ;;  %s3168_s9 = inlined_call_operand.vmem [shape: f32[1,32], index: 9, kind: input, shape index: {}]   ;;  %s3169_s10 = inlined_call_operand.vmem [shape: f32[2,36,32], index: 10, kind: output, shape index: {}]  }
   0x1 LB: > { %s1920_s14 = sadd.s32 4294967295, %s2455_s13   ;;  %p1924_p0 = scmp.ge.s32.totalorder %s2455_s13, 1  ;;  %s2455_s13 = sphi %s2514_s13, %s20_s13  }
   0x2   : > { %p312_p1 = scmp.lt.s32.totalorder %s2455_s13, 3 }
   0x4   : > { %p313_p2 = pnand %p1924_p0, %p312_p1 }
   0x5   : > { %p350_p3 = scmp.lt.s32.totalorder (!%p313_p2), %s1920_s14, 1 }
   0x6   : > { %316 = sbr.rel (%p313_p2) target bundleno = 1081 (0x439), region = 60 }
   0xb   : > { %s3171_s14 = smov (!%p350_p3, %s1920_s14), 1  ;;  %vm368_vm0 = vcmask 261120   ;;  %vm381_vm1 = vcmask 257024   ;;  %v460_v35 = vld [vmem:[%s3163_s4 + $0x10] sm:$0xff]  ;;  %v461_v36 = vld [vmem:[%s3163_s4 + $0x18] sm:$0xff]  ;;  %v458_v37 = vld [vmem:[%s3163_s4] sm:$0xff] }
   0xc   : > { %s2423_s15 = smul.u32 40, %s3171_s14  ;;  %v2457_v38 = vmov 0.0   ;;  %v466_v39 = vpack.c.bf16 %v461_v36, %v460_v35  ;;  %v459_v40 = vld [vmem:[%s3163_s4 + $0x8] sm:$0xff]  ;;  %vm2458_vm2 = vmmov 0   ;;  %v1927_v59 = vld [vmem:[%s3161_s2] ss:$0 sm:$0xff] }
   0xd   : > { %2154 = vmatprep.subr.bf16.mxu0 %v2457_v38  ;;  %2158 = vmatprep.mubr.msk.bf16.mxu0 %vm2458_vm2, %v2457_v38  ;;  %v465_v41 = vpack.c.bf16 %v459_v40, %v458_v37  ;;  %vm585_vm3 = vcmask 1043456   ;;  %vm569_vm4 = vcmask 293888  }
   0xe   : > { %s2530_s18 = scalar_lea.vmem %s3159_s0, %s2423_s15  ;;  %2195 = vmatprep.subr.mxu1 %v2457_v38  ;;  %2205 = vmatprep.mubr.msk.f32.mxu1 %vm2458_vm2, %v2457_v38  ;;  %s359_s19 = scalar_lea.vmem %s3169_s10, %s2423_s15 }
   0xf   : > { %v361_v0 = vld [vmem:[%s2530_s18] sm:$0xff]  ;;  %v363_v1 = vld [vmem:[%s2530_s18 + $0x10] sm:$0xff]  ;;  %v362_v2 = vld [vmem:[%s2530_s18 + $0x8] sm:$0xff]  ;;  %2155 = vmatpush3.bf16.msra.mxu0 %v466_v39 }
  0x10   : > { %v369_v3 = vsel %vm368_vm0, %v361_v0, 0.0  ;;  %v375_v4 = vsel %vm368_vm0, %v363_v1, 0.0  ;;  %v364_v5 = vld [vmem:[%s2530_s18 + $0x18] sm:$0xff]  ;;  %v372_v6 = vsel %vm368_vm0, %v362_v2, 0.0  ;;  %v365_v8 = vld [vmem:[%s2530_s18 + $0x20] sm:$0xf]  ;;  %2156 = vmatprep.subr.bf16.mxu0 %v2457_v38 }
  0x11   : > { %370 = vadd.xlane.f32.xlu0 %v369_v3  ;;  %376 = vadd.xlane.f32.xlu1 %v375_v4  ;;  %v378_v7 = vsel %vm368_vm0, %v364_v5, 0.0  ;;  %v382_v9 = vsel %vm381_vm1, %v365_v8, 0.0 }
  0x13   : > { %2157 = vmatpush3.bf16.msra.mxu0 %v465_v41 }
  0x14   : > { %2170 = vmatprep.subr.mxu0 %v2457_v38 }
  0x15   : > { %373 = vadd.xlane.f32.xlu0 %v372_v6  ;;  %379 = vadd.xlane.f32.xlu1 %v378_v7 }
  0x19   : > { %383 = vadd.xlane.f32.xlu0 %v382_v9 }
  0x9a   : > { %v371_v10 = vpop.xlane.xlu0 %370  ;;  %v377_v11 = vpop.xlane.xlu1 %376 }
  0x9b   : > { %v386_v12 = vmul.f32 0.03125, %v371_v10  ;;  %v388_v13 = vmul.f32 0.03125, %v377_v11 }
  0x9d   : > { %v2542_v14 = vsub.f32 %v361_v0, %v386_v12  ;;  %v2544_v15 = vsub.f32 %v363_v1, %v388_v13  ;;  %v1928_v0 = vld [vmem:[%s3162_s3] ss:$0 sm:$0xff] }
  0x9e   : > { %v374_v16 = vpop.xlane.xlu0 %373  ;;  %v380_v17 = vpop.xlane.xlu1 %379 }
  0x9f   : > { %v387_v18 = vmul.f32 0.03125, %v374_v16  ;;  %v389_v19 = vmul.f32 0.03125, %v380_v17  ;;  %v396_v20 = vmul.f32 %v2542_v14, %v2542_v14  ;;  %v398_v21 = vmul.f32 %v2544_v15, %v2544_v15 }
  0xa1   : > { %v392_v22 = vsub.f32 %v362_v2, %v387_v18  ;;  %v2550_v23 = vsub.f32 %v364_v5, %v389_v19  ;;  %v401_v24 = vsel %vm368_vm0, %v396_v20, 0.0  ;;  %v407_v27 = vsel %vm368_vm0, %v398_v21, 0.0 }
  0xa2   : > { %402 = vadd.xlane.f32.xlu1 %v401_v24  ;;  %v384_v25 = vpop.xlane.xlu0 %383 }
  0xa3   : > { %v390_v26 = vmul.f32 0.03125, %v384_v25  ;;  %v397_v28 = vmul.f32 %v392_v22, %v392_v22  ;;  %v399_v29 = vmul.f32 %v2550_v23, %v2550_v23 }
  0xa5   : > { %v2556_v30 = vsub.f32 %v365_v8, %v390_v26  ;;  %v404_v31 = vsel %vm368_vm0, %v397_v28, 0.0  ;;  %v410_v32 = vsel %vm368_vm0, %v399_v29, 0.0 }
  0xa6   : > { %408 = vadd.xlane.f32.xlu1 %v407_v27  ;;  %405 = vadd.xlane.f32.xlu0 %v404_v31 }
  0xa7   : > { %v400_v33 = vmul.f32 %v2556_v30, %v2556_v30 }
  0xa9   : > { %v413_v34 = vsel %vm381_vm1, %v400_v33, 0.0 }
  0xaa   : > { %411 = vadd.xlane.f32.xlu0 %v410_v32  ;;  %414 = vadd.xlane.f32.xlu1 %v413_v34 }
 0x12b   : > { %v403_v42 = vpop.xlane.xlu1 %402 }
 0x12c   : > { %v416_v43 = vmul.f32 0.03125, %v403_v42 }
 0x12e   : > { %v421_v44 = vadd.f32 1e-06, %v416_v43 }
 0x12f   : > { %v409_v45 = vpop.xlane.xlu1 %408  ;;  %v406_v46 = vpop.xlane.xlu0 %405 }
 0x130   : > { %2434 = vrsqrt.f32 %v421_v44  ;;  %v418_v47 = vmul.f32 0.03125, %v409_v45  ;;  %v417_v48 = vmul.f32 0.03125, %v406_v46 }
 0x132   : > { %v422_v49 = vadd.f32 1e-06, %v417_v48  ;;  %v423_v50 = vadd.f32 1e-06, %v418_v47 }
 0x133   : > { %v415_v51 = vpop.xlane.xlu1 %414  ;;  %v412_v52 = vpop.xlane.xlu0 %411 }
 0x134   : > { %v419_v53 = vmul.f32 0.03125, %v412_v52  ;;  %2436 = vrsqrt.f32 %v422_v49  ;;  %v420_v54 = vmul.f32 0.03125, %v415_v51 }
 0x135   : > { %2438 = vrsqrt.f32 %v423_v50 }
 0x136   : > { %v424_v55 = vadd.f32 1e-06, %v419_v53  ;;  %v425_v56 = vadd.f32 1e-06, %v420_v54 }
 0x138   : > { %2440 = vrsqrt.f32 %v424_v55 }
 0x139   : > { %2442 = vrsqrt.f32 %v425_v56 }
 0x13d   : > { %v2435_v57 = vpop.eup %2434 }
 0x13e   : > { %v431_v58 = vmul.f32 %v2435_v57, %v2542_v14 }
 0x140   : > { %v442_v62 = vmul.f32 %v1927_v59, %v431_v58 }
 0x141   : > { %v2437_v60 = vpop.eup %2436 }
 0x142   : > { %v432_v61 = vmul.f32 %v2437_v60, %v392_v22  ;;  %v2439_v63 = vpop.eup %2438  ;;  %v453_v3 = vadd.f32 %v1928_v0, %v442_v62  ;;  %v564_v62 = vld [vmem:[%s3160_s1] sm:$0xff] }
 0x143   : > { %v433_v5 = vmul.f32 %v2439_v63, %v2544_v15  ;;  %v1940_v63 = vld [vmem:[%s3160_s1 + $0x28] sm:$0xff] }
 0x144   : > { %v443_v1 = vmul.f32 %v1927_v59, %v432_v61 }
 0x145   : > { %v2441_v2 = vpop.eup %2440  ;;  %v444_v10 = vmul.f32 %v1927_v59, %v433_v5  ;;  %v1943_v5 = vld [vmem:[%s3160_s1 + $0x40] sm:$0xff] }
 0x146   : > { %v454_v4 = vadd.f32 %v1928_v0, %v443_v1  ;;  %v434_v6 = vmul.f32 %v2441_v2, %v2550_v23  ;;  %v2443_v9 = vpop.eup %2442  ;;  %v1929_v23 = vld [vmem:[%s3164_s5] ss:$0 sm:$0xff]  ;;  %v1941_v1 = vld [vmem:[%s3160_s1 + $0x30] sm:$0xff] }
 0x147   : > { %v435_v12 = vmul.f32 %v2443_v9, %v2556_v30  ;;  %v455_v13 = vadd.f32 %v1928_v0, %v444_v10  ;;  %v566_v2 = vld [vmem:[%s3160_s1 + $0x10] sm:$0xff]  ;;  %v1966_v9 = vld [vmem:[%s3160_s1 + $0x78] sm:$0xff] }
 0x148   : > { %v462_v7 = vpack.c.bf16 %v454_v4, %v453_v3  ;;  %v445_v8 = vmul.f32 %v1927_v59, %v434_v6  ;;  %v1942_v3 = vld [vmem:[%s3160_s1 + $0x38] sm:$0xff]  ;;  %v568_v6 = vld [vmem:[%s3160_s1 + $0x20] sm:$0xf] }
 0x149   : > { %v446_v16 = vmul.f32 %v1927_v59, %v435_v12  ;;  %v567_v4 = vld [vmem:[%s3160_s1 + $0x18] sm:$0xff]  ;;  %v1955_v12 = vld [vmem:[%s3160_s1 + $0x60] sm:$0xff] }
 0x14a   : > { %2159 = vmatmul.mubr.msk.bf16.vlgmr.msra.gmra.mxu0 %vm368_vm0, %v462_v7  ;;  %v456_v11 = vadd.f32 %v1928_v0, %v445_v8  ;;  %v1944_v7 = vld [vmem:[%s3160_s1 + $0x48] sm:$0xf]  ;;  %v1953_v8 = vld [vmem:[%s3160_s1 + $0x50] sm:$0xff]  ;;  %v1954_v10 = vld [vmem:[%s3160_s1 + $0x58] sm:$0xff] }
 0x14b   : > { %2162 = vmatprep.mubr.msk.bf16.mxu0 %vm2458_vm2, %v2457_v38  ;;  %v457_v15 = vadd.f32 %v1928_v0, %v446_v16  ;;  %v565_v0 = vld [vmem:[%s3160_s1 + $0x8] sm:$0xff]  ;;  %v1969_v16 = vld [vmem:[%s3160_s1 + $0x90] sm:$0xff] }
 0x14c   : > { %v463_v14 = vpack.c.bf16 %v456_v11, %v455_v13  ;;  %v1967_v11 = vld [vmem:[%s3160_s1 + $0x80] sm:$0xff]  ;;  %v1968_v13 = vld [vmem:[%s3160_s1 + $0x88] sm:$0xff] }
 0x14d   : > { %v464_v17 = vpack.c.bf16 %v457_v15, %v457_v15  ;;  %v1957_v15 = vld [vmem:[%s3160_s1 + $0x70] sm:$0xf] }
 0x152   : > { %2163 = vmatmul.mubr.msk.bf16.gmra.mxu0 %vm368_vm0, %v463_v14  ;;  %v1956_v14 = vld [vmem:[%s3160_s1 + $0x68] sm:$0xff] }
 0x153   : > { %2166 = vmatprep.mubr.msk.bf16.mxu0 %vm2458_vm2, %v2457_v38 }
 0x15a   : > { %2167 = vmatmul.mubr.msk.bf16.gmra.mxu0 %vm368_vm0, %v464_v17  ;;  %v1970_v17 = vld [vmem:[%s3160_s1 + $0x98] sm:$0xf] }
 0x15b   : > { %2180 = vmatprep.mubr.msk.f32.mxu0 %vm2458_vm2, %v2457_v38 }
 0x20a   : > { %v517_v18 = vpop.f32.mrf.mxu0 }
 0x20b   : > { %v518_v30 = vadd.f32 %v1929_v23, %v517_v18  ;;  %v1979_v18 = vld [vmem:[%s3160_s1 + $0xa0] sm:$0xff] }
 0x20c   : > { %v2160_v19 = vpop.f32.mrf.mxu0 }
 0x20d   : > { %v539_v39 = vadd.f32 3.0, %v518_v30  ;;  %v1992_v19 = vld [vmem:[%s3160_s1 + $0xc8] sm:$0xff] }
 0x20e   : > { %v520_v20 = vpop.f32.mrf.mxu0 }
 0x20f   : > { %v521_v27 = vadd.f32 %v1929_v23, %v520_v20  ;;  %v544_v47 = vmax.f32 %v539_v39, 0.0  ;;  %v1980_v20 = vld [vmem:[%s3160_s1 + $0xa8] sm:$0xff]  ;;  %v2031_v39 = vld [vmem:[%s3160_s1 + $0x140] sm:$0xff] }
 0x210   : > { %v2161_v21 = vpop.f32.mrf.mxu0 }
 0x211   : > { %v540_v34 = vadd.f32 3.0, %v521_v27  ;;  %v549_v53 = vmin.f32 %v544_v47, 6.0  ;;  %v1993_v21 = vld [vmem:[%s3160_s1 + $0xd0] sm:$0xff]  ;;  %v1772_v47 = vld [vmem:[%s3167_s8 + $0x60] sm:$0xff] }
 0x212   : > { %v525_v22 = vpop.f32.mrf.mxu0 }
 0x213   : > { %v526_v25 = vadd.f32 %v1929_v23, %v525_v22  ;;  %v545_v43 = vmax.f32 %v540_v34, 0.0  ;;  %v554_v58 = vmul.f32 %v549_v53, %v518_v30  ;;  %v1981_v22 = vld [vmem:[%s3160_s1 + $0xb0] sm:$0xff]  ;;  %v2006_v30 = vld [vmem:[%s3160_s1 + $0xf8] sm:$0xff]  ;;  %v2008_v34 = vld [vmem:[%s3160_s1 + $0x108] sm:$0xff] }
 0x214   : > { %v2164_v24 = vpop.f32.mrf.mxu0  ;;  %v1768_v53 = vld [vmem:[%s3167_s8 + $0x40] sm:$0xff] }
 0x215   : > { %v541_v31 = vadd.f32 3.0, %v526_v25  ;;  %v550_v50 = vmin.f32 %v545_v43, 6.0  ;;  %v2627_v61 = vmul.f32 0.16666667, %v554_v58  ;;  %v1982_v24 = vld [vmem:[%s3160_s1 + $0xb8] sm:$0xff] }
 0x216   : > { %v528_v26 = vpop.f32.mrf.mxu0  ;;  %v2035_v43 = vld [vmem:[%s3160_s1 + $0x160] sm:$0xf] }
 0x217   : > { %v529_v28 = vadd.f32 %v1929_v23, %v528_v26  ;;  %v546_v40 = vmax.f32 %v541_v31, 0.0  ;;  %v555_v56 = vmul.f32 %v550_v50, %v521_v27  ;;  %v1983_v26 = vld [vmem:[%s3160_s1 + $0xc0] sm:$0xf]  ;;  %v1996_v27 = vld [vmem:[%s3160_s1 + $0xe8] sm:$0xf]  ;;  %v1770_v50 = vld [vmem:[%s3167_s8 + $0x50] sm:$0xff] }
 0x218   : > { %v2165_v29 = vpop.f32.mrf.mxu0  ;;  %v2019_v31 = vld [vmem:[%s3160_s1 + $0x120] sm:$0xff] }
 0x219   : > { %v542_v32 = vadd.f32 3.0, %v529_v28  ;;  %v551_v48 = vmin.f32 %v546_v40, 6.0  ;;  %v2621_v60 = vmul.f32 0.16666667, %v555_v56  ;;  %v2018_v29 = vld [vmem:[%s3160_s1 + $0x118] sm:$0xff]  ;;  %v2032_v40 = vld [vmem:[%s3160_s1 + $0x148] sm:$0xff] }
 0x21a   : > { %v533_v33 = vpop.f32.mrf.mxu0  ;;  %v1766_v56 = vld [vmem:[%s3167_s8 + $0x30] sm:$0xff] }
 0x21b   : > { %v547_v35 = vmax.f32 %v542_v32, 0.0  ;;  %v534_v36 = vadd.f32 %v1929_v23, %v533_v33  ;;  %v556_v54 = vmul.f32 %v551_v48, %v526_v25  ;;  %v1994_v23 = vld [vmem:[%s3160_s1 + $0xd8] sm:$0xff]  ;;  %v1995_v25 = vld [vmem:[%s3160_s1 + $0xe0] sm:$0xff]  ;;  %v2020_v33 = vld [vmem:[%s3160_s1 + $0x128] sm:$0xff] }
 0x21c   : > { %v2168_v37 = vpop.f32.mrf.mxu0  ;;  %v2007_v32 = vld [vmem:[%s3160_s1 + $0x100] sm:$0xff]  ;;  %v1773_v48 = vld [vmem:[%s3167_s8 + $0x68] sm:$0xff] }
 0x21d   : > { %v543_v41 = vadd.f32 3.0, %v534_v36  ;;  %v552_v44 = vmin.f32 %v547_v35, 6.0  ;;  %v2615_v59 = vmul.f32 0.16666667, %v556_v54  ;;  %v2021_v35 = vld [vmem:[%s3160_s1 + $0x130] sm:$0xff]  ;;  %v1769_v54 = vld [vmem:[%s3167_s8 + $0x48] sm:$0xff] }
 0x21e   : > { %v536_v42 = vpop.f32.mrf.mxu0  ;;  %v2022_v37 = vld [vmem:[%s3160_s1 + $0x138] sm:$0xf] }
 0x21f   : > { %v548_v45 = vmax.f32 %v543_v41, 0.0  ;;  %v557_v51 = vmul.f32 %v552_v44, %v529_v28  ;;  %v2005_v28 = vld [vmem:[%s3160_s1 + $0xf0] sm:$0xff]  ;;  %v2034_v42 = vld [vmem:[%s3160_s1 + $0x158] sm:$0xff] }
 0x220   : > { %v2169_v46 = vpop.f32.mrf.mxu0  ;;  %v2033_v41 = vld [vmem:[%s3160_s1 + $0x150] sm:$0xff] }
 0x221   : > { %v553_v49 = vmin.f32 %v548_v45, 6.0  ;;  %v2607_v57 = vmul.f32 0.16666667, %v557_v51  ;;  %v1774_v44 = vld [vmem:[%s3167_s8 + $0x70] sm:$0xff]  ;;  %v1775_v45 = vld [vmem:[%s3167_s8 + $0x78] sm:$0xff] }
 0x222   : > { %v1786_v46 = vpack.c.bf16 %v1775_v45, %v1774_v44  ;;  %v1771_v51 = vld [vmem:[%s3167_s8 + $0x58] sm:$0xff] }
 0x223   : > { %v558_v52 = vmul.f32 %v553_v49, %v534_v36  ;;  %v2009_v36 = vld [vmem:[%s3160_s1 + $0x110] sm:$0xf]  ;;  %v1785_v49 = vpack.c.bf16 %v1773_v48, %v1772_v47 }
 0x225   : > { %v2605_v55 = vmul.f32 0.16666667, %v558_v52  ;;  %v1784_v52 = vpack.c.bf16 %v1771_v51, %v1770_v50 }
 0x227   : > { %2171 = vmatpush3.msk.msra.mxu0 %vm585_vm3, %v2605_v55  ;;  %2196 = vmatpush3.msk.msra.mxu1 %vm585_vm3, %v2605_v55 }
 0x228   : > { %2172 = vmatprep.subr.mxu0 %v2457_v38  ;;  %2197 = vmatprep.subr.mxu1 %v2457_v38 }
 0x229   : > { %2173 = vmatpush3.msra.mxu0 %v2607_v57  ;;  %2198 = vmatpush3.msra.mxu1 %v2607_v57 }
 0x22a   : > { %2174 = vmatprep.subr.mxu0 %v2457_v38  ;;  %2199 = vmatprep.subr.mxu1 %v2457_v38 }
 0x22b   : > { %2175 = vmatpush3.msra.mxu0 %v2615_v59  ;;  %2200 = vmatpush3.msra.mxu1 %v2615_v59 }
 0x22c   : > { %2176 = vmatprep.subr.mxu0 %v2457_v38  ;;  %2201 = vmatprep.subr.mxu1 %v2457_v38 }
 0x22d   : > { %2177 = vmatpush3.msra.mxu0 %v2621_v60  ;;  %2202 = vmatpush3.msra.mxu1 %v2621_v60 }
 0x22e   : > { %2178 = vmatprep.subr.mxu0 %v2457_v38  ;;  %2203 = vmatprep.subr.mxu1 %v2457_v38 }
 0x22f   : > { %2179 = vmatpush3.msra.mxu0 %v2627_v61  ;;  %2204 = vmatpush3.msra.mxu1 %v2627_v61 }
 0x230   : > { %2181 = vmatmul.mubr.msk.f32.vlgmr.msra.gmra.mxu0 %vm569_vm4, %v564_v62  ;;  %2206 = vmatmul.mubr.msk.f32.vlgmr.msra.gmra.mxu1 %vm569_vm4, %v1940_v63  ;;  %v1762_v62 = vld [vmem:[%s3167_s8 + $0x10] sm:$0xff]  ;;  %v1763_v63 = vld [vmem:[%s3167_s8 + $0x18] sm:$0xff] }
 0x231   : > { %2220 = vmatprep.subr.mxu0 %v2457_v38  ;;  %2245 = vmatprep.subr.mxu1 %v2457_v38 }
 0x232   : > { %2221 = vmatpush3.msk.msra.mxu0 %vm585_vm3, %v2605_v55  ;;  %2246 = vmatpush3.msk.msra.mxu1 %vm585_vm3, %v2605_v55 }
 0x233   : > { %2222 = vmatprep.subr.mxu0 %v2457_v38  ;;  %2247 = vmatprep.subr.mxu1 %v2457_v38 }
 0x234   : > { %2183 = vmatprep.mubr.msk.f32.mxu0 %vm2458_vm2, %v2457_v38  ;;  %2208 = vmatprep.mubr.msk.f32.mxu1 %vm2458_vm2, %v2457_v38 }
 0x235   : > { %2223 = vmatpush3.msra.mxu0 %v2607_v57  ;;  %2248 = vmatpush3.msra.mxu1 %v2607_v57 }
 0x236   : > { %2184 = vmatmul.mubr.msk.f32.gmra.mxu0 %vm569_vm4, %v565_v0  ;;  %2209 = vmatmul.mubr.msk.f32.gmra.mxu1 %vm569_vm4, %v1941_v1  ;;  %v1780_v0 = vpack.c.bf16 %v1763_v63, %v1762_v62  ;;  %v1760_v1 = vld [vmem:[%s3167_s8] sm:$0xff] }
 0x237   : > { %2224 = vmatprep.subr.mxu0 %v2457_v38  ;;  %2249 = vmatprep.subr.mxu1 %v2457_v38 }
 0x238   : > { %2225 = vmatpush3.msra.mxu0 %v2615_v59  ;;  %2250 = vmatpush3.msra.mxu1 %v2615_v59 }
 0x239   : > { %2226 = vmatprep.subr.mxu0 %v2457_v38  ;;  %2251 = vmatprep.subr.mxu1 %v2457_v38 }
 0x23a   : > { %2186 = vmatprep.mubr.msk.f32.mxu0 %vm2458_vm2, %v2457_v38  ;;  %2211 = vmatprep.mubr.msk.f32.mxu1 %vm2458_vm2, %v2457_v38 }
 0x23b   : > { %2227 = vmatpush3.msra.mxu0 %v2621_v60  ;;  %2252 = vmatpush3.msra.mxu1 %v2621_v60 }
 0x23c   : > { %2187 = vmatmul.mubr.msk.f32.gmra.mxu0 %vm569_vm4, %v566_v2  ;;  %2212 = vmatmul.mubr.msk.f32.gmra.mxu1 %vm569_vm4, %v1942_v3  ;;  %v1761_v2 = vld [vmem:[%s3167_s8 + $0x8] sm:$0xff] }
 0x23d   : > { %2228 = vmatprep.subr.mxu0 %v2457_v38  ;;  %2253 = vmatprep.subr.mxu1 %v2457_v38  ;;  %v1779_v3 = vpack.c.bf16 %v1761_v2, %v1760_v1 }
 0x23e   : > { %2229 = vmatpush3.msra.mxu0 %v2627_v61  ;;  %2254 = vmatpush3.msra.mxu1 %v2627_v61 }
 0x23f   : > { %2189 = vmatprep.mubr.msk.f32.mxu0 %vm2458_vm2, %v2457_v38  ;;  %2214 = vmatprep.mubr.msk.f32.mxu1 %vm2458_vm2, %v2457_v38 }
 0x240   : > { %2190 = vmatmul.mubr.msk.f32.gmra.mxu0 %vm569_vm4, %v567_v4  ;;  %2215 = vmatmul.mubr.msk.f32.gmra.mxu1 %vm569_vm4, %v1943_v5  ;;  %v1939_v4 = vld [vmem:[%s3165_s6] ss:$0 sm:$0xff]  ;;  %v1952_v5 = vld [vmem:[%s3165_s6 + $0x1] ss:$0 sm:$0xff] }
 0x241   : > { %2192 = vmatprep.mubr.msk.f32.mxu0 %vm2458_vm2, %v2457_v38  ;;  %2217 = vmatprep.mubr.msk.f32.mxu1 %vm2458_vm2, %v2457_v38 }
 0x242   : > { %2270 = vmatprep.subr.mxu0 %v2457_v38  ;;  %2295 = vmatprep.subr.mxu1 %v2457_v38 }
 0x244   : > { %2193 = vmatmul.mubr.msk.f32.gmra.mxu0 %vm569_vm4, %v568_v6  ;;  %2218 = vmatmul.mubr.msk.f32.gmra.mxu1 %vm569_vm4, %v1944_v7 }
 0x245   : > { %2230 = vmatprep.mubr.msk.f32.mxu0 %vm2458_vm2, %v2457_v38  ;;  %2255 = vmatprep.mubr.msk.f32.mxu1 %vm2458_vm2, %v2457_v38 }
 0x248   : > { %2231 = vmatmul.mubr.msk.f32.vlgmr.msra.gmra.mxu0 %vm569_vm4, %v1953_v8  ;;  %2256 = vmatmul.mubr.msk.f32.vlgmr.msra.gmra.mxu1 %vm569_vm4, %v1966_v9 }
 0x249   : > { %2271 = vmatpush3.msk.msra.mxu0 %vm585_vm3, %v2605_v55  ;;  %2296 = vmatpush3.msk.msra.mxu1 %vm585_vm3, %v2605_v55 }
 0x24a   : > { %2272 = vmatprep.subr.mxu0 %v2457_v38  ;;  %2297 = vmatprep.subr.mxu1 %v2457_v38 }
 0x24b   : > { %2273 = vmatpush3.msra.mxu0 %v2607_v57  ;;  %2298 = vmatpush3.msra.mxu1 %v2607_v57 }
 0x24c   : > { %2233 = vmatprep.mubr.msk.f32.mxu0 %vm2458_vm2, %v2457_v38  ;;  %2258 = vmatprep.mubr.msk.f32.mxu1 %vm2458_vm2, %v2457_v38 }
 0x24d   : > { %2274 = vmatprep.subr.mxu0 %v2457_v38  ;;  %2299 = vmatprep.subr.mxu1 %v2457_v38 }
 0x24e   : > { %2234 = vmatmul.mubr.msk.f32.gmra.mxu0 %vm569_vm4, %v1954_v10  ;;  %2259 = vmatmul.mubr.msk.f32.gmra.mxu1 %vm569_vm4, %v1967_v11 }
 0x24f   : > { %2275 = vmatpush3.msra.mxu0 %v2615_v59  ;;  %2300 = vmatpush3.msra.mxu1 %v2615_v59 }
 0x250   : > { %2276 = vmatprep.subr.mxu0 %v2457_v38  ;;  %2301 = vmatprep.subr.mxu1 %v2457_v38 }
 0x251   : > { %2277 = vmatpush3.msra.mxu0 %v2621_v60  ;;  %2302 = vmatpush3.msra.mxu1 %v2621_v60 }
 0x252   : > { %2236 = vmatprep.mubr.msk.f32.mxu0 %vm2458_vm2, %v2457_v38  ;;  %2261 = vmatprep.mubr.msk.f32.mxu1 %vm2458_vm2, %v2457_v38 }
 0x253   : > { %2278 = vmatprep.subr.mxu0 %v2457_v38  ;;  %2303 = vmatprep.subr.mxu1 %v2457_v38 }
 0x254   : > { %2237 = vmatmul.mubr.msk.f32.gmra.mxu0 %vm569_vm4, %v1955_v12  ;;  %2262 = vmatmul.mubr.msk.f32.gmra.mxu1 %vm569_vm4, %v1968_v13 }
 0x255   : > { %2279 = vmatpush3.msra.mxu0 %v2627_v61  ;;  %2304 = vmatpush3.msra.mxu1 %v2627_v61 }
 0x256   : > { %2239 = vmatprep.mubr.msk.f32.mxu0 %vm2458_vm2, %v2457_v38  ;;  %2264 = vmatprep.mubr.msk.f32.mxu1 %vm2458_vm2, %v2457_v38 }
 0x257   : > { %2320 = vmatprep.subr.mxu0 %v2457_v38  ;;  %2345 = vmatprep.subr.mxu1 %v2457_v38 }
 0x258   : > { %2240 = vmatmul.mubr.msk.f32.gmra.mxu0 %vm569_vm4, %v1956_v14  ;;  %2265 = vmatmul.mubr.msk.f32.gmra.mxu1 %vm569_vm4, %v1969_v16 }
 0x259   : > { %2242 = vmatprep.mubr.msk.f32.mxu0 %vm2458_vm2, %v2457_v38  ;;  %2267 = vmatprep.mubr.msk.f32.mxu1 %vm2458_vm2, %v2457_v38 }
 0x25c   : > { %2243 = vmatmul.mubr.msk.f32.gmra.mxu0 %vm569_vm4, %v1957_v15  ;;  %2268 = vmatmul.mubr.msk.f32.gmra.mxu1 %vm569_vm4, %v1970_v17 }
 0x25d   : > { %2280 = vmatprep.mubr.msk.f32.mxu0 %vm2458_vm2, %v2457_v38  ;;  %2305 = vmatprep.mubr.msk.f32.mxu1 %vm2458_vm2, %v2457_v38 }
 0x260   : > { %2281 = vmatmul.mubr.msk.f32.vlgmr.msra.gmra.mxu0 %vm569_vm4, %v1979_v18  ;;  %2306 = vmatmul.mubr.msk.f32.vlgmr.msra.gmra.mxu1 %vm569_vm4, %v1992_v19 }
 0x261   : > { %2321 = vmatpush3.msk.msra.mxu0 %vm585_vm3, %v2605_v55  ;;  %2346 = vmatpush3.msk.msra.mxu1 %vm585_vm3, %v2605_v55 }
 0x262   : > { %2322 = vmatprep.subr.mxu0 %v2457_v38  ;;  %2347 = vmatprep.subr.mxu1 %v2457_v38 }
 0x263   : > { %2323 = vmatpush3.msra.mxu0 %v2607_v57  ;;  %2348 = vmatpush3.msra.mxu1 %v2607_v57 }
 0x264   : > { %2283 = vmatprep.mubr.msk.f32.mxu0 %vm2458_vm2, %v2457_v38  ;;  %2324 = vmatprep.subr.mxu0 %v2457_v38 }
 0x265   : > { %2349 = vmatprep.subr.mxu1 %v2457_v38  ;;  %2284 = vmatmul.mubr.msk.f32.gmra.mxu0 %vm569_vm4, %v1980_v20 }
 0x266   : > { %2325 = vmatpush3.msra.mxu0 %v2615_v59  ;;  %2350 = vmatpush3.msra.mxu1 %v2615_v59 }
 0x267   : > { %2308 = vmatprep.mubr.msk.f32.mxu1 %vm2458_vm2, %v2457_v38  ;;  %2326 = vmatprep.subr.mxu0 %v2457_v38 }
 0x268   : > { %2351 = vmatprep.subr.mxu1 %v2457_v38  ;;  %2309 = vmatmul.mubr.msk.f32.gmra.mxu1 %vm569_vm4, %v1993_v21 }
 0x269   : > { %2327 = vmatpush3.msra.mxu0 %v2621_v60  ;;  %2352 = vmatpush3.msra.mxu1 %v2621_v60 }
 0x26a   : > { %2286 = vmatprep.mubr.msk.f32.mxu0 %vm2458_vm2, %v2457_v38  ;;  %2328 = vmatprep.subr.mxu0 %v2457_v38 }
 0x26b   : > { %2353 = vmatprep.subr.mxu1 %v2457_v38  ;;  %2287 = vmatmul.mubr.msk.f32.gmra.mxu0 %vm569_vm4, %v1981_v22 }
 0x26c   : > { %2329 = vmatpush3.msra.mxu0 %v2627_v61  ;;  %2354 = vmatpush3.msra.mxu1 %v2627_v61 }
 0x26d   : > { %2311 = vmatprep.mubr.msk.f32.mxu1 %vm2458_vm2, %v2457_v38  ;;  %2289 = vmatprep.mubr.msk.f32.mxu0 %vm2458_vm2, %v2457_v38 }
 0x26e   : > { %2312 = vmatmul.mubr.msk.f32.gmra.mxu1 %vm569_vm4, %v1994_v23  ;;  %2370 = vmatprep.subr.mxu0 %v2457_v38 }
 0x26f   : > { %2290 = vmatmul.mubr.msk.f32.gmra.mxu0 %vm569_vm4, %v1982_v24  ;;  %2314 = vmatprep.mubr.msk.f32.mxu1 %vm2458_vm2, %v2457_v38 }
 0x270   : > { %2292 = vmatprep.mubr.msk.f32.mxu0 %vm2458_vm2, %v2457_v38  ;;  %2395 = vmatprep.subr.bf16.mxu1 %v2457_v38 }
 0x272   : > { %2315 = vmatmul.mubr.msk.f32.gmra.mxu1 %vm569_vm4, %v1995_v25 }
 0x273   : > { %2293 = vmatmul.mubr.msk.f32.gmra.mxu0 %vm569_vm4, %v1983_v26  ;;  %2317 = vmatprep.mubr.msk.f32.mxu1 %vm2458_vm2, %v2457_v38 }
 0x274   : > { %2330 = vmatprep.mubr.msk.f32.mxu0 %vm2458_vm2, %v2457_v38 }
 0x276   : > { %2318 = vmatmul.mubr.msk.f32.gmra.mxu1 %vm569_vm4, %v1996_v27 }
 0x277   : > { %2331 = vmatmul.mubr.msk.f32.vlgmr.msra.gmra.mxu0 %vm569_vm4, %v2005_v28  ;;  %2355 = vmatprep.mubr.msk.f32.mxu1 %vm2458_vm2, %v2457_v38 }
 0x278   : > { %2371 = vmatpush3.msk.msra.mxu0 %vm585_vm3, %v2605_v55  ;;  %2333 = vmatprep.mubr.msk.f32.mxu0 %vm2458_vm2, %v2457_v38  ;;  %v1783_v55 = vpack.c.bf16 %v1769_v54, %v1768_v53 }
 0x279   : > { %2372 = vmatprep.subr.mxu0 %v2457_v38 }
 0x27a   : > { %2356 = vmatmul.mubr.msk.f32.vlgmr.msra.gmra.mxu1 %vm569_vm4, %v2018_v29  ;;  %2373 = vmatpush3.msra.mxu0 %v2607_v57  ;;  %v1767_v57 = vld [vmem:[%s3167_s8 + $0x38] sm:$0xff] }
 0x27b   : > { %2374 = vmatprep.subr.mxu0 %v2457_v38  ;;  %2334 = vmatmul.mubr.msk.f32.gmra.mxu0 %vm569_vm4, %v2006_v30  ;;  %v1782_v58 = vpack.c.bf16 %v1767_v57, %v1766_v56 }
 0x27c   : > { %2375 = vmatpush3.msra.mxu0 %v2615_v59  ;;  %2358 = vmatprep.mubr.msk.f32.mxu1 %vm2458_vm2, %v2457_v38  ;;  %v1764_v59 = vld [vmem:[%s3167_s8 + $0x20] sm:$0xff] }
 0x27d   : > { %2376 = vmatprep.subr.mxu0 %v2457_v38  ;;  %2336 = vmatprep.mubr.msk.f32.mxu0 %vm2458_vm2, %v2457_v38 }
 0x27e   : > { %2359 = vmatmul.mubr.msk.f32.gmra.mxu1 %vm569_vm4, %v2019_v31  ;;  %2377 = vmatpush3.msra.mxu0 %v2621_v60  ;;  %v1765_v60 = vld [vmem:[%s3167_s8 + $0x28] sm:$0xff] }
 0x27f   : > { %2378 = vmatprep.subr.mxu0 %v2457_v38  ;;  %2337 = vmatmul.mubr.msk.f32.gmra.mxu0 %vm569_vm4, %v2007_v32 }
 0x280   : > { %2379 = vmatpush3.msra.mxu0 %v2627_v61  ;;  %2361 = vmatprep.mubr.msk.f32.mxu1 %vm2458_vm2, %v2457_v38  ;;  %v1781_v61 = vpack.c.bf16 %v1765_v60, %v1764_v59 }
 0x281   : > { %2339 = vmatprep.mubr.msk.f32.mxu0 %vm2458_vm2, %v2457_v38  ;;  %2396 = vmatpush3.bf16.msra.mxu1 %v1786_v46 }
 0x282   : > { %2362 = vmatmul.mubr.msk.f32.gmra.mxu1 %vm569_vm4, %v2020_v33  ;;  %2397 = vmatprep.subr.bf16.mxu1 %v2457_v38 }
 0x283   : > { %2340 = vmatmul.mubr.msk.f32.gmra.mxu0 %vm569_vm4, %v2008_v34  ;;  %2364 = vmatprep.mubr.msk.f32.mxu1 %vm2458_vm2, %v2457_v38 }
 0x284   : > { %2342 = vmatprep.mubr.msk.f32.mxu0 %vm2458_vm2, %v2457_v38 }
 0x285   : > { %2398 = vmatpush3.bf16.msra.mxu1 %v1785_v49 }
 0x286   : > { %2365 = vmatmul.mubr.msk.f32.gmra.mxu1 %vm569_vm4, %v2021_v35  ;;  %2399 = vmatprep.subr.bf16.mxu1 %v2457_v38 }
 0x287   : > { %2343 = vmatmul.mubr.msk.f32.gmra.mxu0 %vm569_vm4, %v2009_v36  ;;  %2367 = vmatprep.mubr.msk.f32.mxu1 %vm2458_vm2, %v2457_v38 }
 0x288   : > { %2380 = vmatprep.mubr.msk.f32.mxu0 %vm2458_vm2, %v2457_v38 }
 0x289   : > { %2400 = vmatpush3.bf16.msra.mxu1 %v1784_v52 }
 0x28a   : > { %2368 = vmatmul.mubr.msk.f32.gmra.mxu1 %vm569_vm4, %v2022_v37  ;;  %2401 = vmatprep.subr.bf16.mxu1 %v2457_v38 }
 0x28b   : > { %2381 = vmatmul.mubr.msk.f32.vlgmr.msra.gmra.mxu0 %vm569_vm4, %v2031_v39  ;;  %2411 = vmatprep.mubr.msk.bf16.mxu1 %vm2458_vm2, %v2457_v38 }
 0x28c   : > { %2383 = vmatprep.mubr.msk.f32.mxu0 %vm2458_vm2, %v2457_v38 }
 0x28d   : > { %2402 = vmatpush3.bf16.msra.mxu1 %v1783_v55 }
 0x28e   : > { %2403 = vmatprep.subr.bf16.mxu1 %v2457_v38 }
 0x28f   : > { %2384 = vmatmul.mubr.msk.f32.gmra.mxu0 %vm569_vm4, %v2032_v40 }
 0x290   : > { %2386 = vmatprep.mubr.msk.f32.mxu0 %vm2458_vm2, %v2457_v38 }
 0x291   : > { %2404 = vmatpush3.bf16.msra.mxu1 %v1782_v58 }
 0x292   : > { %2405 = vmatprep.subr.bf16.mxu1 %v2457_v38 }
 0x293   : > { %2387 = vmatmul.mubr.msk.f32.gmra.mxu0 %vm569_vm4, %v2033_v41 }
 0x294   : > { %2389 = vmatprep.mubr.msk.f32.mxu0 %vm2458_vm2, %v2457_v38 }
 0x295   : > { %2406 = vmatpush3.bf16.msra.mxu1 %v1781_v61 }
 0x296   : > { %2407 = vmatprep.subr.bf16.mxu1 %v2457_v38 }
 0x297   : > { %2390 = vmatmul.mubr.msk.f32.gmra.mxu0 %vm569_vm4, %v2034_v42 }
 0x298   : > { %2392 = vmatprep.mubr.msk.f32.mxu0 %vm2458_vm2, %v2457_v38 }
 0x299   : > { %2408 = vmatpush3.bf16.msra.mxu1 %v1780_v0 }
 0x29a   : > { %2409 = vmatprep.subr.bf16.mxu1 %v2457_v38 }
 0x29b   : > { %2393 = vmatmul.mubr.msk.f32.gmra.mxu0 %vm569_vm4, %v2035_v43 }
 0x29d   : > { %2410 = vmatpush3.bf16.msra.mxu1 %v1779_v3 }
 0x2f0   : > { %v655_v6 = vpop.f32.mrf.mxu0  ;;  %v778_v7 = vpop.f32.mrf.mxu1 }
 0x2f1   : > { %v686_v8 = vmul.f32 %v1939_v4, %v655_v6  ;;  %v810_v9 = vmul.f32 %v1952_v5, %v778_v7 }
 0x2f2   : > { %v2182_v10 = vpop.f32.mrf.mxu0  ;;  %v2207_v11 = vpop.f32.mrf.mxu1 }
 0x2f3   : > { %v3042_v12 = vadd.f32 %v810_v9, %v686_v8 }
 0x2f6   : > { %v660_v13 = vpop.f32.mrf.mxu0  ;;  %v783_v14 = vpop.f32.mrf.mxu1 }
 0x2f7   : > { %v687_v16 = vmul.f32 %v1939_v4, %v660_v13  ;;  %v811_v15 = vmul.f32 %v1952_v5, %v783_v14 }
 0x2f8   : > { %v2185_v17 = vpop.f32.mrf.mxu0  ;;  %v2210_v18 = vpop.f32.mrf.mxu1 }
 0x2f9   : > { %v3044_v19 = vadd.f32 %v811_v15, %v687_v16  ;;  %v1965_v15 = vld [vmem:[%s3165_s6 + $0x2] ss:$0 sm:$0xff] }
 0x2fc   : > { %v665_v20 = vpop.f32.mrf.mxu0  ;;  %v788_v21 = vpop.f32.mrf.mxu1 }
 0x2fd   : > { %v688_v22 = vmul.f32 %v1939_v4, %v665_v20  ;;  %v812_v23 = vmul.f32 %v1952_v5, %v788_v21 }
 0x2fe   : > { %v2188_v24 = vpop.f32.mrf.mxu0  ;;  %v2213_v25 = vpop.f32.mrf.mxu1 }
 0x2ff   : > { %v3046_v26 = vadd.f32 %v812_v23, %v688_v22  ;;  %v1978_v23 = vld [vmem:[%s3165_s6 + $0x3] ss:$0 sm:$0xff] }
 0x300   : > { %v670_v27 = vpop.f32.mrf.mxu0  ;;  %v793_v28 = vpop.f32.mrf.mxu1 }
 0x301   : > { %v689_v29 = vmul.f32 %v1939_v4, %v670_v27  ;;  %v813_v30 = vmul.f32 %v1952_v5, %v793_v28  ;;  %v3073_v27 = vld [vmem:[%s3165_s6 + $0x4] ss:$0 sm:$0xff] }
 0x302   : > { %v2191_v31 = vpop.f32.mrf.mxu0  ;;  %v2216_v32 = vpop.f32.mrf.mxu1 }
 0x303   : > { %v3048_v33 = vadd.f32 %v813_v30, %v689_v29 }
 0x304   : > { %v675_v34 = vpop.f32.mrf.mxu0  ;;  %v798_v35 = vpop.f32.mrf.mxu1 }
 0x305   : > { %v690_v36 = vmul.f32 %v1939_v4, %v675_v34  ;;  %v814_v37 = vmul.f32 %v1952_v5, %v798_v35 }
 0x306   : > { %v2194_v39 = vpop.f32.mrf.mxu0  ;;  %v2219_v40 = vpop.f32.mrf.mxu1 }
 0x307   : > { %v3050_v41 = vadd.f32 %v814_v37, %v690_v36  ;;  %v3080_v39 = vld [vmem:[%s3165_s6 + $0x5] ss:$0 sm:$0xff] }
 0x308   : > { %v907_v42 = vpop.f32.mrf.mxu0  ;;  %v1036_v43 = vpop.f32.mrf.mxu1 }
 0x309   : > { %v939_v21 = vmul.f32 %v1965_v15, %v907_v42  ;;  %v1068_v30 = vmul.f32 %v1978_v23, %v1036_v43 }
 0x30a   : > { %v2232_v44 = vpop.f32.mrf.mxu0  ;;  %v2257_v45 = vpop.f32.mrf.mxu1 }
 0x30b   : > { %v944_v29 = vadd.f32 %v939_v21, %v3042_v12  ;;  %v3086_v12 = vld [vmem:[%s3165_s6 + $0x6] ss:$0 sm:$0xff] }
 0x30d   : > { %v1073_v42 = vadd.f32 %v1068_v30, %v944_v29 }
 0x30e   : > { %v912_v46 = vpop.f32.mrf.mxu0  ;;  %v1041_v47 = vpop.f32.mrf.mxu1 }
 0x30f   : > { %v940_v31 = vmul.f32 %v1965_v15, %v912_v46  ;;  %v1069_v45 = vmul.f32 %v1978_v23, %v1041_v47 }
 0x310   : > { %v2235_v48 = vpop.f32.mrf.mxu0  ;;  %v2260_v49 = vpop.f32.mrf.mxu1 }
 0x311   : > { %v945_v44 = vadd.f32 %v940_v31, %v3044_v19 }
 0x313   : > { %v1074_v19 = vadd.f32 %v1069_v45, %v945_v44 }
 0x314   : > { %v917_v50 = vpop.f32.mrf.mxu0  ;;  %v1046_v51 = vpop.f32.mrf.mxu1 }
 0x315   : > { %v941_v37 = vmul.f32 %v1965_v15, %v917_v50 }
 0x316   : > { %v2238_v52 = vpop.f32.mrf.mxu0  ;;  %v2263_v53 = vpop.f32.mrf.mxu1 }
 0x317   : > { %v946_v53 = vadd.f32 %v941_v37, %v3046_v26 }
 0x318   : > { %v922_v54 = vpop.f32.mrf.mxu0  ;;  %v3052_v55 = vpop.f32.mrf.mxu1 }
 0x31a   : > { %v2241_v56 = vpop.f32.mrf.mxu0  ;;  %v2266_v57 = vpop.f32.mrf.mxu1 }
 0x31b   : > { %v1070_v56 = vmul.f32 %v1978_v23, %v1046_v51  ;;  %v942_v57 = vmul.f32 %v1965_v15, %v922_v54 }
 0x31c   : > { %v3054_v58 = vpop.f32.mrf.mxu0  ;;  %v3056_v59 = vpop.f32.mrf.mxu1 }
 0x31d   : > { %v1075_v51 = vadd.f32 %v1070_v56, %v946_v53  ;;  %v947_v54 = vadd.f32 %v942_v57, %v3048_v33  ;;  %v3109_v33 = vld [vmem:[%s3165_s6 + $0x8] ss:$0 sm:$0xff] }
 0x31e   : > { %v2244_v60 = vpop.f32.mrf.mxu0  ;;  %v2269_v61 = vpop.f32.mrf.mxu1 }
 0x320   : > { %v1165_v62 = vpop.f32.mrf.mxu0  ;;  %v1294_v63 = vpop.f32.mrf.mxu1 }
 0x321   : > { %v1197_v35 = vmul.f32 %v3073_v27, %v1165_v62  ;;  %v1326_v49 = vmul.f32 %v3080_v39, %v1294_v63 }
 0x322   : > { %v2282_v0 = vpop.f32.mrf.mxu0  ;;  %v2307_v1 = vpop.f32.mrf.mxu1 }
 0x323   : > { %v1202_v46 = vadd.f32 %v1197_v35, %v1073_v42  ;;  %v3096_v0 = vld [vmem:[%s3165_s6 + $0x7] ss:$0 sm:$0xff] }
 0x325   : > { %v1170_v2 = vpop.f32.mrf.mxu0  ;;  %v1331_v1 = vadd.f32 %v1326_v49, %v1202_v46 }
 0x326   : > { %v1198_v50 = vmul.f32 %v3073_v27, %v1170_v2 }
 0x327   : > { %v2285_v3 = vpop.f32.mrf.mxu0 }
 0x328   : > { %v1299_v4 = vpop.f32.mrf.mxu1  ;;  %v1203_v2 = vadd.f32 %v1198_v50, %v1074_v19 }
 0x329   : > { %v1327_v3 = vmul.f32 %v3080_v39, %v1299_v4 }
 0x32a   : > { %v2310_v5 = vpop.f32.mrf.mxu1 }
 0x32b   : > { %v1175_v6 = vpop.f32.mrf.mxu0  ;;  %v1071_v5 = vmul.f32 %v1978_v23, %v3052_v55  ;;  %v1332_v55 = vadd.f32 %v1327_v3, %v1203_v2 }
 0x32c   : > { %v1199_v62 = vmul.f32 %v3073_v27, %v1175_v6 }
 0x32d   : > { %v2288_v7 = vpop.f32.mrf.mxu0 }
 0x32e   : > { %v1304_v8 = vpop.f32.mrf.mxu1  ;;  %v943_v7 = vmul.f32 %v1965_v15, %v3054_v58  ;;  %v1076_v15 = vadd.f32 %v1071_v5, %v947_v54 }
 0x32f   : > { %v1180_v9 = vpop.f32.mrf.mxu0  ;;  %v1328_v21 = vmul.f32 %v3080_v39, %v1304_v8 }
 0x330   : > { %v2313_v10 = vpop.f32.mrf.mxu1  ;;  %v1200_v4 = vmul.f32 %v3073_v27, %v1180_v9 }
 0x331   : > { %v2291_v11 = vpop.f32.mrf.mxu0 }
 0x332   : > { %v3058_v13 = vpop.f32.mrf.mxu1  ;;  %v1205_v35 = vadd.f32 %v1200_v4, %v1076_v15 }
 0x333   : > { %v3060_v14 = vpop.f32.mrf.mxu0  ;;  %v1329_v37 = vmul.f32 %v3080_v39, %v3058_v13 }
 0x334   : > { %v2316_v16 = vpop.f32.mrf.mxu1 }
 0x335   : > { %v2294_v17 = vpop.f32.mrf.mxu0  ;;  %v1334_v49 = vadd.f32 %v1329_v37, %v1205_v35 }
 0x336   : > { %v3065_v18 = vpop.f32.mrf.mxu1 }
 0x337   : > { %v1423_v20 = vpop.f32.mrf.mxu0 }
 0x338   : > { %v2319_v22 = vpop.f32.mrf.mxu1  ;;  %v1455_v47 = vmul.f32 %v3086_v12, %v1423_v20  ;;  %v1204_v20 = vadd.f32 %v1199_v62, %v1075_v51 }
 0x339   : > { %v2332_v24 = vpop.f32.mrf.mxu0 }
 0x33a   : > { %v1552_v25 = vpop.f32.mrf.mxu1  ;;  %v1460_v6 = vadd.f32 %v1455_v47, %v1331_v1  ;;  %v948_v24 = vadd.f32 %v943_v7, %v3050_v41  ;;  %v1201_v41 = vmul.f32 %v3073_v27, %v3060_v14  ;;  %v1330_v14 = vmul.f32 %v3080_v39, %v3065_v18 }
 0x33b   : > { %v1428_v28 = vpop.f32.mrf.mxu0  ;;  %v1584_v11 = vmul.f32 %v3096_v0, %v1552_v25  ;;  %v1072_v25 = vmul.f32 %v1978_v23, %v3056_v59  ;;  %v2044_v59 = vld [vmem:[%s3166_s7] ss:$0 sm:$0xff] }
 0x33c   : > { %v2357_v32 = vpop.f32.mrf.mxu1  ;;  %v1456_v16 = vmul.f32 %v3086_v12, %v1428_v28 }
 0x33d   : > { %v2335_v34 = vpop.f32.mrf.mxu0  ;;  %v1589_v30 = vadd.f32 %v1584_v11, %v1460_v6  ;;  %v1077_v42 = vadd.f32 %v1072_v25, %v948_v24 }
 0x33e   : > { %v1557_v36 = vpop.f32.mrf.mxu1  ;;  %v1461_v8 = vadd.f32 %v1456_v16, %v1332_v55  ;;  %v1333_v34 = vadd.f32 %v1328_v21, %v1204_v20 }
 0x33f   : > { %v1433_v40 = vpop.f32.mrf.mxu0  ;;  %v1585_v9 = vmul.f32 %v3096_v0, %v1557_v36  ;;  %v1206_v50 = vadd.f32 %v1201_v41, %v1077_v42 }
 0x340   : > { %v2360_v48 = vpop.f32.mrf.mxu1  ;;  %v1457_v28 = vmul.f32 %v3086_v12, %v1433_v40 }
 0x341   : > { %v2338_v43 = vpop.f32.mrf.mxu0  ;;  %v1335_v1 = vadd.f32 %v1330_v14, %v1206_v50  ;;  %v2445_v50 = vld [vmem:[%s2530_s18 + $0x8] sm:$0xff] }
 0x342   : > { %v1562_v52 = vpop.f32.mrf.mxu1  ;;  %v1462_v44 = vadd.f32 %v1457_v28, %v1333_v34  ;;  %v1590_v43 = vadd.f32 %v1585_v9, %v1461_v8 }
 0x343   : > { %v1438_v60 = vpop.f32.mrf.mxu0  ;;  %v1586_v36 = vmul.f32 %v3096_v0, %v1562_v52 }
 0x344   : > { %v2363_v61 = vpop.f32.mrf.mxu1  ;;  %v1458_v45 = vmul.f32 %v3086_v12, %v1438_v60 }
 0x345   : > { %v2341_v63 = vpop.f32.mrf.mxu0  ;;  %v1591_v57 = vadd.f32 %v1586_v36, %v1462_v44 }
 0x346   : > { %v1567_v26 = vpop.f32.mrf.mxu1  ;;  %v1463_v19 = vadd.f32 %v1458_v45, %v1334_v49 }
 0x347   : > { %v1443_v10 = vpop.f32.mrf.mxu0  ;;  %v1587_v60 = vmul.f32 %v3096_v0, %v1567_v26 }
 0x348   : > { %v2366_v17 = vpop.f32.mrf.mxu1  ;;  %v1459_v47 = vmul.f32 %v3086_v12, %v1443_v10 }
 0x349   : > { %v2344_v22 = vpop.f32.mrf.mxu0  ;;  %v1592_v7 = vadd.f32 %v1587_v60, %v1463_v19 }
 0x34a   : > { %v1572_v58 = vpop.f32.mrf.mxu1  ;;  %v1464_v18 = vadd.f32 %v1459_v47, %v1335_v1 }
 0x34b   : > { %v1681_v29 = vpop.f32.mrf.mxu0  ;;  %v1588_v39 = vmul.f32 %v3096_v0, %v1572_v58 }
 0x34c   : > { %v1713_v31 = vmul.f32 %v3109_v33, %v1681_v29  ;;  %v2369_v32 = vpop.f32.mrf.mxu1 }
 0x34d   : > { %v2382_v23 = vpop.f32.mrf.mxu0  ;;  %v1593_v21 = vadd.f32 %v1588_v39, %v1464_v18 }
 0x34e   : > { %v1718_v40 = vadd.f32 %v1713_v31, %v1589_v30 }
 0x34f   : > { %v1686_v48 = vpop.f32.mrf.mxu0 }
 0x350   : > { %v1730_v46 = vadd.f32 %v2044_v59, %v1718_v40  ;;  %v1714_v13 = vmul.f32 %v3109_v33, %v1686_v48  ;;  %v2045_v48 = vld [vmem:[%s3168_s9] ss:$0 sm:$0xff] }
 0x351   : > { %v2385_v27 = vpop.f32.mrf.mxu0 }
 0x352   : > { %v1735_v53 = vadd.f32 3.0, %v1730_v46  ;;  %v1719_v56 = vadd.f32 %v1714_v13, %v1590_v43  ;;  %v2444_v43 = vld [vmem:[%s2530_s18] sm:$0xff] }
 0x353   : > { %v1691_v52 = vpop.f32.mrf.mxu0 }
 0x354   : > { %v1740_v61 = vmax.f32 %v1735_v53, 0.0  ;;  %v1731_v62 = vadd.f32 %v2044_v59, %v1719_v56  ;;  %v1715_v63 = vmul.f32 %v3109_v33, %v1691_v52 }
 0x355   : > { %v2388_v2 = vpop.f32.mrf.mxu0 }
 0x356   : > { %v1745_v3 = vmin.f32 %v1740_v61, 6.0  ;;  %v1736_v51 = vadd.f32 3.0, %v1731_v62  ;;  %v1720_v54 = vadd.f32 %v1715_v63, %v1591_v57  ;;  %v2446_v57 = vld [vmem:[%s2530_s18 + $0x10] sm:$0xff]  ;;  %v2447_v61 = vld [vmem:[%s2530_s18 + $0x18] sm:$0xff] }
 0x357   : > { %v1696_v5 = vpop.f32.mrf.mxu0 }
 0x358   : > { %v1741_v6 = vmax.f32 %v1736_v51, 0.0  ;;  %v1732_v11 = vadd.f32 %v2044_v59, %v1720_v54  ;;  %v1716_v12 = vmul.f32 %v3109_v33, %v1696_v5  ;;  %v1750_v10 = vmul.f32 %v1745_v3, %v1730_v46  ;;  %v2448_v3 = vld [vmem:[%s2530_s18 + $0x20] sm:$0xf] }
 0x359   : > { %v2391_v26 = vpop.f32.mrf.mxu0 }
 0x35a   : > { %v1746_v16 = vmin.f32 %v1741_v6, 6.0  ;;  %v1737_v17 = vadd.f32 3.0, %v1732_v11  ;;  %v1721_v20 = vadd.f32 %v1716_v12, %v1592_v7  ;;  %v1755_v25 = vmul.f32 0.16666667, %v1750_v10 }
 0x35b   : > { %v1701_v4 = vpop.f32.mrf.mxu0 }
 0x35c   : > { %v1751_v22 = vmul.f32 %v1746_v16, %v1731_v62  ;;  %v1742_v55 = vmax.f32 %v1737_v17, 0.0  ;;  %v1733_v15 = vadd.f32 %v2044_v59, %v1721_v20  ;;  %v1717_v24 = vmul.f32 %v3109_v33, %v1701_v4 }
 0x35d   : > { %v2394_v0 = vpop.f32.mrf.mxu0 }
 0x35e   : > { %v1756_v58 = vmul.f32 0.16666667, %v1751_v22  ;;  %v1747_v28 = vmin.f32 %v1742_v55, 6.0  ;;  %v1738_v29 = vadd.f32 3.0, %v1733_v15  ;;  %v1722_v30 = vadd.f32 %v1717_v24, %v1593_v21 }
 0x360   : > { %v1776_v8 = vpack.c.bf16 %v1756_v58, %v1755_v25  ;;  %v1743_v9 = vmax.f32 %v1738_v29, 0.0  ;;  %v1734_v31 = vadd.f32 %v2044_v59, %v1722_v30  ;;  %v1752_v35 = vmul.f32 %v1747_v28, %v1732_v11 }
 0x362   : > { %v1748_v32 = vmin.f32 %v1743_v9, 6.0  ;;  %v1739_v34 = vadd.f32 3.0, %v1734_v31  ;;  %2412 = vmatmul.mubr.bf16.vlgmr.msra.gmra.mxu1 %v1776_v8  ;;  %v1757_v41 = vmul.f32 0.16666667, %v1752_v35 }
 0x363   : > { %2415 = vmatprep.mubr.msk.bf16.mxu1 %vm2458_vm2, %v2457_v38 }
 0x364   : > { %v1744_v37 = vmax.f32 %v1739_v34, 0.0  ;;  %v1753_v33 = vmul.f32 %v1748_v32, %v1733_v15 }
 0x366   : > { %v1758_v23 = vmul.f32 0.16666667, %v1753_v33  ;;  %v1749_v40 = vmin.f32 %v1744_v37, 6.0 }
 0x368   : > { %v1777_v42 = vpack.c.bf16 %v1758_v23, %v1757_v41  ;;  %v1754_v44 = vmul.f32 %v1749_v40, %v1734_v31 }
 0x36a   : > { %2416 = vmatmul.mubr.bf16.gmra.mxu1 %v1777_v42  ;;  %v1759_v59 = vmul.f32 0.16666667, %v1754_v44 }
 0x36b   : > { %2419 = vmatprep.mubr.msk.bf16.mxu1 %vm2458_vm2, %v2457_v38 }
 0x36c   : > { %v1778_v36 = vpack.c.bf16 %v1759_v59, %v1759_v59 }
 0x372   : > { %2420 = vmatmul.mubr.bf16.gmra.mxu1 %v1778_v36 }
 0x422   : > { %v1821_v45 = vpop.f32.mrf.mxu1 }
 0x423   : > { %v1843_v46 = vadd.f32 %v2444_v43, %v1821_v45 }
 0x424   : > { %v2413_v13 = vpop.f32.mrf.mxu1 }
 0x425   : > { %v1855_v49 = vadd.f32 %v2045_v48, %v1843_v46 }
 0x426   : > { %v1824_v38 = vpop.f32.mrf.mxu1 }
 0x427   : > { %1860 = vst.msk [vmem:[%s359_s19] sm:$0xff] %vm368_vm0, %v1855_v49  ;;  %v1844_v14 = vadd.f32 %v2445_v50, %v1824_v38 }
 0x428   : > { %v2414_v27 = vpop.f32.mrf.mxu1 }
 0x429   : > { %v1856_v53 = vadd.f32 %v2045_v48, %v1844_v14 }
 0x42a   : > { %v1829_v56 = vpop.f32.mrf.mxu1 }
 0x42b   : > { %1861 = vst.msk [vmem:[%s359_s19 + $0x8] sm:$0xff] %vm368_vm0, %v1856_v53  ;;  %v1845_v19 = vadd.f32 %v2446_v57, %v1829_v56 }
 0x42c   : > { %v2417_v47 = vpop.f32.mrf.mxu1 }
 0x42d   : > { %v1857_v52 = vadd.f32 %v2045_v48, %v1845_v19 }
 0x42e   : > { %v1832_v60 = vpop.f32.mrf.mxu1 }
 0x42f   : > { %1862 = vst.msk [vmem:[%s359_s19 + $0x10] sm:$0xff] %vm368_vm0, %v1857_v52  ;;  %v1846_v62 = vadd.f32 %v2447_v61, %v1832_v60 }
 0x430   : > { %v2418_v63 = vpop.f32.mrf.mxu1 }
 0x431   : > { %v1858_v1 = vadd.f32 %v2045_v48, %v1846_v62 }
 0x432   : > { %v1837_v2 = vpop.f32.mrf.mxu1 }
 0x433   : > { %1863 = vst.msk [vmem:[%s359_s19 + $0x18] sm:$0xff] %vm368_vm0, %v1858_v1  ;;  %v1847_v51 = vadd.f32 %v2448_v3, %v1837_v2 }
 0x434   : > { %v2421_v54 = vpop.f32.mrf.mxu1 }
 0x435   : > { %v1859_v18 = vadd.f32 %v2045_v48, %v1847_v51 }
 0x436   : > { %v1840_v39 = vpop.f32.mrf.mxu1 }
 0x437   : > { %1864 = vst.msk [vmem:[%s359_s19 + $0x20] sm:$0xf] %vm381_vm1, %v1859_v18 }
 0x438   : > { %v2422_v5 = vpop.f32.mrf.mxu1 }
 0x439 PF: > { %s20_s13 = sadd.s32 1, %s2455_s13  }
 0x43a   : > { %p17_p4 = scmp.ge.s32.totalorder %s20_s13, 4  }
 0x43c   :  { %19 = sbr.rel (!%p17_p4) target bundleno = 1 (0x1), region = 106 }

// kernel: _forward_impl.6
= control target key start
LH: loop header
LB: loop body
LE: loop exit
PB: predicated region body
PF: predicated region fallthrough
CT: control target
= control target key end

     0   :  { %s4493_s21 = smov 0   ;;  %s5843_s0 = inlined_call_operand.vmem [shape: f32[2,36,32], index: 0, kind: input, shape index: {}]   ;;  %s5844_s1 = inlined_call_operand.vmem [shape: f32[9,53,36], index: 1, kind: input, shape index: {}]   ;;  %s5845_s2 = inlined_call_operand.vmem [shape: f32[9,53,32], index: 2, kind: input, shape index: {}]   ;;  %s5846_s3 = inlined_call_operand.vmem [shape: f32[53,32], index: 3, kind: input, shape index: {}]   ;;  %s5847_s4 = inlined_call_operand.vmem [shape: f32[1,32], index: 4, kind: input, shape index: {}]   ;;  %s5848_s5 = inlined_call_operand.vmem [shape: f32[1,32], index: 5, kind: input, shape index: {}]   ;;  %s5849_s6 = inlined_call_operand.vmem [shape: f32[1,32], index: 6, kind: input, shape index: {}]   ;;  %s5850_s7 = inlined_call_operand.vmem [shape: f32[1,32], index: 7, kind: input, shape index: {}]   ;;  %s5851_s8 = inlined_call_operand.vmem [shape: f32[2,32,16], index: 8, kind: input, shape index: {}]   ;;  %s5852_s9 = inlined_call_operand.vmem [shape: f32[2,1,16], index: 9, kind: input, shape index: {}]   ;;  %s5853_s10 = inlined_call_operand.vmem [shape: f32[2,32,16], index: 10, kind: input, shape index: {}]   ;;  %s5854_s11 = inlined_call_operand.vmem [shape: f32[2,1,16], index: 11, kind: input, shape index: {}]   ;;  %s5855_s12 = inlined_call_operand.vmem [shape: f32[2,32,16], index: 12, kind: input, shape index: {}]   ;;  %s5856_s13 = inlined_call_operand.vmem [shape: f32[2,1,16], index: 13, kind: input, shape index: {}]   ;;  %s5857_s14 = inlined_call_operand.vmem [shape: f32[2,16,32], index: 14, kind: input, shape index: {}]   ;;  %s5858_s15 = inlined_call_operand.vmem [shape: f32[1,32], index: 15, kind: input, shape index: {}]   ;;  %s5859_s16 = inlined_call_operand.vmem [shape: f32[2,36,32], index: 16, kind: output, shape index: {}]  }
   0x1   :  { %5860 = sst [smem:[#allocation2_spill]] %s5843_s0 }
   0x2 LB: > { %s3359_s22 = sadd.s32 4294967295, %s4403_s21   ;;  %p3363_p0 = scmp.ge.s32.totalorder %s4403_s21, 1  ;;  %s4403_s21 = sphi %s4493_s21, %s26_s21  }
   0x3   : > { %p462_p1 = scmp.lt.s32.totalorder %s4403_s21, 3 }
   0x5   : > { %p463_p2 = pnand %p3363_p0, %p462_p1 }
   0x6   : > { %p512_p3 = scmp.lt.s32.totalorder (!%p463_p2), %s3359_s22, 1  ;;  %s5861_s26 = sld [smem:[#allocation2_spill]] (!%p463_p2) }
   0x7   : > { %466 = sbr.rel (%p463_p2) target bundleno = 3127 (0xc37), region = 84 }
   0xc   : > { %s5863_s22 = smov (!%p512_p3, %s3359_s22), 1  ;;  %vm543_vm0 = vcmask 257024   ;;  %vm530_vm1 = vcmask 261120   ;;  %v4405_v35 = vmov 0.0   ;;  %vm4406_vm2 = vmmov 0  }
   0xd   : > { %s4316_s23 = smul.u32 40, %s5863_s22  ;;  %3818 = vmatprep.subr.mxu0 %v4405_v35  ;;  %3849 = vmatprep.subr.mxu1 %v4405_v35  ;;  %v3366_v52 = vld [vmem:[%s5847_s4] ss:$0 sm:$0xff]  ;;  %vm657_vm3 = vcmask 1043456   ;;  %vm635_vm4 = vcmask 293888   ;;  %vm2109_vm5 = vcmask 258048  }
   0xe   : > { %3828 = vmatprep.mubr.msk.f32.mxu0 %vm4406_vm2, %v4405_v35  ;;  %3859 = vmatprep.mubr.msk.f32.mxu1 %vm4406_vm2, %v4405_v35  ;;  %v3367_v54 = vld [vmem:[%s5848_s5] ss:$0 sm:$0xff]  ;;  %vm2479_vm6 = vcmask 130048   ;;  %vm2635_vm7 = vcmask 1041408   ;;  %vm2636_vm8 = vcmask 1042432   ;;  %vm2562_vm9 = vcmask 433152  }
   0xf   : > { %s4509_s27 = scalar_lea.vmem %s5861_s26, %s4316_s23  ;;  %vm2575_vm10 = vcmask 429056   ;;  %s521_s18 = scalar_lea.vmem %s5859_s16, %s4316_s23 }
  0x10   : > { %v527_v0 = vld [vmem:[%s4509_s27 + $0x20] sm:$0xf]  ;;  %v526_v1 = vld [vmem:[%s4509_s27 + $0x18] sm:$0xff]  ;;  %v525_v2 = vld [vmem:[%s4509_s27 + $0x10] sm:$0xff] }
  0x11   : > { %v544_v3 = vsel %vm543_vm0, %v527_v0, 0.0  ;;  %v537_v4 = vsel %vm530_vm1, %v525_v2, 0.0  ;;  %v524_v5 = vld [vmem:[%s4509_s27 + $0x8] sm:$0xff]  ;;  %v540_v6 = vsel %vm530_vm1, %v526_v1, 0.0  ;;  %v523_v8 = vld [vmem:[%s4509_s27] sm:$0xff] }
  0x12   : > { %545 = vadd.xlane.f32.xlu0 %v544_v3  ;;  %538 = vadd.xlane.f32.xlu1 %v537_v4  ;;  %v534_v7 = vsel %vm530_vm1, %v524_v5, 0.0  ;;  %v531_v9 = vsel %vm530_vm1, %v523_v8, 0.0 }
  0x16   : > { %541 = vadd.xlane.f32.xlu0 %v540_v6  ;;  %535 = vadd.xlane.f32.xlu1 %v534_v7 }
  0x1a   : > { %532 = vadd.xlane.f32.xlu0 %v531_v9  ;;  %v4572_v9 = vld [vmem:[%s5844_s1 + $0xe0] sm:$0xff] }
  0x9b   : > { %v546_v10 = vpop.xlane.xlu0 %545  ;;  %v539_v11 = vpop.xlane.xlu1 %538 }
  0x9c   : > { %v552_v12 = vmul.f32 0.03125, %v546_v10  ;;  %v550_v13 = vmul.f32 0.03125, %v539_v11  ;;  %v761_v10 = vld [vmem:[%s5844_s1] sm:$0xff]  ;;  %v4595_v11 = vld [vmem:[%s5844_s1 + $0xe8] sm:$0xff] }
  0x9e   : > { %v557_v14 = vsub.f32 %v527_v0, %v552_v12  ;;  %v555_v15 = vsub.f32 %v525_v2, %v550_v13  ;;  %v762_v12 = vld [vmem:[%s5844_s1 + $0x8] sm:$0xff]  ;;  %v4618_v13 = vld [vmem:[%s5844_s1 + $0xf0] sm:$0xff] }
  0x9f   : > { %v542_v16 = vpop.xlane.xlu0 %541  ;;  %v536_v17 = vpop.xlane.xlu1 %535 }
  0xa0   : > { %v551_v18 = vmul.f32 0.03125, %v542_v16  ;;  %v562_v19 = vmul.f32 %v557_v14, %v557_v14  ;;  %v549_v20 = vmul.f32 0.03125, %v536_v17  ;;  %v560_v21 = vmul.f32 %v555_v15, %v555_v15  ;;  %v764_v16 = vld [vmem:[%s5844_s1 + $0x18] sm:$0xff]  ;;  %v4658_v17 = vld [vmem:[%s5844_s1 + $0x100] sm:$0xff] }
  0xa2   : > { %v556_v22 = vsub.f32 %v526_v1, %v551_v18  ;;  %v575_v23 = vsel %vm543_vm0, %v562_v19, 0.0  ;;  %v4522_v24 = vsub.f32 %v524_v5, %v549_v20  ;;  %v569_v27 = vsel %vm530_vm1, %v560_v21, 0.0  ;;  %v765_v18 = vld [vmem:[%s5844_s1 + $0x20] sm:$0xff]  ;;  %v4675_v19 = vld [vmem:[%s5844_s1 + $0x108] sm:$0xff]  ;;  %v4690_v21 = vld [vmem:[%s5844_s1 + $0x110] sm:$0x1f] }
  0xa3   : > { %576 = vadd.xlane.f32.xlu1 %v575_v23  ;;  %v533_v25 = vpop.xlane.xlu0 %532  ;;  %v766_v20 = vld [vmem:[%s5844_s1 + $0x28] sm:$0xff]  ;;  %v3391_v23 = vld [vmem:[%s5844_s1 + $0x38] sm:$0xff] }
  0xa4   : > { %v548_v26 = vmul.f32 0.03125, %v533_v25  ;;  %v561_v28 = vmul.f32 %v556_v22, %v556_v22  ;;  %v559_v29 = vmul.f32 %v4522_v24, %v4522_v24  ;;  %v3392_v25 = vld [vmem:[%s5844_s1 + $0x40] sm:$0xff] }
  0xa6   : > { %v553_v30 = vsub.f32 %v523_v8, %v548_v26  ;;  %v572_v31 = vsel %vm530_vm1, %v561_v28, 0.0  ;;  %v566_v32 = vsel %vm530_vm1, %v559_v29, 0.0  ;;  %v3414_v26 = vld [vmem:[%s5844_s1 + $0x78] sm:$0xff]  ;;  %v3415_v28 = vld [vmem:[%s5844_s1 + $0x80] sm:$0xff]  ;;  %v3394_v29 = vld [vmem:[%s5844_s1 + $0x50] sm:$0xff] }
  0xa7   : > { %570 = vadd.xlane.f32.xlu1 %v569_v27  ;;  %573 = vadd.xlane.f32.xlu0 %v572_v31  ;;  %v3393_v27 = vld [vmem:[%s5844_s1 + $0x48] sm:$0xff]  ;;  %v3395_v31 = vld [vmem:[%s5844_s1 + $0x58] sm:$0xff] }
  0xa8   : > { %v558_v33 = vmul.f32 %v553_v30, %v553_v30 }
  0xaa   : > { %v563_v34 = vsel %vm530_vm1, %v558_v33, 0.0  ;;  %v3396_v33 = vld [vmem:[%s5844_s1 + $0x60] sm:$0xff] }
  0xab   : > { %567 = vadd.xlane.f32.xlu0 %v566_v32  ;;  %564 = vadd.xlane.f32.xlu1 %v563_v34  ;;  %v3417_v32 = vld [vmem:[%s5844_s1 + $0x90] sm:$0xff]  ;;  %v3418_v34 = vld [vmem:[%s5844_s1 + $0x98] sm:$0xff] }
 0x12c   : > { %v577_v36 = vpop.xlane.xlu1 %576 }
 0x12d   : > { %v582_v37 = vmul.f32 0.03125, %v577_v36  ;;  %v3397_v36 = vld [vmem:[%s5844_s1 + $0x68] sm:$0x1f] }
 0x12f   : > { %v587_v38 = vadd.f32 1e-06, %v582_v37  ;;  %v3419_v37 = vld [vmem:[%s5844_s1 + $0xa0] sm:$0x1f] }
 0x130   : > { %v571_v39 = vpop.xlane.xlu1 %570  ;;  %v574_v40 = vpop.xlane.xlu0 %573 }
 0x131   : > { %4328 = vrsqrt.f32 %v587_v38  ;;  %v580_v41 = vmul.f32 0.03125, %v571_v39  ;;  %v581_v42 = vmul.f32 0.03125, %v574_v40  ;;  %v3435_v38 = vld [vmem:[%s5844_s1 + $0xa8] sm:$0xff]  ;;  %v3436_v39 = vld [vmem:[%s5844_s1 + $0xb0] sm:$0xff]  ;;  %v3437_v40 = vld [vmem:[%s5844_s1 + $0xb8] sm:$0xff] }
 0x133   : > { %v585_v43 = vadd.f32 1e-06, %v580_v41  ;;  %v586_v44 = vadd.f32 1e-06, %v581_v42  ;;  %v3438_v41 = vld [vmem:[%s5844_s1 + $0xc0] sm:$0xff]  ;;  %v3439_v42 = vld [vmem:[%s5844_s1 + $0xc8] sm:$0xff] }
 0x134   : > { %v565_v45 = vpop.xlane.xlu1 %564  ;;  %v568_v46 = vpop.xlane.xlu0 %567 }
 0x135   : > { %4330 = vrsqrt.f32 %v585_v43  ;;  %v578_v47 = vmul.f32 0.03125, %v565_v45  ;;  %v579_v48 = vmul.f32 0.03125, %v568_v46  ;;  %v3440_v43 = vld [vmem:[%s5844_s1 + $0xd0] sm:$0xff]  ;;  %v3472_v45 = vld [vmem:[%s5844_s1 + $0x118] sm:$0xff] }
 0x136   : > { %4332 = vrsqrt.f32 %v586_v44  ;;  %v3441_v44 = vld [vmem:[%s5844_s1 + $0xd8] sm:$0x1f]  ;;  %v3494_v46 = vld [vmem:[%s5844_s1 + $0x150] sm:$0xff] }
 0x137   : > { %v583_v49 = vadd.f32 1e-06, %v578_v47  ;;  %v584_v50 = vadd.f32 1e-06, %v579_v48  ;;  %v3473_v47 = vld [vmem:[%s5844_s1 + $0x120] sm:$0xff]  ;;  %v3495_v48 = vld [vmem:[%s5844_s1 + $0x158] sm:$0xff] }
 0x139   : > { %4334 = vrsqrt.f32 %v583_v49  ;;  %v3474_v49 = vld [vmem:[%s5844_s1 + $0x128] sm:$0xff] }
 0x13a   : > { %4336 = vrsqrt.f32 %v584_v50  ;;  %v3496_v50 = vld [vmem:[%s5844_s1 + $0x160] sm:$0xff] }
 0x13e   : > { %v4329_v51 = vpop.eup %4328 }
 0x13f   : > { %v597_v53 = vmul.f32 %v4329_v51, %v557_v14  ;;  %v763_v14 = vld [vmem:[%s5844_s1 + $0x10] sm:$0xff] }
 0x140   : > { %v3475_v51 = vld [vmem:[%s5844_s1 + $0x130] sm:$0xff] }
 0x141   : > { %v608_v55 = vmul.f32 %v3366_v52, %v597_v53  ;;  %v3476_v53 = vld [vmem:[%s5844_s1 + $0x138] sm:$0xff] }
 0x142   : > { %v4331_v56 = vpop.eup %4330 }
 0x143   : > { %v4333_v57 = vpop.eup %4332  ;;  %v4542_v58 = vadd.f32 %v3367_v54, %v608_v55  ;;  %v595_v59 = vmul.f32 %v4331_v56, %v555_v15  ;;  %v4637_v15 = vld [vmem:[%s5844_s1 + $0xf8] sm:$0xff]  ;;  %v3477_v55 = vld [vmem:[%s5844_s1 + $0x140] sm:$0xff] }
 0x144   : > { %v596_v60 = vmul.f32 %v4333_v57, %v556_v22  ;;  %v767_v22 = vld [vmem:[%s5844_s1 + $0x30] sm:$0x1f]  ;;  %v3499_v56 = vld [vmem:[%s5844_s1 + $0x178] sm:$0xff]  ;;  %v3478_v57 = vld [vmem:[%s5844_s1 + $0x148] sm:$0x1f] }
 0x145   : > { %3819 = vmatpush3.msk.msra.mxu0 %vm657_vm3, %v4542_v58  ;;  %3850 = vmatpush3.msk.msra.mxu1 %vm657_vm3, %v4542_v58  ;;  %v606_v62 = vmul.f32 %v3366_v52, %v595_v59  ;;  %v2223_v59 = vld [vmem:[%s5851_s8 + $0x10] sm:$0xff] }
 0x146   : > { %v4335_v61 = vpop.eup %4334  ;;  %v607_v63 = vmul.f32 %v3366_v52, %v596_v60  ;;  %3820 = vmatprep.subr.mxu0 %v4405_v35  ;;  %3851 = vmatprep.subr.mxu1 %v4405_v35  ;;  %v2224_v60 = vld [vmem:[%s5851_s8 + $0x18] sm:$0xff] }
 0x147   : > { %v4337_v0 = vpop.eup %4336  ;;  %v593_v1 = vmul.f32 %v4335_v61, %v553_v30  ;;  %v4553_v4 = vadd.f32 %v3367_v54, %v606_v62  ;;  %v3416_v30 = vld [vmem:[%s5844_s1 + $0x88] sm:$0xff]  ;;  %v3500_v61 = vld [vmem:[%s5844_s1 + $0x180] sm:$0x1f] }
 0x148   : > { %v4550_v2 = vadd.f32 %v3367_v54, %v607_v63  ;;  %v594_v3 = vmul.f32 %v4337_v0, %v4522_v24  ;;  %v3413_v24 = vld [vmem:[%s5844_s1 + $0x70] sm:$0xff]  ;;  %v3516_v62 = vld [vmem:[%s5844_s1 + $0x188] sm:$0xff]  ;;  %v2229_v63 = vpack.c.bf16 %v2224_v60, %v2223_v59  ;;  %v2221_v0 = vld [vmem:[%s5851_s8] sm:$0xff] }
 0x149   : > { %v604_v5 = vmul.f32 %v3366_v52, %v593_v1  ;;  %v2222_v1 = vld [vmem:[%s5851_s8 + $0x8] sm:$0xff] }
 0x14a   : > { %v605_v6 = vmul.f32 %v3366_v52, %v594_v3  ;;  %3821 = vmatpush3.msra.mxu0 %v4550_v2  ;;  %3852 = vmatpush3.msra.mxu1 %v4550_v2  ;;  %v3497_v52 = vld [vmem:[%s5844_s1 + $0x168] sm:$0xff]  ;;  %v3538_v3 = vld [vmem:[%s5844_s1 + $0x1c0] sm:$0xff] }
 0x14b   : > { %3822 = vmatprep.subr.mxu0 %v4405_v35  ;;  %3853 = vmatprep.subr.mxu1 %v4405_v35  ;;  %v4565_v8 = vadd.f32 %v3367_v54, %v604_v5  ;;  %v3517_v5 = vld [vmem:[%s5844_s1 + $0x190] sm:$0xff] }
 0x14c   : > { %v4559_v7 = vadd.f32 %v3367_v54, %v605_v6  ;;  %3823 = vmatpush3.msra.mxu0 %v4553_v4  ;;  %3854 = vmatpush3.msra.mxu1 %v4553_v4  ;;  %v3498_v54 = vld [vmem:[%s5844_s1 + $0x170] sm:$0xff]  ;;  %v2228_v6 = vpack.c.bf16 %v2222_v1, %v2221_v0  ;;  %v633_v0 = vld [vmem:[%s5846_s3 + $0x28] sm:$0xff] }
 0x14d   : > { %3824 = vmatprep.subr.mxu0 %v4405_v35  ;;  %3855 = vmatprep.subr.mxu1 %v4405_v35  ;;  %v894_v1 = vld [vmem:[%s5845_s2 + $0x28] sm:$0xff] }
 0x14e   : > { %3825 = vmatpush3.msra.mxu0 %v4559_v7  ;;  %3856 = vmatpush3.msra.mxu1 %v4559_v7 }
 0x14f   : > { %3826 = vmatprep.subr.mxu0 %v4405_v35  ;;  %3857 = vmatprep.subr.mxu1 %v4405_v35 }
 0x150   : > { %3827 = vmatpush3.msra.mxu0 %v4565_v8  ;;  %3858 = vmatpush3.msra.mxu1 %v4565_v8 }
 0x151   : > { %3829 = vmatmul.mubr.msk.f32.vlgmr.msra.gmra.mxu0 %vm635_vm4, %v4572_v9  ;;  %3860 = vmatmul.mubr.msk.f32.vlgmr.msra.gmra.mxu1 %vm635_vm4, %v761_v10  ;;  %v3518_v10 = vld [vmem:[%s5844_s1 + $0x198] sm:$0xff] }
 0x152   : > { %3880 = vmatprep.subr.mxu0 %v4405_v35  ;;  %3911 = vmatprep.subr.mxu1 %v4405_v35 }
 0x153   : > { %3881 = vmatpush3.msk.msra.mxu0 %vm657_vm3, %v4542_v58  ;;  %3912 = vmatpush3.msk.msra.mxu1 %vm657_vm3, %v4542_v58 }
 0x154   : > { %3882 = vmatprep.subr.mxu0 %v4405_v35  ;;  %3913 = vmatprep.subr.mxu1 %v4405_v35 }
 0x155   : > { %3831 = vmatprep.mubr.msk.f32.mxu0 %vm4406_vm2, %v4405_v35  ;;  %3862 = vmatprep.mubr.msk.f32.mxu1 %vm4406_vm2, %v4405_v35 }
 0x156   : > { %3883 = vmatpush3.msra.mxu0 %v4550_v2  ;;  %3914 = vmatpush3.msra.mxu1 %v4550_v2 }
 0x157   : > { %3832 = vmatmul.mubr.msk.f32.gmra.mxu0 %vm635_vm4, %v4595_v11  ;;  %3863 = vmatmul.mubr.msk.f32.gmra.mxu1 %vm635_vm4, %v762_v12  ;;  %v3519_v12 = vld [vmem:[%s5844_s1 + $0x1a0] sm:$0xff] }
 0x158   : > { %3884 = vmatprep.subr.mxu0 %v4405_v35  ;;  %3915 = vmatprep.subr.mxu1 %v4405_v35 }
 0x159   : > { %3885 = vmatpush3.msra.mxu0 %v4553_v4  ;;  %3916 = vmatpush3.msra.mxu1 %v4553_v4 }
 0x15a   : > { %3886 = vmatprep.subr.mxu0 %v4405_v35  ;;  %3917 = vmatprep.subr.mxu1 %v4405_v35 }
 0x15b   : > { %3834 = vmatprep.mubr.msk.f32.mxu0 %vm4406_vm2, %v4405_v35  ;;  %3865 = vmatprep.mubr.msk.f32.mxu1 %vm4406_vm2, %v4405_v35 }
 0x15c   : > { %3887 = vmatpush3.msra.mxu0 %v4559_v7  ;;  %3918 = vmatpush3.msra.mxu1 %v4559_v7 }
 0x15d   : > { %3835 = vmatmul.mubr.msk.f32.gmra.mxu0 %vm635_vm4, %v4618_v13  ;;  %3866 = vmatmul.mubr.msk.f32.gmra.mxu1 %vm635_vm4, %v763_v14  ;;  %v3520_v14 = vld [vmem:[%s5844_s1 + $0x1a8] sm:$0xff] }
 0x15e   : > { %3888 = vmatprep.subr.mxu0 %v4405_v35  ;;  %3919 = vmatprep.subr.mxu1 %v4405_v35 }
 0x15f   : > { %3889 = vmatpush3.msra.mxu0 %v4565_v8  ;;  %3920 = vmatpush3.msra.mxu1 %v4565_v8 }
 0x160   : > { %3837 = vmatprep.mubr.msk.f32.mxu0 %vm4406_vm2, %v4405_v35  ;;  %3868 = vmatprep.mubr.msk.f32.mxu1 %vm4406_vm2, %v4405_v35 }
 0x161   : > { %3838 = vmatmul.mubr.msk.f32.gmra.mxu0 %vm635_vm4, %v4637_v15  ;;  %3869 = vmatmul.mubr.msk.f32.gmra.mxu1 %vm635_vm4, %v764_v16  ;;  %v3521_v16 = vld [vmem:[%s5844_s1 + $0x1b0] sm:$0xff] }
 0x162   : > { %3840 = vmatprep.mubr.msk.f32.mxu0 %vm4406_vm2, %v4405_v35  ;;  %3871 = vmatprep.mubr.msk.f32.mxu1 %vm4406_vm2, %v4405_v35 }
 0x163   : > { %3942 = vmatprep.subr.mxu0 %v4405_v35  ;;  %3973 = vmatprep.subr.mxu1 %v4405_v35 }
 0x165   : > { %3841 = vmatmul.mubr.msk.f32.gmra.mxu0 %vm635_vm4, %v4658_v17  ;;  %3872 = vmatmul.mubr.msk.f32.gmra.mxu1 %vm635_vm4, %v765_v18  ;;  %v3522_v18 = vld [vmem:[%s5844_s1 + $0x1b8] sm:$0x1f] }
 0x166   : > { %3843 = vmatprep.mubr.msk.f32.mxu0 %vm4406_vm2, %v4405_v35  ;;  %3874 = vmatprep.mubr.msk.f32.mxu1 %vm4406_vm2, %v4405_v35 }
 0x169   : > { %3844 = vmatmul.mubr.msk.f32.gmra.mxu0 %vm635_vm4, %v4675_v19  ;;  %3875 = vmatmul.mubr.msk.f32.gmra.mxu1 %vm635_vm4, %v766_v20  ;;  %v5102_v20 = vpack.c.bf16 %v4559_v7, %v4565_v8 }
 0x16a   : > { %3846 = vmatprep.mubr.msk.f32.mxu0 %vm4406_vm2, %v4405_v35  ;;  %3877 = vmatprep.mubr.msk.f32.mxu1 %vm4406_vm2, %v4405_v35 }
 0x16d   : > { %3847 = vmatmul.mubr.msk.f32.gmra.mxu0 %vm635_vm4, %v4690_v21  ;;  %3878 = vmatmul.mubr.msk.f32.gmra.mxu1 %vm635_vm4, %v767_v22 }
 0x16e   : > { %3890 = vmatprep.mubr.msk.f32.mxu0 %vm4406_vm2, %v4405_v35  ;;  %3921 = vmatprep.mubr.msk.f32.mxu1 %vm4406_vm2, %v4405_v35 }
 0x171   : > { %3891 = vmatmul.mubr.msk.f32.vlgmr.msra.gmra.mxu0 %vm635_vm4, %v3391_v23  ;;  %3922 = vmatmul.mubr.msk.f32.vlgmr.msra.gmra.mxu1 %vm635_vm4, %v3413_v24 }
 0x172   : > { %3943 = vmatpush3.msk.msra.mxu0 %vm657_vm3, %v4542_v58  ;;  %3974 = vmatpush3.msk.msra.mxu1 %vm657_vm3, %v4542_v58 }
 0x173   : > { %3944 = vmatprep.subr.mxu0 %v4405_v35  ;;  %3975 = vmatprep.subr.mxu1 %v4405_v35 }
 0x174   : > { %3945 = vmatpush3.msra.mxu0 %v4550_v2  ;;  %3976 = vmatpush3.msra.mxu1 %v4550_v2 }
 0x175   : > { %3893 = vmatprep.mubr.msk.f32.mxu0 %vm4406_vm2, %v4405_v35  ;;  %3924 = vmatprep.mubr.msk.f32.mxu1 %vm4406_vm2, %v4405_v35 }
 0x176   : > { %3946 = vmatprep.subr.mxu0 %v4405_v35  ;;  %3977 = vmatprep.subr.mxu1 %v4405_v35 }
 0x177   : > { %3894 = vmatmul.mubr.msk.f32.gmra.mxu0 %vm635_vm4, %v3392_v25  ;;  %3925 = vmatmul.mubr.msk.f32.gmra.mxu1 %vm635_vm4, %v3414_v26 }
 0x178   : > { %3947 = vmatpush3.msra.mxu0 %v4553_v4  ;;  %3978 = vmatpush3.msra.mxu1 %v4553_v4 }
 0x179   : > { %3948 = vmatprep.subr.mxu0 %v4405_v35  ;;  %3979 = vmatprep.subr.mxu1 %v4405_v35 }
 0x17a   : > { %3949 = vmatpush3.msra.mxu0 %v4559_v7  ;;  %3980 = vmatpush3.msra.mxu1 %v4559_v7 }
 0x17b   : > { %3896 = vmatprep.mubr.msk.f32.mxu0 %vm4406_vm2, %v4405_v35  ;;  %3927 = vmatprep.mubr.msk.f32.mxu1 %vm4406_vm2, %v4405_v35 }
 0x17c   : > { %3950 = vmatprep.subr.mxu0 %v4405_v35  ;;  %3981 = vmatprep.subr.mxu1 %v4405_v35 }
 0x17d   : > { %3897 = vmatmul.mubr.msk.f32.gmra.mxu0 %vm635_vm4, %v3393_v27  ;;  %3928 = vmatmul.mubr.msk.f32.gmra.mxu1 %vm635_vm4, %v3415_v28  ;;  %v629_v27 = vld [vmem:[%s5846_s3 + $0x8] sm:$0xff] }
 0x17e   : > { %3951 = vmatpush3.msra.mxu0 %v4565_v8  ;;  %3982 = vmatpush3.msra.mxu1 %v4565_v8  ;;  %v890_v28 = vld [vmem:[%s5845_s2 + $0x8] sm:$0xff] }
 0x17f   : > { %3899 = vmatprep.mubr.msk.f32.mxu0 %vm4406_vm2, %v4405_v35  ;;  %3930 = vmatprep.mubr.msk.f32.mxu1 %vm4406_vm2, %v4405_v35 }
 0x180   : > { %4004 = vmatprep.subr.mxu0 %v4405_v35  ;;  %4035 = vmatprep.subr.mxu1 %v4405_v35 }
 0x181   : > { %3900 = vmatmul.mubr.msk.f32.gmra.mxu0 %vm635_vm4, %v3394_v29  ;;  %3931 = vmatmul.mubr.msk.f32.gmra.mxu1 %vm635_vm4, %v3416_v30 }
 0x182   : > { %3902 = vmatprep.mubr.msk.f32.mxu0 %vm4406_vm2, %v4405_v35  ;;  %3933 = vmatprep.mubr.msk.f32.mxu1 %vm4406_vm2, %v4405_v35 }
 0x185   : > { %3903 = vmatmul.mubr.msk.f32.gmra.mxu0 %vm635_vm4, %v3395_v31  ;;  %3934 = vmatmul.mubr.msk.f32.gmra.mxu1 %vm635_vm4, %v3417_v32 }
 0x186   : > { %3905 = vmatprep.mubr.msk.f32.mxu0 %vm4406_vm2, %v4405_v35  ;;  %3936 = vmatprep.mubr.msk.f32.mxu1 %vm4406_vm2, %v4405_v35 }
 0x189   : > { %3906 = vmatmul.mubr.msk.f32.gmra.mxu0 %vm635_vm4, %v3396_v33  ;;  %3937 = vmatmul.mubr.msk.f32.gmra.mxu1 %vm635_vm4, %v3418_v34 }
 0x18a   : > { %3908 = vmatprep.mubr.msk.f32.mxu0 %vm4406_vm2, %v4405_v35  ;;  %3939 = vmatprep.mubr.msk.f32.mxu1 %vm4406_vm2, %v4405_v35 }
 0x18d   : > { %3909 = vmatmul.mubr.msk.f32.gmra.mxu0 %vm635_vm4, %v3397_v36  ;;  %3940 = vmatmul.mubr.msk.f32.gmra.mxu1 %vm635_vm4, %v3419_v37  ;;  %v630_v37 = vld [vmem:[%s5846_s3 + $0x10] sm:$0xff] }
 0x18e   : > { %3952 = vmatprep.mubr.msk.f32.mxu0 %vm4406_vm2, %v4405_v35  ;;  %3983 = vmatprep.mubr.msk.f32.mxu1 %vm4406_vm2, %v4405_v35 }
 0x191   : > { %3953 = vmatmul.mubr.msk.f32.vlgmr.msra.gmra.mxu0 %vm635_vm4, %v3435_v38  ;;  %3984 = vmatmul.mubr.msk.f32.vlgmr.msra.gmra.mxu1 %vm635_vm4, %v4572_v9  ;;  %v3539_v9 = vld [vmem:[%s5844_s1 + $0x1c8] sm:$0xff]  ;;  %v891_v38 = vld [vmem:[%s5845_s2 + $0x10] sm:$0xff] }
 0x192   : > { %4005 = vmatpush3.msk.msra.mxu0 %vm657_vm3, %v4542_v58  ;;  %4036 = vmatpush3.msk.msra.mxu1 %vm657_vm3, %v4542_v58 }
 0x193   : > { %4006 = vmatprep.subr.mxu0 %v4405_v35  ;;  %4037 = vmatprep.subr.mxu1 %v4405_v35 }
 0x194   : > { %4007 = vmatpush3.msra.mxu0 %v4550_v2  ;;  %4038 = vmatpush3.msra.mxu1 %v4550_v2 }
 0x195   : > { %3955 = vmatprep.mubr.msk.f32.mxu0 %vm4406_vm2, %v4405_v35  ;;  %3986 = vmatprep.mubr.msk.f32.mxu1 %vm4406_vm2, %v4405_v35 }
 0x196   : > { %4008 = vmatprep.subr.mxu0 %v4405_v35  ;;  %4039 = vmatprep.subr.mxu1 %v4405_v35 }
 0x197   : > { %3956 = vmatmul.mubr.msk.f32.gmra.mxu0 %vm635_vm4, %v3436_v39  ;;  %3987 = vmatmul.mubr.msk.f32.gmra.mxu1 %vm635_vm4, %v4595_v11  ;;  %v3540_v11 = vld [vmem:[%s5844_s1 + $0x1d0] sm:$0xff] }
 0x198   : > { %4009 = vmatpush3.msra.mxu0 %v4553_v4  ;;  %4040 = vmatpush3.msra.mxu1 %v4553_v4 }
 0x199   : > { %4010 = vmatprep.subr.mxu0 %v4405_v35  ;;  %4041 = vmatprep.subr.mxu1 %v4405_v35 }
 0x19a   : > { %4011 = vmatpush3.msra.mxu0 %v4559_v7  ;;  %4042 = vmatpush3.msra.mxu1 %v4559_v7 }
 0x19b   : > { %3958 = vmatprep.mubr.msk.f32.mxu0 %vm4406_vm2, %v4405_v35  ;;  %3989 = vmatprep.mubr.msk.f32.mxu1 %vm4406_vm2, %v4405_v35 }
 0x19c   : > { %4012 = vmatprep.subr.mxu0 %v4405_v35  ;;  %4043 = vmatprep.subr.mxu1 %v4405_v35 }
 0x19d   : > { %3959 = vmatmul.mubr.msk.f32.gmra.mxu0 %vm635_vm4, %v3437_v40  ;;  %3990 = vmatmul.mubr.msk.f32.gmra.mxu1 %vm635_vm4, %v4618_v13  ;;  %v3541_v13 = vld [vmem:[%s5844_s1 + $0x1d8] sm:$0xff] }
 0x19e   : > { %4013 = vmatpush3.msra.mxu0 %v4565_v8  ;;  %4044 = vmatpush3.msra.mxu1 %v4565_v8 }
 0x19f   : > { %3961 = vmatprep.mubr.msk.f32.mxu0 %vm4406_vm2, %v4405_v35  ;;  %3992 = vmatprep.mubr.msk.f32.mxu1 %vm4406_vm2, %v4405_v35 }
 0x1a0   : > { %4066 = vmatprep.subr.mxu0 %v4405_v35  ;;  %4097 = vmatprep.subr.mxu1 %v4405_v35 }
 0x1a1   : > { %3962 = vmatmul.mubr.msk.f32.gmra.mxu0 %vm635_vm4, %v3438_v41  ;;  %3993 = vmatmul.mubr.msk.f32.gmra.mxu1 %vm635_vm4, %v4637_v15  ;;  %v3542_v15 = vld [vmem:[%s5844_s1 + $0x1e0] sm:$0xff] }
 0x1a2   : > { %3964 = vmatprep.mubr.msk.f32.mxu0 %vm4406_vm2, %v4405_v35  ;;  %3995 = vmatprep.mubr.msk.f32.mxu1 %vm4406_vm2, %v4405_v35 }
 0x1a5   : > { %3965 = vmatmul.mubr.msk.f32.gmra.mxu0 %vm635_vm4, %v3439_v42  ;;  %3996 = vmatmul.mubr.msk.f32.gmra.mxu1 %vm635_vm4, %v4658_v17  ;;  %v3543_v17 = vld [vmem:[%s5844_s1 + $0x1e8] sm:$0xff] }
 0x1a6   : > { %3967 = vmatprep.mubr.msk.f32.mxu0 %vm4406_vm2, %v4405_v35  ;;  %3998 = vmatprep.mubr.msk.f32.mxu1 %vm4406_vm2, %v4405_v35 }
 0x1a9   : > { %3968 = vmatmul.mubr.msk.f32.gmra.mxu0 %vm635_vm4, %v3440_v43  ;;  %3999 = vmatmul.mubr.msk.f32.gmra.mxu1 %vm635_vm4, %v4675_v19  ;;  %v3544_v19 = vld [vmem:[%s5844_s1 + $0x1f0] sm:$0x1f] }
 0x1aa   : > { %3970 = vmatprep.mubr.msk.f32.mxu0 %vm4406_vm2, %v4405_v35  ;;  %4001 = vmatprep.mubr.msk.f32.mxu1 %vm4406_vm2, %v4405_v35 }
 0x1ad   : > { %3971 = vmatmul.mubr.msk.f32.gmra.mxu0 %vm635_vm4, %v3441_v44  ;;  %4002 = vmatmul.mubr.msk.f32.gmra.mxu1 %vm635_vm4, %v4690_v21  ;;  %v5111_v21 = vpack.c.bf16 %v4550_v2, %v4553_v4 }
 0x1ae   : > { %4014 = vmatprep.mubr.msk.f32.mxu0 %vm4406_vm2, %v4405_v35  ;;  %4045 = vmatprep.mubr.msk.f32.mxu1 %vm4406_vm2, %v4405_v35 }
 0x1b1   : > { %4015 = vmatmul.mubr.msk.f32.vlgmr.msra.gmra.mxu0 %vm635_vm4, %v3472_v45  ;;  %4046 = vmatmul.mubr.msk.f32.vlgmr.msra.gmra.mxu1 %vm635_vm4, %v3494_v46  ;;  %v631_v45 = vld [vmem:[%s5846_s3 + $0x18] sm:$0xff] }
 0x1b2   : > { %4067 = vmatpush3.msk.msra.mxu0 %vm657_vm3, %v4542_v58  ;;  %4098 = vmatpush3.msk.msra.mxu1 %vm657_vm3, %v4542_v58  ;;  %v892_v46 = vld [vmem:[%s5845_s2 + $0x18] sm:$0xff] }
 0x1b3   : > { %4068 = vmatprep.subr.mxu0 %v4405_v35  ;;  %4099 = vmatprep.subr.mxu1 %v4405_v35 }
 0x1b4   : > { %4069 = vmatpush3.msra.mxu0 %v4550_v2  ;;  %4100 = vmatpush3.msra.mxu1 %v4550_v2  ;;  %v628_v2 = vld [vmem:[%s5846_s3] sm:$0xff] }
 0x1b5   : > { %4017 = vmatprep.mubr.msk.f32.mxu0 %vm4406_vm2, %v4405_v35  ;;  %4070 = vmatprep.subr.mxu0 %v4405_v35 }
 0x1b6   : > { %4101 = vmatprep.subr.mxu1 %v4405_v35  ;;  %4018 = vmatmul.mubr.msk.f32.gmra.mxu0 %vm635_vm4, %v3473_v47 }
 0x1b7   : > { %4048 = vmatprep.mubr.msk.f32.mxu1 %vm4406_vm2, %v4405_v35  ;;  %4071 = vmatpush3.msra.mxu0 %v4553_v4 }
 0x1b8   : > { %4102 = vmatpush3.msra.mxu1 %v4553_v4  ;;  %4072 = vmatprep.subr.mxu0 %v4405_v35  ;;  %v889_v4 = vld [vmem:[%s5845_s2] sm:$0xff] }
 0x1b9   : > { %4049 = vmatmul.mubr.msk.f32.gmra.mxu1 %vm635_vm4, %v3495_v48  ;;  %4103 = vmatprep.subr.mxu1 %v4405_v35 }
 0x1ba   : > { %4073 = vmatpush3.msra.mxu0 %v4559_v7  ;;  %4104 = vmatpush3.msra.mxu1 %v4559_v7  ;;  %v5119_v7 = vpack.c.bf16 %v4542_v58, %v4542_v58 }
 0x1bb   : > { %4020 = vmatprep.mubr.msk.f32.mxu0 %vm4406_vm2, %v4405_v35  ;;  %4074 = vmatprep.subr.mxu0 %v4405_v35 }
 0x1bc   : > { %4105 = vmatprep.subr.mxu1 %v4405_v35  ;;  %4021 = vmatmul.mubr.msk.f32.gmra.mxu0 %vm635_vm4, %v3474_v49 }
 0x1bd   : > { %4051 = vmatprep.mubr.msk.f32.mxu1 %vm4406_vm2, %v4405_v35  ;;  %4075 = vmatpush3.msra.mxu0 %v4565_v8 }
 0x1be   : > { %4106 = vmatpush3.msra.mxu1 %v4565_v8  ;;  %4023 = vmatprep.mubr.msk.f32.mxu0 %vm4406_vm2, %v4405_v35 }
 0x1bf   : > { %4052 = vmatmul.mubr.msk.f32.gmra.mxu1 %vm635_vm4, %v3496_v50  ;;  %4128 = vmatprep.subr.bf16.mxu0 %v4405_v35 }
 0x1c0   : > { %4024 = vmatmul.mubr.msk.f32.gmra.mxu0 %vm635_vm4, %v3475_v51  ;;  %4054 = vmatprep.mubr.msk.f32.mxu1 %vm4406_vm2, %v4405_v35 }
 0x1c1   : > { %4026 = vmatprep.mubr.msk.f32.mxu0 %vm4406_vm2, %v4405_v35 }
 0x1c3   : > { %4055 = vmatmul.mubr.msk.f32.gmra.mxu1 %vm635_vm4, %v3497_v52 }
 0x1c4   : > { %4027 = vmatmul.mubr.msk.f32.gmra.mxu0 %vm635_vm4, %v3476_v53  ;;  %4057 = vmatprep.mubr.msk.f32.mxu1 %vm4406_vm2, %v4405_v35 }
 0x1c5   : > { %4029 = vmatprep.mubr.msk.f32.mxu0 %vm4406_vm2, %v4405_v35 }
 0x1c7   : > { %4058 = vmatmul.mubr.msk.f32.gmra.mxu1 %vm635_vm4, %v3498_v54  ;;  %v632_v54 = vld [vmem:[%s5846_s3 + $0x20] sm:$0xff] }
 0x1c8   : > { %4030 = vmatmul.mubr.msk.f32.gmra.mxu0 %vm635_vm4, %v3477_v55  ;;  %4060 = vmatprep.mubr.msk.f32.mxu1 %vm4406_vm2, %v4405_v35  ;;  %v893_v55 = vld [vmem:[%s5845_s2 + $0x20] sm:$0xff] }
 0x1c9   : > { %4032 = vmatprep.mubr.msk.f32.mxu0 %vm4406_vm2, %v4405_v35 }
 0x1cb   : > { %4061 = vmatmul.mubr.msk.f32.gmra.mxu1 %vm635_vm4, %v3499_v56 }
 0x1cc   : > { %4033 = vmatmul.mubr.msk.f32.gmra.mxu0 %vm635_vm4, %v3478_v57  ;;  %4063 = vmatprep.mubr.msk.f32.mxu1 %vm4406_vm2, %v4405_v35 }
 0x1cd   : > { %4076 = vmatprep.mubr.msk.f32.mxu0 %vm4406_vm2, %v4405_v35 }
 0x1cf   : > { %4064 = vmatmul.mubr.msk.f32.gmra.mxu1 %vm635_vm4, %v3500_v61 }
 0x1d0   : > { %4077 = vmatmul.mubr.msk.f32.vlgmr.msra.gmra.mxu0 %vm635_vm4, %v3516_v62  ;;  %4107 = vmatprep.mubr.msk.f32.mxu1 %vm4406_vm2, %v4405_v35 }
 0x1d1   : > { %4079 = vmatprep.mubr.msk.f32.mxu0 %vm4406_vm2, %v4405_v35  ;;  %4129 = vmatpush3.bf16.msra.mxu0 %v2229_v63 }
 0x1d2   : > { %4130 = vmatprep.subr.bf16.mxu0 %v4405_v35 }
 0x1d3   : > { %4108 = vmatmul.mubr.msk.f32.vlgmr.msra.gmra.mxu1 %vm635_vm4, %v3538_v3 }
 0x1d4   : > { %4080 = vmatmul.mubr.msk.f32.gmra.mxu0 %vm635_vm4, %v3517_v5  ;;  %4110 = vmatprep.mubr.msk.f32.mxu1 %vm4406_vm2, %v4405_v35 }
 0x1d5   : > { %4082 = vmatprep.mubr.msk.f32.mxu0 %vm4406_vm2, %v4405_v35  ;;  %4131 = vmatpush3.bf16.msra.mxu0 %v2228_v6 }
 0x1d6   : > { %4168 = vmatprep.subr.bf16.mxu0 %v4405_v35 }
 0x1d7   : > { %4111 = vmatmul.mubr.msk.f32.gmra.mxu1 %vm635_vm4, %v3539_v9 }
 0x1d8   : > { %4083 = vmatmul.mubr.msk.f32.gmra.mxu0 %vm635_vm4, %v3518_v10  ;;  %4113 = vmatprep.mubr.msk.f32.mxu1 %vm4406_vm2, %v4405_v35 }
 0x1d9   : > { %4085 = vmatprep.mubr.msk.f32.mxu0 %vm4406_vm2, %v4405_v35 }
 0x1db   : > { %4114 = vmatmul.mubr.msk.f32.gmra.mxu1 %vm635_vm4, %v3540_v11 }
 0x1dc   : > { %4086 = vmatmul.mubr.msk.f32.gmra.mxu0 %vm635_vm4, %v3519_v12  ;;  %4116 = vmatprep.mubr.msk.f32.mxu1 %vm4406_vm2, %v4405_v35 }
 0x1dd   : > { %4088 = vmatprep.mubr.msk.f32.mxu0 %vm4406_vm2, %v4405_v35 }
 0x1df   : > { %4117 = vmatmul.mubr.msk.f32.gmra.mxu1 %vm635_vm4, %v3541_v13  ;;  %v634_v13 = vld [vmem:[%s5846_s3 + $0x30] sm:$0x1f] }
 0x1e0   : > { %4089 = vmatmul.mubr.msk.f32.gmra.mxu0 %vm635_vm4, %v3520_v14  ;;  %4119 = vmatprep.mubr.msk.f32.mxu1 %vm4406_vm2, %v4405_v35  ;;  %v895_v14 = vld [vmem:[%s5845_s2 + $0x30] sm:$0x1f] }
 0x1e1   : > { %4091 = vmatprep.mubr.msk.f32.mxu0 %vm4406_vm2, %v4405_v35 }
 0x1e3   : > { %4120 = vmatmul.mubr.msk.f32.gmra.mxu1 %vm635_vm4, %v3542_v15 }
 0x1e4   : > { %4092 = vmatmul.mubr.msk.f32.gmra.mxu0 %vm635_vm4, %v3521_v16  ;;  %4122 = vmatprep.mubr.msk.f32.mxu1 %vm4406_vm2, %v4405_v35 }
 0x1e5   : > { %4094 = vmatprep.mubr.msk.f32.mxu0 %vm4406_vm2, %v4405_v35 }
 0x1e7   : > { %4123 = vmatmul.mubr.msk.f32.gmra.mxu1 %vm635_vm4, %v3543_v17 }
 0x1e8   : > { %4095 = vmatmul.mubr.msk.f32.gmra.mxu0 %vm635_vm4, %v3522_v18  ;;  %4125 = vmatprep.mubr.msk.f32.mxu1 %vm4406_vm2, %v4405_v35 }
 0x1e9   : > { %4132 = vmatprep.mubr.msk.bf16.mxu0 %vm4406_vm2, %v4405_v35 }
 0x1eb   : > { %4126 = vmatmul.mubr.msk.f32.gmra.mxu1 %vm635_vm4, %v3544_v19 }
 0x1ec   : > { %4133 = vmatmul.mubr.msk.bf16.vlgmr.msra.gmra.mxu0 %vm530_vm1, %v5102_v20 }
 0x1ed   : > { %4136 = vmatprep.mubr.msk.bf16.mxu0 %vm4406_vm2, %v4405_v35 }
 0x1f4   : > { %4137 = vmatmul.mubr.msk.bf16.gmra.mxu0 %vm530_vm1, %v5111_v21 }
 0x1f5   : > { %4140 = vmatprep.mubr.msk.bf16.mxu0 %vm4406_vm2, %v4405_v35 }
 0x1fc   : > { %4141 = vmatmul.mubr.msk.bf16.gmra.mxu0 %vm530_vm1, %v5119_v7 }
 0x1fd   : > { %4176 = vmatprep.mubr.msk.bf16.mxu0 %vm4406_vm2, %v4405_v35 }
 0x211   : > { %v727_v8 = vpop.f32.mrf.mxu0  ;;  %v855_v22 = vpop.f32.mrf.mxu1 }
 0x212   : > { %v728_v23 = vadd.f32 %v727_v8, %v628_v2  ;;  %v896_v24 = vmul.f32 %v889_v4, %v855_v22  ;;  %v3406_v8 = vld [vmem:[%s5845_s2 + $0x38] sm:$0xff]  ;;  %v3428_v22 = vld [vmem:[%s5845_s2 + $0x70] sm:$0xff] }
 0x213   : > { %v3830_v58 = vpop.f32.mrf.mxu0  ;;  %v3861_v25 = vpop.f32.mrf.mxu1 }
 0x214   : > { %v5131_v26 = vadd.f32 %v896_v24, %v728_v23 }
 0x217   : > { %v732_v29 = vpop.f32.mrf.mxu0  ;;  %v860_v30 = vpop.f32.mrf.mxu1 }
 0x218   : > { %v733_v31 = vadd.f32 %v732_v29, %v629_v27  ;;  %v897_v32 = vmul.f32 %v890_v28, %v860_v30 }
 0x219   : > { %v3833_v33 = vpop.f32.mrf.mxu0  ;;  %v3864_v34 = vpop.f32.mrf.mxu1 }
 0x21a   : > { %v5139_v36 = vadd.f32 %v897_v32, %v733_v31  ;;  %v3407_v31 = vld [vmem:[%s5845_s2 + $0x40] sm:$0xff]  ;;  %v3429_v32 = vld [vmem:[%s5845_s2 + $0x78] sm:$0xff] }
 0x21d   : > { %v737_v39 = vpop.f32.mrf.mxu0  ;;  %v865_v40 = vpop.f32.mrf.mxu1 }
 0x21e   : > { %v738_v41 = vadd.f32 %v737_v39, %v630_v37  ;;  %v898_v42 = vmul.f32 %v891_v38, %v865_v40 }
 0x21f   : > { %v3836_v43 = vpop.f32.mrf.mxu0  ;;  %v3867_v44 = vpop.f32.mrf.mxu1 }
 0x220   : > { %v5153_v47 = vadd.f32 %v898_v42, %v738_v41  ;;  %v3430_v43 = vld [vmem:[%s5845_s2 + $0x80] sm:$0xff] }
 0x221   : > { %v742_v48 = vpop.f32.mrf.mxu0  ;;  %v870_v49 = vpop.f32.mrf.mxu1 }
 0x222   : > { %v743_v50 = vadd.f32 %v742_v48, %v631_v45  ;;  %v899_v51 = vmul.f32 %v892_v46, %v870_v49 }
 0x223   : > { %v3839_v52 = vpop.f32.mrf.mxu0  ;;  %v3870_v53 = vpop.f32.mrf.mxu1 }
 0x224   : > { %v5161_v56 = vadd.f32 %v899_v51, %v743_v50  ;;  %v3431_v52 = vld [vmem:[%s5845_s2 + $0x88] sm:$0xff] }
 0x225   : > { %v747_v57 = vpop.f32.mrf.mxu0  ;;  %v875_v59 = vpop.f32.mrf.mxu1 }
 0x226   : > { %v748_v60 = vadd.f32 %v747_v57, %v632_v54  ;;  %v900_v61 = vmul.f32 %v893_v55, %v875_v59 }
 0x227   : > { %v3842_v62 = vpop.f32.mrf.mxu0  ;;  %v3873_v63 = vpop.f32.mrf.mxu1 }
 0x228   : > { %v5169_v3 = vadd.f32 %v900_v61, %v748_v60  ;;  %v3410_v63 = vld [vmem:[%s5845_s2 + $0x58] sm:$0xff] }
 0x229   : > { %v752_v5 = vpop.f32.mrf.mxu0  ;;  %v880_v6 = vpop.f32.mrf.mxu1 }
 0x22a   : > { %v753_v9 = vadd.f32 %v752_v5, %v633_v0  ;;  %v901_v10 = vmul.f32 %v894_v1, %v880_v6  ;;  %v3432_v0 = vld [vmem:[%s5845_s2 + $0x90] sm:$0xff] }
 0x22b   : > { %v3845_v11 = vpop.f32.mrf.mxu0  ;;  %v3876_v12 = vpop.f32.mrf.mxu1 }
 0x22c   : > { %v5177_v15 = vadd.f32 %v901_v10, %v753_v9 }
 0x22d   : > { %v757_v16 = vpop.f32.mrf.mxu0  ;;  %v885_v17 = vpop.f32.mrf.mxu1 }
 0x22e   : > { %v758_v18 = vadd.f32 %v757_v16, %v634_v13  ;;  %v902_v19 = vmul.f32 %v895_v14, %v885_v17  ;;  %v3411_v13 = vld [vmem:[%s5845_s2 + $0x60] sm:$0xff]  ;;  %v3433_v14 = vld [vmem:[%s5845_s2 + $0x98] sm:$0xff] }
 0x22f   : > { %v3848_v2 = vpop.f32.mrf.mxu0  ;;  %v3879_v4 = vpop.f32.mrf.mxu1 }
 0x230   : > { %v5185_v23 = vadd.f32 %v902_v19, %v758_v18 }
 0x231   : > { %v1005_v24 = vpop.f32.mrf.mxu0  ;;  %v1156_v58 = vpop.f32.mrf.mxu1 }
 0x232   : > { %v1047_v25 = vmul.f32 %v3406_v8, %v1005_v24  ;;  %v1198_v27 = vmul.f32 %v3428_v22, %v1156_v58  ;;  %v3412_v22 = vld [vmem:[%s5845_s2 + $0x68] sm:$0x1f]  ;;  %v3434_v24 = vld [vmem:[%s5845_s2 + $0xa0] sm:$0x1f] }
 0x233   : > { %v3892_v28 = vpop.f32.mrf.mxu0  ;;  %v3923_v29 = vpop.f32.mrf.mxu1 }
 0x234   : > { %v1054_v30 = vadd.f32 %v1047_v25, %v5131_v26  ;;  %v3408_v26 = vld [vmem:[%s5845_s2 + $0x48] sm:$0xff] }
 0x236   : > { %v5194_v33 = vadd.f32 %v1198_v27, %v1054_v30 }
 0x237   : > { %v1010_v34 = vpop.f32.mrf.mxu0  ;;  %v1161_v37 = vpop.f32.mrf.mxu1 }
 0x238   : > { %v1048_v38 = vmul.f32 %v3407_v31, %v1010_v34  ;;  %v1199_v39 = vmul.f32 %v3429_v32, %v1161_v37 }
 0x239   : > { %v3895_v40 = vpop.f32.mrf.mxu0  ;;  %v3926_v41 = vpop.f32.mrf.mxu1 }
 0x23a   : > { %v1055_v42 = vadd.f32 %v1048_v38, %v5139_v36  ;;  %v3409_v36 = vld [vmem:[%s5845_s2 + $0x50] sm:$0xff] }
 0x23c   : > { %v5203_v44 = vadd.f32 %v1199_v39, %v1055_v42 }
 0x23d   : > { %v1015_v45 = vpop.f32.mrf.mxu0  ;;  %v1166_v46 = vpop.f32.mrf.mxu1 }
 0x23e   : > { %v1049_v48 = vmul.f32 %v3408_v26, %v1015_v45  ;;  %v1200_v49 = vmul.f32 %v3430_v43, %v1166_v46 }
 0x23f   : > { %v3898_v50 = vpop.f32.mrf.mxu0  ;;  %v3929_v51 = vpop.f32.mrf.mxu1 }
 0x240   : > { %v1056_v53 = vadd.f32 %v1049_v48, %v5153_v47 }
 0x241   : > { %v1020_v54 = vpop.f32.mrf.mxu0  ;;  %v1171_v55 = vpop.f32.mrf.mxu1 }
 0x242   : > { %v5212_v57 = vadd.f32 %v1200_v49, %v1056_v53  ;;  %v1050_v59 = vmul.f32 %v3409_v36, %v1020_v54  ;;  %v1201_v60 = vmul.f32 %v3431_v52, %v1171_v55 }
 0x243   : > { %v3901_v61 = vpop.f32.mrf.mxu0  ;;  %v3932_v62 = vpop.f32.mrf.mxu1 }
 0x244   : > { %v1057_v1 = vadd.f32 %v1050_v59, %v5161_v56 }
 0x245   : > { %v1025_v5 = vpop.f32.mrf.mxu0  ;;  %v1176_v47 = vpop.f32.mrf.mxu1 }
 0x246   : > { %v5221_v6 = vadd.f32 %v1201_v60, %v1057_v1  ;;  %v1051_v9 = vmul.f32 %v3410_v63, %v1025_v5  ;;  %v1202_v10 = vmul.f32 %v3432_v0, %v1176_v47 }
 0x247   : > { %v3904_v11 = vpop.f32.mrf.mxu0  ;;  %v3935_v12 = vpop.f32.mrf.mxu1 }
 0x248   : > { %v1058_v16 = vadd.f32 %v1051_v9, %v5169_v3 }
 0x249   : > { %v1030_v17 = vpop.f32.mrf.mxu0  ;;  %v1181_v56 = vpop.f32.mrf.mxu1 }
 0x24a   : > { %v5230_v18 = vadd.f32 %v1202_v10, %v1058_v16  ;;  %v1052_v19 = vmul.f32 %v3411_v13, %v1030_v17  ;;  %v1203_v2 = vmul.f32 %v3433_v14, %v1181_v56 }
 0x24b   : > { %v3907_v4 = vpop.f32.mrf.mxu0  ;;  %v3938_v8 = vpop.f32.mrf.mxu1 }
 0x24c   : > { %v1059_v58 = vadd.f32 %v1052_v19, %v5177_v15  ;;  %v3450_v19 = vld [vmem:[%s5845_s2 + $0xa8] sm:$0xff] }
 0x24d   : > { %v1035_v25 = vpop.f32.mrf.mxu0  ;;  %v1186_v3 = vpop.f32.mrf.mxu1 }
 0x24e   : > { %v5239_v27 = vadd.f32 %v1203_v2, %v1059_v58  ;;  %v1053_v28 = vmul.f32 %v3412_v22, %v1035_v25  ;;  %v1204_v29 = vmul.f32 %v3434_v24, %v1186_v3  ;;  %v3451_v24 = vld [vmem:[%s5845_s2 + $0xb0] sm:$0xff]  ;;  %v3465_v25 = vld [vmem:[%s5845_s2 + $0xe0] sm:$0xff] }
 0x24f   : > { %v3910_v30 = vpop.f32.mrf.mxu0  ;;  %v3941_v31 = vpop.f32.mrf.mxu1 }
 0x250   : > { %v1060_v32 = vadd.f32 %v1053_v28, %v5185_v23  ;;  %v3487_v30 = vld [vmem:[%s5845_s2 + $0x118] sm:$0xff] }
 0x251   : > { %v1307_v34 = vpop.f32.mrf.mxu0  ;;  %v1429_v37 = vpop.f32.mrf.mxu1 }
 0x252   : > { %v5242_v38 = vadd.f32 %v1204_v29, %v1060_v32  ;;  %v1349_v22 = vmul.f32 %v3450_v19, %v1307_v34  ;;  %v1471_v34 = vmul.f32 %v3465_v25, %v1429_v37 }
 0x253   : > { %v3954_v39 = vpop.f32.mrf.mxu0  ;;  %v3985_v40 = vpop.f32.mrf.mxu1 }
 0x254   : > { %v1356_v32 = vadd.f32 %v1349_v22, %v5194_v33  ;;  %v3466_v39 = vld [vmem:[%s5845_s2 + $0xe8] sm:$0xff]  ;;  %v3468_v22 = vld [vmem:[%s5845_s2 + $0xf8] sm:$0xff] }
 0x257   : > { %v1312_v41 = vpop.f32.mrf.mxu0  ;;  %v1434_v42 = vpop.f32.mrf.mxu1 }
 0x258   : > { %v1350_v29 = vmul.f32 %v3451_v24, %v1312_v41  ;;  %v1472_v37 = vmul.f32 %v3466_v39, %v1434_v42 }
 0x259   : > { %v3957_v26 = vpop.f32.mrf.mxu0  ;;  %v3988_v15 = vpop.f32.mrf.mxu1 }
 0x25a   : > { %v3452_v26 = vld [vmem:[%s5845_s2 + $0xb8] sm:$0xff]  ;;  %v1357_v33 = vadd.f32 %v1350_v29, %v5203_v44 }
 0x25d   : > { %v1317_v43 = vpop.f32.mrf.mxu0  ;;  %v5244_v45 = vpop.f32.mrf.mxu1 }
 0x25f   : > { %v3960_v46 = vpop.f32.mrf.mxu0  ;;  %v3991_v48 = vpop.f32.mrf.mxu1 }
 0x260   : > { %v3488_v46 = vld [vmem:[%s5845_s2 + $0x120] sm:$0xff] }
 0x261   : > { %v5246_v49 = vpop.f32.mrf.mxu0  ;;  %v5248_v50 = vpop.f32.mrf.mxu1 }
 0x263   : > { %v3963_v23 = vpop.f32.mrf.mxu0  ;;  %v3994_v51 = vpop.f32.mrf.mxu1 }
 0x264   : > { %v3509_v23 = vld [vmem:[%s5845_s2 + $0x150] sm:$0xff] }
 0x265   : > { %v5250_v36 = vpop.f32.mrf.mxu0  ;;  %v5252_v52 = vpop.f32.mrf.mxu1 }
 0x267   : > { %v3966_v53 = vpop.f32.mrf.mxu0  ;;  %v3997_v54 = vpop.f32.mrf.mxu1 }
 0x268   : > { %v1478_v53 = vadd.f32 %v1471_v34, %v1356_v32  ;;  %v1351_v54 = vmul.f32 %v3452_v26, %v1317_v43  ;;  %v3511_v32 = vld [vmem:[%s5845_s2 + $0x160] sm:$0xff]  ;;  %v3490_v34 = vld [vmem:[%s5845_s2 + $0x130] sm:$0xff] }
 0x269   : > { %v5254_v55 = vpop.f32.mrf.mxu0  ;;  %v5256_v59 = vpop.f32.mrf.mxu1 }
 0x26b   : > { %v3969_v60 = vpop.f32.mrf.mxu0  ;;  %v4000_v61 = vpop.f32.mrf.mxu1 }
 0x26c   : > { %v3467_v61 = vld [vmem:[%s5845_s2 + $0xf0] sm:$0xff] }
 0x26d   : > { %v5258_v62 = vpop.f32.mrf.mxu0  ;;  %v5260_v63 = vpop.f32.mrf.mxu1  ;;  %v1473_v19 = vmul.f32 %v3467_v61, %v5244_v45  ;;  %v3553_v45 = vld [vmem:[%s5845_s2 + $0x1c0] sm:$0xff] }
 0x26f   : > { %v3972_v0 = vpop.f32.mrf.mxu0  ;;  %v4003_v1 = vpop.f32.mrf.mxu1 }
 0x270   : > { %v3453_v0 = vld [vmem:[%s5845_s2 + $0xc0] sm:$0xff] }
 0x271   : > { %v1580_v5 = vpop.f32.mrf.mxu0  ;;  %v1731_v47 = vpop.f32.mrf.mxu1 }
 0x272   : > { %v1622_v41 = vmul.f32 %v3487_v30, %v1580_v5  ;;  %v1773_v5 = vmul.f32 %v3509_v23, %v1731_v47  ;;  %v1352_v47 = vmul.f32 %v3453_v0, %v5246_v49 }
 0x273   : > { %v4016_v9 = vpop.f32.mrf.mxu0  ;;  %v4047_v10 = vpop.f32.mrf.mxu1 }
 0x274   : > { %v1629_v42 = vadd.f32 %v1622_v41, %v1478_v53  ;;  %v3510_v9 = vld [vmem:[%s5845_s2 + $0x158] sm:$0xff]  ;;  %v1479_v10 = vadd.f32 %v1472_v37, %v1357_v33  ;;  %v1359_v26 = vadd.f32 %v1352_v47, %v5221_v6  ;;  %v1474_v41 = vmul.f32 %v3468_v22, %v5248_v50  ;;  %v3455_v33 = vld [vmem:[%s5845_s2 + $0xd0] sm:$0xff] }
 0x275   : > { %v3491_v50 = vld [vmem:[%s5845_s2 + $0x138] sm:$0xff] }
 0x276   : > { %v1585_v11 = vpop.f32.mrf.mxu0  ;;  %v1780_v29 = vadd.f32 %v1773_v5, %v1629_v42 }
 0x277   : > { %v1623_v1 = vmul.f32 %v3488_v46, %v1585_v11  ;;  %v1358_v11 = vadd.f32 %v1351_v54, %v5212_v57 }
 0x278   : > { %v4019_v12 = vpop.f32.mrf.mxu0 }
 0x279   : > { %v1736_v13 = vpop.f32.mrf.mxu1  ;;  %v3489_v12 = vld [vmem:[%s5845_s2 + $0x128] sm:$0xff]  ;;  %v1630_v24 = vadd.f32 %v1623_v1, %v1479_v10  ;;  %v1480_v39 = vadd.f32 %v1473_v19, %v1358_v11  ;;  %v1481_v10 = vadd.f32 %v1474_v41, %v1359_v26 }
 0x27a   : > { %v1774_v25 = vmul.f32 %v3510_v9, %v1736_v13  ;;  %v3554_v1 = vld [vmem:[%s5845_s2 + $0x1c8] sm:$0xff] }
 0x27b   : > { %v4050_v14 = vpop.f32.mrf.mxu1 }
 0x27c   : > { %v1590_v16 = vpop.f32.mrf.mxu0  ;;  %v1781_v37 = vadd.f32 %v1774_v25, %v1630_v24  ;;  %v3513_v25 = vld [vmem:[%s5845_s2 + $0x170] sm:$0xff] }
 0x27d   : > { %v1624_v30 = vmul.f32 %v3489_v12, %v1590_v16  ;;  %v3532_v16 = vld [vmem:[%s5845_s2 + $0x190] sm:$0xff]  ;;  %v1354_v12 = vmul.f32 %v3455_v33, %v5254_v55 }
 0x27e   : > { %v4022_v17 = vpop.f32.mrf.mxu0 }
 0x27f   : > { %v5262_v56 = vpop.f32.mrf.mxu1  ;;  %v3531_v17 = vld [vmem:[%s5845_s2 + $0x188] sm:$0xff]  ;;  %v1631_v53 = vadd.f32 %v1624_v30, %v1480_v39  ;;  %v3471_v39 = vld [vmem:[%s5845_s2 + $0x110] sm:$0x1f] }
 0x280   : > { %v5267_v2 = vpop.f32.mrf.mxu0  ;;  %v1775_v54 = vmul.f32 %v3511_v32, %v5262_v56  ;;  %v3512_v56 = vld [vmem:[%s5845_s2 + $0x168] sm:$0xff] }
 0x281   : > { %v4053_v4 = vpop.f32.mrf.mxu1  ;;  %v1625_v6 = vmul.f32 %v3490_v34, %v5267_v2 }
 0x282   : > { %v4025_v8 = vpop.f32.mrf.mxu0  ;;  %v3454_v4 = vld [vmem:[%s5845_s2 + $0xc8] sm:$0xff]  ;;  %v1782_v22 = vadd.f32 %v1775_v54, %v1631_v53 }
 0x283   : > { %v5272_v58 = vpop.f32.mrf.mxu1  ;;  %v1353_v49 = vmul.f32 %v3454_v4, %v5250_v36  ;;  %v3469_v36 = vld [vmem:[%s5845_s2 + $0x100] sm:$0xff]  ;;  %v1632_v24 = vadd.f32 %v1625_v6, %v1481_v10 }
 0x284   : > { %v5277_v3 = vpop.f32.mrf.mxu0  ;;  %v1475_v5 = vmul.f32 %v3469_v36, %v5252_v52  ;;  %v3456_v52 = vld [vmem:[%s5845_s2 + $0xd8] sm:$0x1f]  ;;  %v1776_v55 = vmul.f32 %v3512_v56, %v5272_v58  ;;  %v3534_v58 = vld [vmem:[%s5845_s2 + $0x1a0] sm:$0xff] }
 0x285   : > { %v4056_v28 = vpop.f32.mrf.mxu1  ;;  %v1360_v42 = vadd.f32 %v1353_v49, %v5230_v18  ;;  %v3470_v18 = vld [vmem:[%s5845_s2 + $0x108] sm:$0xff]  ;;  %v1626_v11 = vmul.f32 %v3491_v50, %v5277_v3  ;;  %v3555_v3 = vld [vmem:[%s5845_s2 + $0x1d0] sm:$0xff]  ;;  %v1361_v49 = vadd.f32 %v1354_v12, %v5239_v27  ;;  %v1355_v34 = vmul.f32 %v3456_v52, %v5258_v62 }
 0x286   : > { %v4028_v31 = vpop.f32.mrf.mxu0  ;;  %v1476_v32 = vmul.f32 %v3470_v18, %v5256_v59  ;;  %v1783_v33 = vadd.f32 %v1776_v55, %v1632_v24  ;;  %v1477_v50 = vmul.f32 %v3471_v39, %v5260_v63  ;;  %v3515_v63 = vld [vmem:[%s5845_s2 + $0x180] sm:$0x1f]  ;;  %v3559_v39 = vld [vmem:[%s5845_s2 + $0x1f0] sm:$0x1f] }
 0x287   : > { %v5286_v40 = vpop.f32.mrf.mxu1  ;;  %v1482_v30 = vadd.f32 %v1475_v5, %v1360_v42  ;;  %v1362_v6 = vadd.f32 %v1355_v34, %v5242_v38  ;;  %v3557_v38 = vld [vmem:[%s5845_s2 + $0x1e0] sm:$0xff] }
 0x288   : > { %v5291_v15 = vpop.f32.mrf.mxu0  ;;  %v1777_v41 = vmul.f32 %v3513_v25, %v5286_v40  ;;  %v3493_v40 = vld [vmem:[%s5845_s2 + $0x148] sm:$0x1f]  ;;  %v1483_v54 = vadd.f32 %v1476_v32, %v1361_v49 }
 0x289   : > { %v4059_v48 = vpop.f32.mrf.mxu1  ;;  %v1633_v26 = vadd.f32 %v1626_v11, %v1482_v30  ;;  %v1484_v52 = vadd.f32 %v1477_v50, %v1362_v6 }
 0x28a   : > { %v4031_v51 = vpop.f32.mrf.mxu0 }
 0x28b   : > { %v5300_v60 = vpop.f32.mrf.mxu1 }
 0x28c   : > { %v5308_v44 = vpop.f32.mrf.mxu0 }
 0x28d   : > { %v4062_v43 = vpop.f32.mrf.mxu1  ;;  %v1628_v10 = vmul.f32 %v3493_v40, %v5308_v44 }
 0x28e   : > { %v4034_v14 = vpop.f32.mrf.mxu0  ;;  %v3533_v43 = vld [vmem:[%s5845_s2 + $0x198] sm:$0xff] }
 0x28f   : > { %v5325_v8 = vpop.f32.mrf.mxu1  ;;  %v1635_v24 = vadd.f32 %v1628_v10, %v1484_v52 }
 0x290   : > { %v1882_v28 = vpop.f32.mrf.mxu0  ;;  %v1779_v55 = vmul.f32 %v3515_v63, %v5325_v8 }
 0x291   : > { %v4065_v57 = vpop.f32.mrf.mxu1  ;;  %v1924_v31 = vmul.f32 %v3531_v17, %v1882_v28 }
 0x292   : > { %v4078_v13 = vpop.f32.mrf.mxu0  ;;  %v3492_v57 = vld [vmem:[%s5845_s2 + $0x140] sm:$0xff]  ;;  %v1786_v34 = vadd.f32 %v1779_v55, %v1635_v24 }
 0x293   : > { %v1931_v46 = vadd.f32 %v1924_v31, %v1780_v29  ;;  %v2033_v48 = vpop.f32.mrf.mxu1  ;;  %v1627_v27 = vmul.f32 %v3492_v57, %v5291_v15  ;;  %v3535_v15 = vld [vmem:[%s5845_s2 + $0x1a8] sm:$0xff]  ;;  %v3537_v57 = vld [vmem:[%s5845_s2 + $0x1b8] sm:$0x1f] }
 0x294   : > { %v2075_v23 = vmul.f32 %v3553_v45, %v2033_v48  ;;  %v1887_v51 = vpop.f32.mrf.mxu0 }
 0x295   : > { %v4109_v61 = vpop.f32.mrf.mxu1  ;;  %v1925_v0 = vmul.f32 %v3532_v16, %v1887_v51 }
 0x296   : > { %v4081_v9 = vpop.f32.mrf.mxu0  ;;  %v5364_v2 = vadd.f32 %v2075_v23, %v1931_v46  ;;  %v3514_v23 = vld [vmem:[%s5845_s2 + $0x178] sm:$0xff] }
 0x297   : > { %v1932_v14 = vadd.f32 %v1925_v0, %v1781_v37  ;;  %v2038_v17 = vpop.f32.mrf.mxu1  ;;  %v3556_v37 = vld [vmem:[%s5845_s2 + $0x1d8] sm:$0xff]  ;;  %v1634_v9 = vadd.f32 %v1627_v27, %v1483_v54 }
 0x298   : > { %v2076_v19 = vmul.f32 %v3554_v1, %v2038_v17  ;;  %v2091_v47 = vsel %vm530_vm1, %v5364_v2, 0.0  ;;  %v1892_v4 = vpop.f32.mrf.mxu0  ;;  %v1784_v1 = vadd.f32 %v1777_v41, %v1633_v26 }
 0x299   : > { %v4112_v28 = vpop.f32.mrf.mxu1  ;;  %2092 = vadd.xlane.f32.xlu0 %v2091_v47  ;;  %v1926_v29 = vmul.f32 %v3533_v43, %v1892_v4  ;;  %v1778_v43 = vmul.f32 %v3514_v23, %v5300_v60  ;;  %v3536_v60 = vld [vmem:[%s5845_s2 + $0x1b0] sm:$0xff] }
 0x29a   : > { %v4084_v31 = vpop.f32.mrf.mxu0  ;;  %v5389_v45 = vadd.f32 %v2076_v19, %v1932_v14 }
 0x29b   : > { %v1933_v13 = vadd.f32 %v1926_v29, %v1782_v22  ;;  %v2043_v16 = vpop.f32.mrf.mxu1  ;;  %v1785_v22 = vadd.f32 %v1778_v43, %v1634_v9  ;;  %v3558_v29 = vld [vmem:[%s5845_s2 + $0x1e8] sm:$0xff] }
 0x29c   : > { %v2077_v36 = vmul.f32 %v3555_v3, %v2043_v16  ;;  %v2094_v46 = vsel %vm530_vm1, %v5389_v45, 0.0  ;;  %v1897_v48 = vpop.f32.mrf.mxu0 }
 0x29d   : > { %v4115_v59 = vpop.f32.mrf.mxu1  ;;  %2095 = vadd.xlane.f32.xlu1 %v2094_v46  ;;  %v1927_v62 = vmul.f32 %v3534_v58, %v1897_v48 }
 0x29e   : > { %v4087_v51 = vpop.f32.mrf.mxu0  ;;  %v5413_v53 = vadd.f32 %v2077_v36, %v1933_v13 }
 0x29f   : > { %v1934_v61 = vadd.f32 %v1927_v62, %v1783_v33  ;;  %v2048_v0 = vpop.f32.mrf.mxu1  ;;  %v5455_v62 = vld [vmem:[%s5852_s9] ss:$0 sm:$0xff] }
 0x2a0   : > { %v2078_v42 = vmul.f32 %v3556_v37, %v2048_v0  ;;  %v2097_v5 = vsel %vm530_vm1, %v5413_v53, 0.0  ;;  %v1902_v56 = vpop.f32.mrf.mxu0 }
 0x2a1   : > { %v4118_v12 = vpop.f32.mrf.mxu1  ;;  %2098 = vadd.xlane.f32.xlu0 %v2097_v5  ;;  %v1928_v14 = vmul.f32 %v3535_v15, %v1902_v56 }
 0x2a2   : > { %v4090_v17 = vpop.f32.mrf.mxu0  ;;  %v5430_v18 = vadd.f32 %v2078_v42, %v1934_v61 }
 0x2a3   : > { %v1935_v44 = vadd.f32 %v1928_v14, %v1784_v1  ;;  %v2053_v11 = vpop.f32.mrf.mxu1 }
 0x2a4   : > { %v2079_v19 = vmul.f32 %v3557_v38, %v2053_v11  ;;  %v2100_v47 = vsel %vm530_vm1, %v5430_v18, 0.0  ;;  %v1907_v4 = vpop.f32.mrf.mxu0 }
 0x2a5   : > { %v4121_v25 = vpop.f32.mrf.mxu1  ;;  %2101 = vadd.xlane.f32.xlu1 %v2100_v47  ;;  %v1929_v28 = vmul.f32 %v3536_v60, %v1907_v4 }
 0x2a6   : > { %v4093_v3 = vpop.f32.mrf.mxu0  ;;  %v5441_v30 = vadd.f32 %v2079_v19, %v1935_v44 }
 0x2a7   : > { %v1936_v31 = vadd.f32 %v1929_v28, %v1785_v22  ;;  %v2058_v58 = vpop.f32.mrf.mxu1 }
 0x2a8   : > { %v2080_v49 = vmul.f32 %v3558_v29, %v2058_v58  ;;  %v2103_v8 = vsel %vm530_vm1, %v5441_v30, 0.0  ;;  %v1912_v32 = vpop.f32.mrf.mxu0 }
 0x2a9   : > { %v4124_v13 = vpop.f32.mrf.mxu1  ;;  %2104 = vadd.xlane.f32.xlu0 %v2103_v8  ;;  %v1930_v16 = vmul.f32 %v3537_v57, %v1912_v32 }
 0x2aa   : > { %v4096_v26 = vpop.f32.mrf.mxu0  ;;  %v2087_v41 = vadd.f32 %v2080_v49, %v1936_v31 }
 0x2ab   : > { %v1937_v36 = vadd.f32 %v1930_v16, %v1786_v34  ;;  %v2063_v46 = vpop.f32.mrf.mxu1 }
 0x2ac   : > { %v2081_v48 = vmul.f32 %v3559_v39, %v2063_v46  ;;  %v2106_v33 = vsel %vm530_vm1, %v2087_v41, 0.0  ;;  %v2280_v27 = vpop.f32.mrf.mxu0 }
 0x2ad   : > { %v4127_v59 = vpop.f32.mrf.mxu1  ;;  %2107 = vadd.xlane.f32.xlu1 %v2106_v33  ;;  %v5459_v15 = vadd.f32 %v5455_v62, %v2280_v27  ;;  %v2302_v27 = vld [vmem:[%s5853_s10] sm:$0xff] }
 0x2ae   : > { %v4134_v37 = vpop.f32.mrf.mxu0  ;;  %v2088_v23 = vadd.f32 %v2081_v48, %v1937_v36  ;;  %v2305_v48 = vld [vmem:[%s5853_s10 + $0x18] sm:$0xff]  ;;  %v2303_v59 = vld [vmem:[%s5853_s10 + $0x8] sm:$0xff] }
 0x2af   : > { %v2310_v37 = vpack.c.bf16 %v2303_v59, %v2302_v27 }
 0x2b0   : > { %v2110_v40 = vsel %vm2109_vm5, %v2088_v23, 0.0  ;;  %v2283_v51 = vpop.f32.mrf.mxu0 }
 0x2b1   : > { %2111 = vadd.xlane.f32.xlu0 %v2110_v40  ;;  %v5462_v54 = vadd.f32 %v5455_v62, %v2283_v51  ;;  %v2398_v40 = vld [vmem:[%s5855_s12 + $0x18] sm:$0xff] }
 0x2b2   : > { %v4135_v6 = vpop.f32.mrf.mxu0 }
 0x2b3   : > { %v2472_v50 = vpack.c.bf16 %v5462_v54, %v5459_v15 }
 0x2b4   : > { %v2288_v61 = vpop.f32.mrf.mxu0 }
 0x2b5   : > { %v5467_v42 = vadd.f32 %v5455_v62, %v2288_v61 }
 0x2b6   : > { %v4138_v0 = vpop.f32.mrf.mxu0 }
 0x2b8   : > { %v2291_v1 = vpop.f32.mrf.mxu0 }
 0x2b9   : > { %v5470_v5 = vadd.f32 %v5455_v62, %v2291_v1 }
 0x2ba   : > { %v4139_v56 = vpop.f32.mrf.mxu0 }
 0x2bb   : > { %v2473_v9 = vpack.c.bf16 %v5470_v5, %v5467_v42 }
 0x2bc   : > { %v5474_v43 = vpop.f32.mrf.mxu0 }
 0x2be   : > { %v4142_v10 = vpop.f32.mrf.mxu0 }
 0x2c0   : > { %v2299_v12 = vpop.f32.mrf.mxu0 }
 0x2c2   : > { %v4143_v14 = vpop.f32.mrf.mxu0 }
 0x322   : > { %v2093_v38 = vpop.xlane.xlu0 %2092 }
 0x323   : > { %v2113_v63 = vmul.f32 0.03125, %v2093_v38 }
 0x325   : > { %v5477_v17 = vsub.f32 %v5364_v2, %v2113_v63 }
 0x326   : > { %v2096_v60 = vpop.xlane.xlu1 %2095 }
 0x327   : > { %v2114_v52 = vmul.f32 0.03125, %v2096_v60  ;;  %v2127_v44 = vmul.f32 %v5477_v17, %v5477_v17 }
 0x329   : > { %v5482_v11 = vsub.f32 %v5389_v45, %v2114_v52  ;;  %v2134_v19 = vsel %vm530_vm1, %v2127_v44, 0.0 }
 0x32a   : > { %v2099_v47 = vpop.xlane.xlu0 %2098  ;;  %2135 = vadd.xlane.f32.xlu1 %v2134_v19 }
 0x32b   : > { %v2115_v4 = vmul.f32 0.03125, %v2099_v47  ;;  %v2128_v22 = vmul.f32 %v5482_v11, %v5482_v11 }
 0x32d   : > { %v5488_v24 = vsub.f32 %v5413_v53, %v2115_v4  ;;  %v2137_v2 = vsel %vm530_vm1, %v2128_v22, 0.0 }
 0x32e   : > { %v2102_v55 = vpop.xlane.xlu1 %2101  ;;  %2138 = vadd.xlane.f32.xlu0 %v2137_v2  ;;  %v3560_v2 = vld [vmem:[%s5849_s6] ss:$0 sm:$0xff] }
 0x32f   : > { %v2116_v25 = vmul.f32 0.03125, %v2102_v55  ;;  %v2129_v45 = vmul.f32 %v5488_v24, %v5488_v24 }
 0x331   : > { %v5494_v28 = vsub.f32 %v5430_v18, %v2116_v25  ;;  %v2140_v29 = vsel %vm530_vm1, %v2129_v45, 0.0 }
 0x332   : > { %v2105_v3 = vpop.xlane.xlu0 %2104  ;;  %2141 = vadd.xlane.f32.xlu1 %v2140_v29 }
 0x333   : > { %v2117_v57 = vmul.f32 0.03125, %v2105_v3  ;;  %v2130_v53 = vmul.f32 %v5494_v28, %v5494_v28 }
 0x335   : > { %v5500_v31 = vsub.f32 %v5441_v30, %v2117_v57  ;;  %v2143_v58 = vsel %vm530_vm1, %v2130_v53, 0.0 }
 0x336   : > { %v2108_v49 = vpop.xlane.xlu1 %2107  ;;  %2144 = vadd.xlane.f32.xlu0 %v2143_v58  ;;  %v3561_v58 = vld [vmem:[%s5850_s7] ss:$0 sm:$0xff] }
 0x337   : > { %v2118_v8 = vmul.f32 0.03125, %v2108_v49  ;;  %v2131_v18 = vmul.f32 %v5500_v31, %v5500_v31 }
 0x339   : > { %v5505_v32 = vsub.f32 %v2087_v41, %v2118_v8  ;;  %v2146_v34 = vsel %vm530_vm1, %v2131_v18, 0.0  ;;  %v2304_v41 = vld [vmem:[%s5853_s10 + $0x10] sm:$0xff] }
 0x33a   : > { %2147 = vadd.xlane.f32.xlu1 %v2146_v34  ;;  %v2112_v13 = vpop.xlane.xlu0 %2111  ;;  %v2311_v33 = vpack.c.bf16 %v2305_v48, %v2304_v41  ;;  %v2395_v48 = vld [vmem:[%s5855_s12] sm:$0xff] }
 0x33b   : > { %v2119_v16 = vmul.f32 0.03125, %v2112_v13  ;;  %v2132_v39 = vmul.f32 %v5505_v32, %v5505_v32 }
 0x33c   : > { %4144 = vmatprep.subr.bf16.mxu1 %v2311_v33 }
 0x33d   : > { %v5510_v30 = vsub.f32 %v2088_v23, %v2119_v16  ;;  %v2149_v26 = vsel %vm530_vm1, %v2132_v39, 0.0  ;;  %4145 = vmatpush3.bf16.msra.mxu1 %v2311_v33  ;;  %v2397_v23 = vld [vmem:[%s5855_s12 + $0x10] sm:$0xff] }
 0x33e   : > { %2150 = vadd.xlane.f32.xlu0 %v2149_v26  ;;  %4146 = vmatprep.subr.bf16.mxu1 %v2310_v37  ;;  %v2400_v51 = vpack.c.bf16 %v2398_v40, %v2397_v23 }
 0x33f   : > { %v2133_v36 = vmul.f32 %v5510_v30, %v5510_v30 }
 0x341   : > { %v2152_v46 = vsel %vm2109_vm5, %v2133_v36, 0.0  ;;  %4147 = vmatpush3.bf16.msra.mxu1 %v2310_v37 }
 0x342   : > { %2153 = vadd.xlane.f32.xlu1 %v2152_v46  ;;  %4156 = vmatprep.subr.bf16.mxu1 %v2400_v51 }
 0x3b3   : > { %v2136_v6 = vpop.xlane.xlu1 %2135 }
 0x3b4   : > { %v2155_v61 = vmul.f32 0.03125, %v2136_v6 }
 0x3b6   : > { %v2162_v0 = vadd.f32 1e-05, %v2155_v61 }
 0x3b7   : > { %v2139_v1 = vpop.xlane.xlu0 %2138 }
 0x3b8   : > { %4338 = vrsqrt.f32 %v2162_v0  ;;  %v2156_v56 = vmul.f32 0.03125, %v2139_v1 }
 0x3ba   : > { %v2163_v10 = vadd.f32 1e-05, %v2156_v56 }
 0x3bb   : > { %v2142_v12 = vpop.xlane.xlu1 %2141 }
 0x3bc   : > { %4340 = vrsqrt.f32 %v2163_v10  ;;  %v2157_v14 = vmul.f32 0.03125, %v2142_v12 }
 0x3be   : > { %v2164_v38 = vadd.f32 1e-05, %v2157_v14 }
 0x3bf   : > { %v2145_v63 = vpop.xlane.xlu0 %2144 }
 0x3c0   : > { %4342 = vrsqrt.f32 %v2164_v38  ;;  %v2158_v60 = vmul.f32 0.03125, %v2145_v63 }
 0x3c2   : > { %v2165_v52 = vadd.f32 1e-05, %v2158_v60  ;;  %v3567_v60 = vld [vmem:[%s5854_s11] ss:$0 sm:$0xff] }
 0x3c3   : > { %v2148_v44 = vpop.xlane.xlu1 %2147 }
 0x3c4   : > { %4344 = vrsqrt.f32 %v2165_v52  ;;  %v2159_v19 = vmul.f32 0.03125, %v2148_v44 }
 0x3c5   : > { %v4339_v47 = vpop.eup %4338 }
 0x3c6   : > { %v2166_v4 = vadd.f32 1e-05, %v2159_v19  ;;  %v2176_v22 = vmul.f32 %v4339_v47, %v5477_v17 }
 0x3c7   : > { %v2151_v55 = vpop.xlane.xlu0 %2150 }
 0x3c8   : > { %4346 = vrsqrt.f32 %v2166_v4  ;;  %v2160_v25 = vmul.f32 0.03125, %v2151_v55  ;;  %v2189_v57 = vmul.f32 %v3560_v2, %v2176_v22 }
 0x3c9   : > { %v4341_v45 = vpop.eup %4340 }
 0x3ca   : > { %v2167_v29 = vadd.f32 1e-05, %v2160_v25  ;;  %v2177_v3 = vmul.f32 %v4341_v45, %v5482_v11  ;;  %v2202_v13 = vadd.f32 %v3561_v58, %v2189_v57 }
 0x3cb   : > { %v2154_v53 = vpop.xlane.xlu1 %2153 }
 0x3cc   : > { %4348 = vrsqrt.f32 %v2167_v29  ;;  %v2161_v49 = vmul.f32 0.03125, %v2154_v53  ;;  %v2190_v17 = vmul.f32 %v3560_v2, %v2177_v3 }
 0x3cd   : > { %v4343_v8 = vpop.eup %4342 }
 0x3ce   : > { %v2178_v18 = vmul.f32 %v4343_v8, %v5488_v24  ;;  %v2168_v34 = vadd.f32 1e-05, %v2161_v49  ;;  %v2203_v16 = vadd.f32 %v3561_v58, %v2190_v17  ;;  %v2396_v24 = vld [vmem:[%s5855_s12 + $0x8] sm:$0xff]  ;;  %v4407_v8 = vmov 65535  }
 0x3d0   : > { %4350 = vrsqrt.f32 %v2168_v34  ;;  %v5543_v39 = vpack.c.bf16 %v2203_v16, %v2202_v13  ;;  %v2191_v11 = vmul.f32 %v3560_v2, %v2178_v18  ;;  %v2637_v18 = vsel %vm2635_vm7, 4294967295, %v4407_v8  ;;  %v3572_v34 = vld [vmem:[%s5856_s13] ss:$0 sm:$0xff] }
 0x3d1   : > { %v4345_v26 = vpop.eup %4344 }
 0x3d2   : > { %v2179_v36 = vmul.f32 %v4345_v26, %v5494_v28  ;;  %4148 = vmatprep.mubr.msk.bf16.mxu1 %vm530_vm1, %v5543_v39  ;;  %v2204_v33 = vadd.f32 %v3561_v58, %v2191_v11  ;;  %v2399_v28 = vpack.c.bf16 %v2396_v24, %v2395_v48  ;;  %v5590_v11 = vsel %vm2636_vm8, %v2637_v18, 0 }
 0x3d4   : > { %v2192_v46 = vmul.f32 %v3560_v2, %v2179_v36 }
 0x3d5   : > { %v4347_v41 = vpop.eup %4346 }
 0x3d6   : > { %v2205_v27 = vadd.f32 %v3561_v58, %v2192_v46  ;;  %v2180_v59 = vmul.f32 %v4347_v41, %v5500_v31 }
 0x3d8   : > { %v5555_v37 = vpack.c.bf16 %v2205_v27, %v2204_v33  ;;  %v2193_v6 = vmul.f32 %v3560_v2, %v2180_v59 }
 0x3d9   : > { %v4349_v23 = vpop.eup %4348 }
 0x3da   : > { %4149 = vmatmul.mubr.msk.bf16.vlgmr.msra.gmra.mxu1 %vm530_vm1, %v5555_v37  ;;  %v2181_v40 = vmul.f32 %v4349_v23, %v5505_v32  ;;  %v2206_v1 = vadd.f32 %v3561_v58, %v2193_v6 }
 0x3db   : > { %4157 = vmatpush3.bf16.msra.mxu1 %v2400_v51 }
 0x3dc   : > { %v2194_v61 = vmul.f32 %v3560_v2, %v2181_v40  ;;  %4158 = vmatprep.subr.bf16.mxu1 %v2399_v28 }
 0x3dd   : > { %v4351_v0 = vpop.eup %4350 }
 0x3de   : > { %v2207_v56 = vadd.f32 %v3561_v58, %v2194_v61  ;;  %v2182_v10 = vmul.f32 %v4351_v0, %v5510_v30 }
 0x3df   : > { %4159 = vmatpush3.bf16.msra.mxu1 %v2399_v28 }
 0x3e0   : > { %v5561_v31 = vpack.c.bf16 %v2207_v56, %v2206_v1  ;;  %v2195_v12 = vmul.f32 %v3560_v2, %v2182_v10  ;;  %4188 = vmatprep.subr.bf16.mxu1 %v4405_v35 }
 0x3e2   : > { %4152 = vmatprep.mubr.msk.bf16.mxu1 %vm530_vm1, %v5561_v31  ;;  %v2208_v14 = vadd.f32 %v3561_v58, %v2195_v12 }
 0x3e4   : > { %v5566_v32 = vpack.c.bf16 %v2208_v14, %v2208_v14 }
 0x3e6   : > { %4153 = vmatmul.mubr.msk.bf16.gmra.mxu1 %vm530_vm1, %v5566_v32 }
 0x3e7   : > { %4160 = vmatprep.mubr.msk.bf16.mxu1 %vm530_vm1, %v5543_v39 }
 0x3ee   : > { %4161 = vmatmul.mubr.msk.bf16.vlgmr.msra.gmra.mxu1 %vm530_vm1, %v5555_v37 }
 0x3ef   : > { %4164 = vmatprep.mubr.msk.bf16.mxu1 %vm530_vm1, %v5561_v31 }
 0x3f6   : > { %4165 = vmatmul.mubr.msk.bf16.gmra.mxu1 %vm530_vm1, %v5566_v32 }
 0x3f7   : > { %4196 = vmatprep.mubr.msk.bf16.mxu1 %vm4406_vm2, %v4405_v35 }
 0x49a   : > { %v4150_v30 = vpop.f32.mrf.mxu1 }
 0x49b   : > { %v2374_v17 = vadd.f32 %v4150_v30, %v3567_v60  ;;  %v2297_v30 = vadd.f32 %v5455_v62, %v5474_v43 }
 0x49c   : > { %v2365_v51 = vpop.f32.mrf.mxu1 }
 0x49d   : > { %v2366_v59 = vadd.f32 %v3567_v60, %v2365_v51  ;;  %v2474_v51 = vpack.c.bf16 %v2297_v30, %v2297_v30 }
 0x49e   : > { %v4151_v38 = vpop.f32.mrf.mxu1 }
 0x49f   : > { %v2377_v53 = vadd.f32 %v4151_v38, %v3567_v60 }
 0x4a0   : > { %v2368_v63 = vpop.f32.mrf.mxu1 }
 0x4a1   : > { %v2476_v16 = vpack.c.bf16 %v2377_v53, %v2374_v17  ;;  %v2369_v48 = vadd.f32 %v3567_v60, %v2368_v63 }
 0x4a3   : > { %v2493_v33 = vsel %vm2479_vm6, %v2476_v16, 0  ;;  %v2475_v40 = vpack.c.bf16 %v2369_v48, %v2366_v59 }
 0x4a5   : > { %v2490_v10 = vsel %vm2479_vm6, %v2475_v40, 0 }
 0x4a6   : > { %v4154_v52 = vpop.f32.mrf.mxu1 }
 0x4a7   : > { %v2390_v44 = vadd.f32 %v4154_v52, %v3567_v60 }
 0x4a8   : > { %v2381_v19 = vpop.f32.mrf.mxu1 }
 0x4a9   : > { %v2478_v47 = vpack.c.bf16 %v2390_v44, %v2390_v44  ;;  %v2382_v55 = vadd.f32 %v3567_v60, %v2381_v19 }
 0x4aa   : > { %v4155_v4 = vpop.f32.mrf.mxu1 }
 0x4ab   : > { %v2499_v22 = vsel %vm2479_vm6, %v2478_v47, 0 }
 0x4ac   : > { %v2384_v2 = vpop.f32.mrf.mxu1  ;;  %4169 = vmatpush3.bf16.xpose.msra.mxu0 %v2499_v22 }
 0x4ad   : > { %v2385_v25 = vadd.f32 %v3567_v60, %v2384_v2  ;;  %4170 = vmatprep.subr.bf16.mxu0 %v4405_v35 }
 0x4ae   : > { %v4162_v45 = vpop.f32.mrf.mxu1 }
 0x4af   : > { %v2477_v29 = vpack.c.bf16 %v2385_v25, %v2382_v55  ;;  %v2451_v0 = vadd.f32 %v4162_v45, %v3572_v34 }
 0x4b0   : > { %v2442_v3 = vpop.f32.mrf.mxu1 }
 0x4b1   : > { %v2496_v58 = vsel %vm2479_vm6, %v2477_v29, 0  ;;  %v2443_v12 = vadd.f32 %v3572_v34, %v2442_v3 }
 0x4b2   : > { %v4163_v57 = vpop.f32.mrf.mxu1 }
 0x4b3   : > { %v2454_v6 = vadd.f32 %v4163_v57, %v3572_v34 }
 0x4b4   : > { %v2445_v49 = vpop.f32.mrf.mxu1  ;;  %4171 = vmatpush3.bf16.xpose.msra.mxu0 %v2496_v58 }
 0x4b5   : > { %4172 = vmatprep.subr.bf16.mxu0 %v4405_v35  ;;  %v2623_v1 = vpack.c.bf16 %v2454_v6, %v2451_v0  ;;  %v2446_v56 = vadd.f32 %v3572_v34, %v2445_v49  ;;  %v2698_v0 = vld [vmem:[%s5857_s14] sm:$0xff] }
 0x4b6   : > { %v4166_v13 = vpop.f32.mrf.mxu1 }
 0x4b7   : > { %v2467_v26 = vadd.f32 %v4166_v13, %v3572_v34  ;;  %v2622_v14 = vpack.c.bf16 %v2446_v56, %v2443_v12 }
 0x4b8   : > { %v2458_v36 = vpop.f32.mrf.mxu1 }
 0x4b9   : > { %v2625_v46 = vpack.c.bf16 %v2467_v26, %v2467_v26  ;;  %v2459_v28 = vadd.f32 %v3572_v34, %v2458_v36 }
 0x4ba   : > { %v4167_v41 = vpop.f32.mrf.mxu1 }
 0x4bb   : > { %v2640_v24 = vand.u32 %v5590_v11, %v2625_v46 }
 0x4bc   : > { %v2461_v27 = vpop.f32.mrf.mxu1  ;;  %4173 = vmatpush3.bf16.xpose.msra.mxu0 %v2493_v33 }
 0x4bd   : > { %v2462_v23 = vadd.f32 %v3572_v34, %v2461_v27  ;;  %4189 = vmatpush3.bf16.msra.mxu1 %v2640_v24  ;;  %4174 = vmatprep.subr.bf16.mxu0 %v4405_v35 }
 0x4be   : > { %4190 = vmatprep.subr.bf16.mxu1 %v4405_v35 }
 0x4bf   : > { %v2624_v61 = vpack.c.bf16 %v2462_v23, %v2459_v28 }
 0x4c1   : > { %4191 = vmatpush3.bf16.msra.mxu1 %v2624_v61 }
 0x4c2   : > { %4192 = vmatprep.subr.bf16.mxu1 %v4405_v35 }
 0x4c4   : > { %4175 = vmatpush3.bf16.xpose.msra.mxu0 %v2490_v10 }
 0x4c5   : > { %4193 = vmatpush3.bf16.msra.mxu1 %v2623_v1  ;;  %4208 = vmatprep.subr.bf16.mxu0 %v4405_v35  ;;  %v2699_v1 = vld [vmem:[%s5857_s14 + $0x8] sm:$0xff] }
 0x4c6   : > { %4194 = vmatprep.subr.bf16.mxu1 %v4405_v35  ;;  %v2703_v56 = vpack.c.bf16 %v2699_v1, %v2698_v0 }
 0x4c9   : > { %4195 = vmatpush3.bf16.msra.mxu1 %v2622_v14 }
 0x4ca   : > { %4222 = vmatprep.subr.bf16.mxu1 %v4405_v35 }
 0x4cb   : > { %4177 = vmatmul.mubr.msk.bf16.vlgmr.msra.gmra.mxu0 %vm2479_vm6, %v2472_v50 }
 0x4cc   : > { %4180 = vmatprep.mubr.msk.bf16.mxu0 %vm4406_vm2, %v4405_v35  ;;  %4209 = vmatpush3.bf16.msra.mxu0 %v2703_v56 }
 0x4d3   : > { %4181 = vmatmul.mubr.msk.bf16.gmra.mxu0 %vm2479_vm6, %v2473_v9 }
 0x4d4   : > { %4184 = vmatprep.mubr.msk.bf16.mxu0 %vm4406_vm2, %v4405_v35 }
 0x4db   : > { %4185 = vmatmul.mubr.msk.bf16.gmra.mxu0 %vm2479_vm6, %v2474_v51 }
 0x4dc   : > { %4210 = vmatprep.mubr.msk.bf16.mxu0 %vm4406_vm2, %v4405_v35 }
 0x58b   : > { %v2535_v15 = vpop.f32.mrf.mxu0 }
 0x58c   : > { %v2557_v54 = vmul.f32 0.25, %v2535_v15 }
 0x58d   : > { %v4178_v50 = vpop.f32.mrf.mxu0 }
 0x58e   : > { %v2563_v42 = vsel %vm2562_vm9, %v2557_v54, -inf  ;;  %v3589_v50 = vld [vmem:[%s5851_s8 + $0x38] sm:$0xff] }
 0x58f   : > { %2564 = vmax.xlane.f32.xlu0 %v2563_v42  ;;  %v2538_v5 = vpop.f32.mrf.mxu0 }
 0x590   : > { %v2558_v9 = vmul.f32 0.25, %v2538_v5 }
 0x591   : > { %v4179_v38 = vpop.f32.mrf.mxu0 }
 0x592   : > { %v2566_v63 = vsel %vm2562_vm9, %v2558_v9, -inf }
 0x593   : > { %2567 = vmax.xlane.f32.xlu1 %v2566_v63  ;;  %v2543_v62 = vpop.f32.mrf.mxu0 }
 0x594   : > { %v2559_v43 = vmul.f32 0.25, %v2543_v62  ;;  %v3586_v62 = vld [vmem:[%s5851_s8 + $0x20] sm:$0xff] }
 0x595   : > { %v4182_v60 = vpop.f32.mrf.mxu0 }
 0x596   : > { %v2569_v52 = vsel %vm2562_vm9, %v2559_v43, -inf  ;;  %v3607_v60 = vld [vmem:[%s5855_s12 + $0x30] sm:$0xff] }
 0x597   : > { %2570 = vmax.xlane.f32.xlu0 %v2569_v52  ;;  %v2546_v44 = vpop.f32.mrf.mxu0  ;;  %v3608_v52 = vld [vmem:[%s5855_s12 + $0x38] sm:$0xff] }
 0x598   : > { %v2560_v19 = vmul.f32 0.25, %v2546_v44 }
 0x599   : > { %v4183_v47 = vpop.f32.mrf.mxu0 }
 0x59a   : > { %v2572_v4 = vsel %vm2562_vm9, %v2560_v19, -inf  ;;  %v2930_v47 = vpack.c.bf16 %v3608_v52, %v3607_v60 }
 0x59b   : > { %2573 = vmax.xlane.f32.xlu1 %v2572_v4  ;;  %v2551_v22 = vpop.f32.mrf.mxu0 }
 0x59c   : > { %v2561_v2 = vmul.f32 0.25, %v2551_v22 }
 0x59d   : > { %v4186_v55 = vpop.f32.mrf.mxu0 }
 0x59e   : > { %v2576_v25 = vsel %vm2575_vm10, %v2561_v2, -inf }
 0x59f   : > { %2577 = vmax.xlane.f32.xlu0 %v2576_v25  ;;  %v2554_v45 = vpop.f32.mrf.mxu0 }
 0x5a1   : > { %v4187_v29 = vpop.f32.mrf.mxu0 }
 0x618   : > { %v2565_v3 = vpop.xlane.xlu0 %2564 }
 0x619   : > { %v2579_v57 = vsub.f32 %v2557_v54, %v2565_v3  ;;  %v3588_v54 = vld [vmem:[%s5851_s8 + $0x30] sm:$0xff]  ;;  %v3605_v3 = vld [vmem:[%s5855_s12 + $0x20] sm:$0xff] }
 0x61a   : > { %v2780_v38 = vpack.c.bf16 %v3589_v50, %v3588_v54 }
 0x61b   : > { %v2584_v53 = vmul.f32 1.442695, %v2579_v57  ;;  %v3606_v57 = vld [vmem:[%s5855_s12 + $0x28] sm:$0xff] }
 0x61c   : > { %v2568_v58 = vpop.xlane.xlu1 %2567 }
 0x61d   : > { %4352 = vpow2.f32 %v2584_v53  ;;  %v2580_v49 = vsub.f32 %v2558_v9, %v2568_v58  ;;  %v2929_v53 = vpack.c.bf16 %v3606_v57, %v3605_v3 }
 0x61f   : > { %v2586_v17 = vmul.f32 1.442695, %v2580_v49 }
 0x620   : > { %v2571_v8 = vpop.xlane.xlu0 %2570 }
 0x621   : > { %4354 = vpow2.f32 %v2586_v17  ;;  %v2581_v18 = vsub.f32 %v2559_v43, %v2571_v8  ;;  %v3587_v43 = vld [vmem:[%s5851_s8 + $0x28] sm:$0xff]  ;;  %v3595_v17 = vld [vmem:[%s5853_s10 + $0x20] sm:$0xff] }
 0x622   : > { %v3596_v8 = vld [vmem:[%s5853_s10 + $0x28] sm:$0xff] }
 0x623   : > { %v2588_v34 = vmul.f32 1.442695, %v2581_v18 }
 0x624   : > { %v2574_v13 = vpop.xlane.xlu1 %2573 }
 0x625   : > { %4356 = vpow2.f32 %v2588_v34  ;;  %v2582_v16 = vsub.f32 %v2560_v19, %v2574_v13  ;;  %v2779_v19 = vpack.c.bf16 %v3587_v43, %v3586_v62  ;;  %v2850_v13 = vpack.c.bf16 %v3596_v8, %v3595_v17  ;;  %v3610_v62 = vld [vmem:[%s5856_s13 + $0x1] ss:$0 sm:$0xff] }
 0x627   : > { %v2590_v26 = vmul.f32 1.442695, %v2582_v16 }
 0x628   : > { %v2578_v36 = vpop.xlane.xlu0 %2577 }
 0x629   : > { %4358 = vpow2.f32 %v2590_v26  ;;  %v2583_v46 = vsub.f32 %v2561_v2, %v2578_v36 }
 0x62a   : > { %v4353_v41 = vpop.eup %4352 }
 0x62b   : > { %v2592_v48 = vmul.f32 1.442695, %v2583_v46  ;;  %v2594_v24 = vsel %vm2562_vm9, %v4353_v41, 0.0 }
 0x62c   : > { %2595 = vadd.xlane.f32.xlu1 %v2594_v24 }
 0x62d   : > { %4360 = vpow2.f32 %v2592_v48 }
 0x62e   : > { %v4355_v33 = vpop.eup %4354 }
 0x62f   : > { %v2597_v27 = vsel %vm2562_vm9, %v4355_v33, 0.0 }
 0x630   : > { %2598 = vadd.xlane.f32.xlu0 %v2597_v27 }
 0x632   : > { %v4357_v59 = vpop.eup %4356 }
 0x633   : > { %v2600_v28 = vsel %vm2562_vm9, %v4357_v59, 0.0 }
 0x634   : > { %2601 = vadd.xlane.f32.xlu1 %v2600_v28 }
 0x636   : > { %v4359_v23 = vpop.eup %4358 }
 0x637   : > { %v2603_v40 = vsel %vm2562_vm9, %v4359_v23, 0.0 }
 0x638   : > { %2604 = vadd.xlane.f32.xlu0 %v2603_v40  ;;  %v5714_v40 = vld [vmem:[%s5852_s9 + $0x1] ss:$0 sm:$0xff] }
 0x63a   : > { %v4361_v6 = vpop.eup %4360 }
 0x63b   : > { %v2606_v61 = vsel %vm2575_vm10, %v4361_v6, 0.0 }
 0x63c   : > { %2607 = vadd.xlane.f32.xlu1 %v2606_v61 }
 0x6b5   : > { %v2596_v10 = vpop.xlane.xlu1 %2595 }
 0x6b6   : > { %4362 = vrcp.f32 %v2596_v10 }
 0x6b9   : > { %v2599_v12 = vpop.xlane.xlu0 %2598 }
 0x6ba   : > { %4364 = vrcp.f32 %v2599_v12 }
 0x6bd   : > { %v2602_v14 = vpop.xlane.xlu1 %2601 }
 0x6be   : > { %4366 = vrcp.f32 %v2602_v14 }
 0x6c1   : > { %v2605_v30 = vpop.xlane.xlu0 %2604 }
 0x6c2   : > { %4368 = vrcp.f32 %v2605_v30 }
 0x6c3   : > { %v4363_v51 = vpop.eup %4362 }
 0x6c4   : > { %v2614_v5 = vmul.f32 %v4363_v51, %v4353_v41 }
 0x6c5   : > { %v2608_v15 = vpop.xlane.xlu1 %2607 }
 0x6c6   : > { %4370 = vrcp.f32 %v2608_v15 }
 0x6c7   : > { %v4365_v42 = vpop.eup %4364 }
 0x6c8   : > { %v2615_v9 = vmul.f32 %v4365_v42, %v4355_v33 }
 0x6ca   : > { %v2619_v63 = vpack.c.bf16 %v2615_v9, %v2614_v5 }
 0x6cb   : > { %v4367_v44 = vpop.eup %4366 }
 0x6cc   : > { %4197 = vmatmul.mubr.msk.bf16.vlgmr.msra.gmra.mxu1 %vm2562_vm9, %v2619_v63  ;;  %v2616_v22 = vmul.f32 %v4367_v44, %v4357_v59 }
 0x6cd   : > { %4200 = vmatprep.mubr.msk.bf16.mxu1 %vm4406_vm2, %v4405_v35  ;;  %4223 = vmatpush3.bf16.msra.mxu1 %v2780_v38 }
 0x6ce   : > { %4224 = vmatprep.subr.bf16.mxu1 %v4405_v35 }
 0x6cf   : > { %v4369_v4 = vpop.eup %4368 }
 0x6d0   : > { %v2617_v2 = vmul.f32 %v4369_v4, %v4359_v23 }
 0x6d1   : > { %4225 = vmatpush3.bf16.msra.mxu1 %v2779_v19 }
 0x6d2   : > { %v2620_v55 = vpack.c.bf16 %v2617_v2, %v2616_v22  ;;  %4250 = vmatprep.subr.bf16.mxu1 %v2930_v47 }
 0x6d3   : > { %v4371_v25 = vpop.eup %4370 }
 0x6d4   : > { %4201 = vmatmul.mubr.msk.bf16.gmra.mxu1 %vm2562_vm9, %v2620_v55  ;;  %v2618_v45 = vmul.f32 %v4371_v25, %v4361_v6 }
 0x6d5   : > { %4204 = vmatprep.mubr.msk.bf16.mxu1 %vm4406_vm2, %v4405_v35 }
 0x6d6   : > { %v2621_v29 = vpack.c.bf16 %v2618_v45, %v2618_v45 }
 0x6dc   : > { %4205 = vmatmul.mubr.msk.bf16.gmra.mxu1 %vm2562_vm9, %v2621_v29 }
 0x6dd   : > { %4226 = vmatprep.mubr.msk.bf16.mxu1 %vm4406_vm2, %v4405_v35 }
 0x6e4   : > { %4227 = vmatmul.mubr.msk.bf16.vlgmr.msra.gmra.mxu1 %vm530_vm1, %v5102_v20  ;;  %v3597_v20 = vld [vmem:[%s5853_s10 + $0x30] sm:$0xff] }
 0x6e5   : > { %4230 = vmatprep.mubr.msk.bf16.mxu1 %vm4406_vm2, %v4405_v35  ;;  %4251 = vmatpush3.bf16.msra.mxu1 %v2930_v47 }
 0x6e6   : > { %4252 = vmatprep.subr.bf16.mxu1 %v2929_v53 }
 0x6e9   : > { %4253 = vmatpush3.bf16.msra.mxu1 %v2929_v53 }
 0x6ea   : > { %4282 = vmatprep.subr.bf16.mxu1 %v4405_v35 }
 0x6ec   : > { %4231 = vmatmul.mubr.msk.bf16.gmra.mxu1 %vm530_vm1, %v5111_v21  ;;  %v3598_v21 = vld [vmem:[%s5853_s10 + $0x38] sm:$0xff] }
 0x6ed   : > { %4234 = vmatprep.mubr.msk.bf16.mxu1 %vm4406_vm2, %v4405_v35 }
 0x6f4   : > { %4235 = vmatmul.mubr.msk.bf16.gmra.mxu1 %vm530_vm1, %v5119_v7  ;;  %v2851_v7 = vpack.c.bf16 %v3598_v21, %v3597_v20 }
 0x6f5   : > { %4254 = vmatprep.mubr.msk.bf16.mxu1 %vm530_vm1, %v5543_v39 }
 0x6f6   : > { %4238 = vmatprep.subr.bf16.mxu0 %v2851_v7 }
 0x6fc   : > { %4255 = vmatmul.mubr.msk.bf16.vlgmr.msra.gmra.mxu1 %vm530_vm1, %v5555_v37 }
 0x6fd   : > { %4258 = vmatprep.mubr.msk.bf16.mxu1 %vm530_vm1, %v5561_v31 }
 0x704   : > { %4259 = vmatmul.mubr.msk.bf16.gmra.mxu1 %vm530_vm1, %v5566_v32 }
 0x705   : > { %4290 = vmatprep.mubr.msk.bf16.mxu1 %vm4406_vm2, %v4405_v35 }
 0x78c   : > { %v2676_v58 = vpop.f32.mrf.mxu1 }
 0x78e   : > { %v4198_v49 = vpop.f32.mrf.mxu1 }
 0x790   : > { %v2679_v18 = vpop.f32.mrf.mxu1 }
 0x791   : > { %v2700_v34 = vpack.c.bf16 %v2679_v18, %v2676_v58 }
 0x792   : > { %v4199_v16 = vpop.f32.mrf.mxu1 }
 0x793   : > { %4211 = vmatmul.mubr.msk.bf16.vlgmr.msra.gmra.mxu0 %vm2479_vm6, %v2700_v34 }
 0x794   : > { %v2684_v26 = vpop.f32.mrf.mxu1  ;;  %4239 = vmatpush3.bf16.msra.mxu0 %v2851_v7  ;;  %4214 = vmatprep.mubr.msk.bf16.mxu0 %vm4406_vm2, %v4405_v35 }
 0x795   : > { %4240 = vmatprep.subr.bf16.mxu0 %v2850_v13 }
 0x796   : > { %v4202_v36 = vpop.f32.mrf.mxu1 }
 0x798   : > { %v2687_v46 = vpop.f32.mrf.mxu1  ;;  %4241 = vmatpush3.bf16.msra.mxu0 %v2850_v13 }
 0x799   : > { %v2701_v41 = vpack.c.bf16 %v2687_v46, %v2684_v26  ;;  %4262 = vmatprep.subr.bf16.mxu0 %v4405_v35 }
 0x79a   : > { %v4203_v48 = vpop.f32.mrf.mxu1 }
 0x79b   : > { %4215 = vmatmul.mubr.msk.bf16.gmra.mxu0 %vm2479_vm6, %v2701_v41  ;;  %v3600_v41 = vld [vmem:[%s5854_s11 + $0x1] ss:$0 sm:$0xff] }
 0x79c   : > { %v2692_v24 = vpop.f32.mrf.mxu1  ;;  %4218 = vmatprep.mubr.msk.bf16.mxu0 %vm4406_vm2, %v4405_v35 }
 0x79d   : > { %v2702_v59 = vpack.c.bf16 %v2692_v24, %v2692_v24 }
 0x79e   : > { %v4206_v33 = vpop.f32.mrf.mxu1 }
 0x7a0   : > { %v2695_v27 = vpop.f32.mrf.mxu1 }
 0x7a2   : > { %v4207_v28 = vpop.f32.mrf.mxu1 }
 0x7a3   : > { %4219 = vmatmul.mubr.msk.bf16.gmra.mxu0 %vm2479_vm6, %v2702_v59 }
 0x7a4   : > { %v2823_v23 = vpop.f32.mrf.mxu1  ;;  %4242 = vmatprep.mubr.msk.bf16.mxu0 %vm530_vm1, %v5543_v39 }
 0x7a5   : > { %v5717_v0 = vadd.f32 %v5714_v40, %v2823_v23 }
 0x7a6   : > { %v4228_v6 = vpop.f32.mrf.mxu1 }
 0x7a8   : > { %v2826_v61 = vpop.f32.mrf.mxu1 }
 0x7a9   : > { %v5720_v1 = vadd.f32 %v5714_v40, %v2826_v61 }
 0x7aa   : > { %v4229_v56 = vpop.f32.mrf.mxu1 }
 0x7ab   : > { %v3003_v10 = vpack.c.bf16 %v5720_v1, %v5717_v0  ;;  %4243 = vmatmul.mubr.msk.bf16.vlgmr.msra.gmra.mxu0 %vm530_vm1, %v5555_v37 }
 0x7ac   : > { %v2831_v39 = vpop.f32.mrf.mxu1  ;;  %4246 = vmatprep.mubr.msk.bf16.mxu0 %vm530_vm1, %v5561_v31 }
 0x7ad   : > { %v5729_v30 = vadd.f32 %v5714_v40, %v2831_v39 }
 0x7ae   : > { %v4232_v12 = vpop.f32.mrf.mxu1 }
 0x7b0   : > { %v2834_v14 = vpop.f32.mrf.mxu1 }
 0x7b1   : > { %v5732_v51 = vadd.f32 %v5714_v40, %v2834_v14 }
 0x7b2   : > { %v4233_v15 = vpop.f32.mrf.mxu1 }
 0x7b3   : > { %v3004_v54 = vpack.c.bf16 %v5732_v51, %v5729_v30  ;;  %4247 = vmatmul.mubr.msk.bf16.gmra.mxu0 %vm530_vm1, %v5566_v32 }
 0x7b4   : > { %v5738_v37 = vpop.f32.mrf.mxu1  ;;  %4270 = vmatprep.mubr.msk.bf16.mxu0 %vm4406_vm2, %v4405_v35 }
 0x7b6   : > { %v4236_v31 = vpop.f32.mrf.mxu1 }
 0x7b8   : > { %v2842_v50 = vpop.f32.mrf.mxu1 }
 0x7ba   : > { %v4237_v42 = vpop.f32.mrf.mxu1 }
 0x7bc   : > { %v4256_v5 = vpop.f32.mrf.mxu1 }
 0x7bd   : > { %v2982_v25 = vadd.f32 %v4256_v5, %v3610_v62 }
 0x7be   : > { %v2973_v9 = vpop.f32.mrf.mxu1 }
 0x7bf   : > { %v2974_v3 = vadd.f32 %v3610_v62, %v2973_v9 }
 0x7c0   : > { %v4257_v38 = vpop.f32.mrf.mxu1 }
 0x7c1   : > { %v2985_v2 = vadd.f32 %v4257_v38, %v3610_v62  ;;  %v2840_v38 = vadd.f32 %v5714_v40, %v5738_v37 }
 0x7c2   : > { %v2976_v63 = vpop.f32.mrf.mxu1 }
 0x7c3   : > { %v3151_v45 = vpack.c.bf16 %v2985_v2, %v2982_v25  ;;  %v2977_v29 = vadd.f32 %v3610_v62, %v2976_v63  ;;  %v3005_v63 = vpack.c.bf16 %v2840_v38, %v2840_v38 }
 0x7c4   : > { %v4260_v43 = vpop.f32.mrf.mxu1 }
 0x7c5   : > { %v2998_v60 = vadd.f32 %v4260_v43, %v3610_v62  ;;  %v3150_v57 = vpack.c.bf16 %v2977_v29, %v2974_v3 }
 0x7c6   : > { %v2989_v52 = vpop.f32.mrf.mxu1 }
 0x7c7   : > { %v3153_v32 = vpack.c.bf16 %v2998_v60, %v2998_v60  ;;  %v2990_v4 = vadd.f32 %v3610_v62, %v2989_v52 }
 0x7c8   : > { %v4261_v44 = vpop.f32.mrf.mxu1 }
 0x7c9   : > { %v3164_v19 = vand.u32 %v3153_v32, %v5590_v11 }
 0x7ca   : > { %v2992_v47 = vpop.f32.mrf.mxu1 }
 0x7cb   : > { %v2993_v22 = vadd.f32 %v3610_v62, %v2992_v47  ;;  %4283 = vmatpush3.bf16.msra.mxu1 %v3164_v19 }
 0x7cc   : > { %4284 = vmatprep.subr.bf16.mxu1 %v4405_v35 }
 0x7cd   : > { %v3152_v55 = vpack.c.bf16 %v2993_v22, %v2990_v4 }
 0x7cf   : > { %4285 = vmatpush3.bf16.msra.mxu1 %v3152_v55 }
 0x7d0   : > { %4286 = vmatprep.subr.bf16.mxu1 %v4405_v35 }
 0x7d3   : > { %4287 = vmatpush3.bf16.msra.mxu1 %v3151_v45 }
 0x7d4   : > { %4288 = vmatprep.subr.bf16.mxu1 %v4405_v35 }
 0x7d7   : > { %4289 = vmatpush3.bf16.msra.mxu1 %v3150_v57 }
 0x7d8   : > { %4302 = vmatprep.subr.bf16.mxu1 %v4405_v35 }
 0x853   : > { %v5750_v11 = vpop.f32.mrf.mxu0 }
 0x855   : > { %v4212_v53 = vpop.f32.mrf.mxu0 }
 0x857   : > { %v5752_v20 = vpop.f32.mrf.mxu0 }
 0x859   : > { %v4213_v21 = vpop.f32.mrf.mxu0 }
 0x85b   : > { %v5754_v7 = vpop.f32.mrf.mxu0 }
 0x85d   : > { %v4216_v58 = vpop.f32.mrf.mxu0 }
 0x85f   : > { %v5756_v49 = vpop.f32.mrf.mxu0 }
 0x861   : > { %v4217_v17 = vpop.f32.mrf.mxu0 }
 0x863   : > { %v5758_v8 = vpop.f32.mrf.mxu0 }
 0x865   : > { %v4220_v18 = vpop.f32.mrf.mxu0 }
 0x867   : > { %v2766_v34 = vpop.f32.mrf.mxu0 }
 0x869   : > { %v4221_v13 = vpop.f32.mrf.mxu0 }
 0x86b   : > { %v4244_v16 = vpop.f32.mrf.mxu0 }
 0x86c   : > { %v2903_v14 = vadd.f32 %v4244_v16, %v3600_v41 }
 0x86d   : > { %v2894_v26 = vpop.f32.mrf.mxu0 }
 0x86e   : > { %v2895_v42 = vadd.f32 %v3600_v41, %v2894_v26 }
 0x86f   : > { %v4245_v36 = vpop.f32.mrf.mxu0 }
 0x870   : > { %v2906_v39 = vadd.f32 %v4245_v36, %v3600_v41 }
 0x871   : > { %v2897_v46 = vpop.f32.mrf.mxu0 }
 0x872   : > { %v3007_v15 = vpack.c.bf16 %v2906_v39, %v2903_v14  ;;  %v2898_v31 = vadd.f32 %v3600_v41, %v2897_v46 }
 0x873   : > { %v4248_v48 = vpop.f32.mrf.mxu0 }
 0x874   : > { %v2919_v24 = vadd.f32 %v4248_v48, %v3600_v41  ;;  %v3023_v50 = vsel %vm2479_vm6, %v3007_v15, 0  ;;  %v3006_v5 = vpack.c.bf16 %v2898_v31, %v2895_v42  ;;  %v3621_v42 = vld [vmem:[%s5857_s14 + $0x10] sm:$0xff] }
 0x875   : > { %v2910_v33 = vpop.f32.mrf.mxu0 }
 0x876   : > { %v3009_v27 = vpack.c.bf16 %v2919_v24, %v2919_v24  ;;  %v2911_v6 = vadd.f32 %v3600_v41, %v2910_v33  ;;  %v3020_v9 = vsel %vm2479_vm6, %v3006_v5, 0  ;;  %v3622_v5 = vld [vmem:[%s5857_s14 + $0x18] sm:$0xff] }
 0x877   : > { %v4249_v59 = vpop.f32.mrf.mxu0 }
 0x878   : > { %v3029_v28 = vsel %vm2479_vm6, %v3009_v27, 0 }
 0x879   : > { %v2913_v23 = vpop.f32.mrf.mxu0  ;;  %4263 = vmatpush3.bf16.xpose.msra.mxu0 %v3029_v28 }
 0x87a   : > { %v2914_v61 = vadd.f32 %v3600_v41, %v2913_v23  ;;  %4264 = vmatprep.subr.bf16.mxu0 %v4405_v35 }
 0x87c   : > { %v3008_v56 = vpack.c.bf16 %v2914_v61, %v2911_v6 }
 0x87e   : > { %v3026_v12 = vsel %vm2479_vm6, %v3008_v56, 0 }
 0x881   : > { %4265 = vmatpush3.bf16.xpose.msra.mxu0 %v3026_v12 }
 0x882   : > { %4266 = vmatprep.subr.bf16.mxu0 %v4405_v35 }
 0x889   : > { %4267 = vmatpush3.bf16.xpose.msra.mxu0 %v3023_v50 }
 0x88a   : > { %4268 = vmatprep.subr.bf16.mxu0 %v4405_v35 }
 0x891   : > { %4269 = vmatpush3.bf16.xpose.msra.mxu0 %v3020_v9 }
 0x898   : > { %4271 = vmatmul.mubr.msk.bf16.vlgmr.msra.gmra.mxu0 %vm2479_vm6, %v3003_v10 }
 0x899   : > { %4274 = vmatprep.mubr.msk.bf16.mxu0 %vm4406_vm2, %v4405_v35 }
 0x8a0   : > { %4275 = vmatmul.mubr.msk.bf16.gmra.mxu0 %vm2479_vm6, %v3004_v54 }
 0x8a1   : > { %4278 = vmatprep.mubr.msk.bf16.mxu0 %vm4406_vm2, %v4405_v35 }
 0x8a8   : > { %4279 = vmatmul.mubr.msk.bf16.gmra.mxu0 %vm2479_vm6, %v3005_v63 }
 0x958   : > { %v3065_v0 = vpop.f32.mrf.mxu0 }
 0x959   : > { %v3087_v1 = vmul.f32 0.25, %v3065_v0  ;;  %v3228_v0 = vpack.c.bf16 %v3622_v5, %v3621_v42 }
 0x95a   : > { %v4272_v10 = vpop.f32.mrf.mxu0 }
 0x95b   : > { %v3092_v62 = vsel %vm2562_vm9, %v3087_v1, -inf }
 0x95c   : > { %3093 = vmax.xlane.f32.xlu0 %v3092_v62  ;;  %v3068_v43 = vpop.f32.mrf.mxu0 }
 0x95d   : > { %v3088_v60 = vmul.f32 0.25, %v3068_v43 }
 0x95e   : > { %v4273_v30 = vpop.f32.mrf.mxu0 }
 0x95f   : > { %v3095_v51 = vsel %vm2562_vm9, %v3088_v60, -inf }
 0x960   : > { %3096 = vmax.xlane.f32.xlu1 %v3095_v51  ;;  %v3073_v54 = vpop.f32.mrf.mxu0 }
 0x961   : > { %v3089_v52 = vmul.f32 0.25, %v3073_v54 }
 0x962   : > { %v4276_v32 = vpop.f32.mrf.mxu0 }
 0x963   : > { %v3098_v40 = vsel %vm2562_vm9, %v3089_v52, -inf }
 0x964   : > { %3099 = vmax.xlane.f32.xlu0 %v3098_v40  ;;  %v3076_v37 = vpop.f32.mrf.mxu0 }
 0x965   : > { %v3090_v44 = vmul.f32 0.25, %v3076_v37 }
 0x966   : > { %v4277_v19 = vpop.f32.mrf.mxu0 }
 0x967   : > { %v3101_v47 = vsel %vm2562_vm9, %v3090_v44, -inf }
 0x968   : > { %3102 = vmax.xlane.f32.xlu1 %v3101_v47  ;;  %v3081_v4 = vpop.f32.mrf.mxu0 }
 0x969   : > { %v3091_v22 = vmul.f32 0.25, %v3081_v4 }
 0x96a   : > { %v4280_v2 = vpop.f32.mrf.mxu0 }
 0x96b   : > { %v3104_v55 = vsel %vm2575_vm10, %v3091_v22, -inf }
 0x96c   : > { %3105 = vmax.xlane.f32.xlu0 %v3104_v55  ;;  %v3084_v25 = vpop.f32.mrf.mxu0 }
 0x96e   : > { %v4281_v45 = vpop.f32.mrf.mxu0 }
 0x9e5   : > { %v3094_v29 = vpop.xlane.xlu0 %3093 }
 0x9e6   : > { %v3107_v3 = vsub.f32 %v3087_v1, %v3094_v29 }
 0x9e8   : > { %v3112_v57 = vmul.f32 1.442695, %v3107_v3 }
 0x9e9   : > { %v3097_v53 = vpop.xlane.xlu1 %3096 }
 0x9ea   : > { %4372 = vpow2.f32 %v3112_v57  ;;  %v3108_v21 = vsub.f32 %v3088_v60, %v3097_v53  ;;  %v3562_v53 = vld [vmem:[%s5858_s15] ss:$0 sm:$0xff] }
 0x9ec   : > { %v3114_v58 = vmul.f32 1.442695, %v3108_v21  ;;  %v4392_v21 = vld [vmem:[%s4509_s27] sm:$0xff] }
 0x9ed   : > { %v3100_v17 = vpop.xlane.xlu0 %3099 }
 0x9ee   : > { %4374 = vpow2.f32 %v3114_v58  ;;  %v3109_v18 = vsub.f32 %v3089_v52, %v3100_v17  ;;  %v2216_v58 = vadd.f32 %v4392_v21, %v3562_v53 }
 0x9f0   : > { %v3116_v34 = vmul.f32 1.442695, %v3109_v18  ;;  %v2769_v17 = vadd.f32 %v5750_v11, %v2216_v58  ;;  %v4393_v18 = vld [vmem:[%s4509_s27 + $0x8] sm:$0xff] }
 0x9f1   : > { %v3103_v13 = vpop.xlane.xlu1 %3102 }
 0x9f2   : > { %4376 = vpow2.f32 %v3116_v34  ;;  %v3110_v16 = vsub.f32 %v3090_v44, %v3103_v13  ;;  %v2217_v34 = vadd.f32 %v4393_v18, %v3562_v53 }
 0x9f4   : > { %v3118_v26 = vmul.f32 1.442695, %v3110_v16 }
 0x9f5   : > { %v3106_v36 = vpop.xlane.xlu0 %3105 }
 0x9f6   : > { %4378 = vpow2.f32 %v3118_v26  ;;  %v3111_v46 = vsub.f32 %v3091_v22, %v3106_v36  ;;  %v2770_v26 = vadd.f32 %v5752_v20, %v2217_v34  ;;  %v4394_v36 = vld [vmem:[%s4509_s27 + $0x10] sm:$0xff] }
 0x9f7   : > { %v4373_v41 = vpop.eup %4372 }
 0x9f8   : > { %v3120_v48 = vmul.f32 1.442695, %v3111_v46  ;;  %v3122_v24 = vsel %vm2562_vm9, %v4373_v41, 0.0  ;;  %v2218_v46 = vadd.f32 %v4394_v36, %v3562_v53 }
 0x9f9   : > { %3123 = vadd.xlane.f32.xlu1 %v3122_v24 }
 0x9fa   : > { %4380 = vpow2.f32 %v3120_v48  ;;  %v2771_v24 = vadd.f32 %v5754_v7, %v2218_v46 }
 0x9fb   : > { %v4375_v33 = vpop.eup %4374 }
 0x9fc   : > { %v3125_v27 = vsel %vm2562_vm9, %v4375_v33, 0.0 }
 0x9fd   : > { %3126 = vadd.xlane.f32.xlu0 %v3125_v27 }
 0x9ff   : > { %v4377_v59 = vpop.eup %4376 }
 0xa00   : > { %v3128_v28 = vsel %vm2562_vm9, %v4377_v59, 0.0 }
 0xa01   : > { %3129 = vadd.xlane.f32.xlu1 %v3128_v28 }
 0xa03   : > { %v4379_v23 = vpop.eup %4378 }
 0xa04   : > { %v3131_v6 = vsel %vm2562_vm9, %v4379_v23, 0.0 }
 0xa05   : > { %3132 = vadd.xlane.f32.xlu0 %v3131_v6 }
 0xa07   : > { %v4381_v61 = vpop.eup %4380 }
 0xa08   : > { %v3134_v56 = vsel %vm2575_vm10, %v4381_v61, 0.0 }
 0xa09   : > { %3135 = vadd.xlane.f32.xlu1 %v3134_v56 }
 0xa82   : > { %v3124_v39 = vpop.xlane.xlu1 %3123 }
 0xa83   : > { %4382 = vrcp.f32 %v3124_v39 }
 0xa86   : > { %v3127_v12 = vpop.xlane.xlu0 %3126 }
 0xa87   : > { %4384 = vrcp.f32 %v3127_v12 }
 0xa8a   : > { %v3130_v14 = vpop.xlane.xlu1 %3129 }
 0xa8b   : > { %4386 = vrcp.f32 %v3130_v14 }
 0xa8e   : > { %v3133_v15 = vpop.xlane.xlu0 %3132 }
 0xa8f   : > { %4388 = vrcp.f32 %v3133_v15 }
 0xa90   : > { %v4383_v31 = vpop.eup %4382 }
 0xa91   : > { %v3142_v38 = vmul.f32 %v4383_v31, %v4373_v41 }
 0xa92   : > { %v3136_v50 = vpop.xlane.xlu1 %3135 }
 0xa93   : > { %4390 = vrcp.f32 %v3136_v50 }
 0xa94   : > { %v4385_v9 = vpop.eup %4384 }
 0xa95   : > { %v3143_v63 = vmul.f32 %v4385_v9, %v4375_v33  ;;  %v4395_v33 = vld [vmem:[%s4509_s27 + $0x18] sm:$0xff] }
 0xa96   : > { %v2219_v27 = vadd.f32 %v4395_v33, %v3562_v53 }
 0xa97   : > { %v3147_v1 = vpack.c.bf16 %v3143_v63, %v3142_v38 }
 0xa98   : > { %v4387_v10 = vpop.eup %4386  ;;  %v2772_v6 = vadd.f32 %v5756_v49, %v2219_v27 }
 0xa99   : > { %4291 = vmatmul.mubr.msk.bf16.vlgmr.msra.gmra.mxu1 %vm2562_vm9, %v3147_v1  ;;  %v3144_v60 = vmul.f32 %v4387_v10, %v4377_v59 }
 0xa9a   : > { %4294 = vmatprep.mubr.msk.bf16.mxu1 %vm4406_vm2, %v4405_v35  ;;  %4303 = vmatpush3.bf16.msra.mxu1 %v3228_v0 }
 0xa9c   : > { %v4389_v62 = vpop.eup %4388 }
 0xa9d   : > { %v3145_v43 = vmul.f32 %v4389_v62, %v4379_v23 }
 0xa9f   : > { %v3148_v30 = vpack.c.bf16 %v3145_v43, %v3144_v60 }
 0xaa0   : > { %v4391_v51 = vpop.eup %4390 }
 0xaa1   : > { %4295 = vmatmul.mubr.msk.bf16.gmra.mxu1 %vm2562_vm9, %v3148_v30  ;;  %v3146_v54 = vmul.f32 %v4391_v51, %v4381_v61  ;;  %v4396_v61 = vld [vmem:[%s4509_s27 + $0x20] sm:$0xf] }
 0xaa2   : > { %4298 = vmatprep.mubr.msk.bf16.mxu1 %vm4406_vm2, %v4405_v35  ;;  %v2220_v20 = vadd.f32 %v4396_v61, %v3562_v53 }
 0xaa3   : > { %v3149_v52 = vpack.c.bf16 %v3146_v54, %v3146_v54 }
 0xaa4   : > { %v2773_v14 = vadd.f32 %v5758_v8, %v2220_v20 }
 0xaa9   : > { %4299 = vmatmul.mubr.msk.bf16.gmra.mxu1 %vm2562_vm9, %v3149_v52 }
 0xaaa   : > { %4304 = vmatprep.mubr.msk.bf16.mxu1 %vm4406_vm2, %v4405_v35 }
 0xb59   : > { %v3200_v32 = vpop.f32.mrf.mxu1 }
 0xb5b   : > { %v4292_v40 = vpop.f32.mrf.mxu1 }
 0xb5d   : > { %v3203_v37 = vpop.f32.mrf.mxu1 }
 0xb5e   : > { %v3225_v44 = vpack.c.bf16 %v3203_v37, %v3200_v32 }
 0xb5f   : > { %v4293_v19 = vpop.f32.mrf.mxu1 }
 0xb60   : > { %4305 = vmatmul.mubr.msk.bf16.vlgmr.msra.gmra.mxu1 %vm2479_vm6, %v3225_v44 }
 0xb61   : > { %v3208_v47 = vpop.f32.mrf.mxu1  ;;  %4308 = vmatprep.mubr.msk.bf16.mxu1 %vm4406_vm2, %v4405_v35 }
 0xb63   : > { %v4296_v4 = vpop.f32.mrf.mxu1 }
 0xb65   : > { %v3211_v22 = vpop.f32.mrf.mxu1 }
 0xb66   : > { %v3226_v2 = vpack.c.bf16 %v3211_v22, %v3208_v47 }
 0xb67   : > { %v4297_v55 = vpop.f32.mrf.mxu1 }
 0xb68   : > { %4309 = vmatmul.mubr.msk.bf16.gmra.mxu1 %vm2479_vm6, %v3226_v2 }
 0xb69   : > { %v3216_v25 = vpop.f32.mrf.mxu1  ;;  %4312 = vmatprep.mubr.msk.bf16.mxu1 %vm4406_vm2, %v4405_v35 }
 0xb6a   : > { %v3227_v3 = vpack.c.bf16 %v3216_v25, %v3216_v25 }
 0xb6b   : > { %v4300_v45 = vpop.f32.mrf.mxu1 }
 0xb6d   : > { %v3219_v29 = vpop.f32.mrf.mxu1 }
 0xb6f   : > { %v4301_v57 = vpop.f32.mrf.mxu1 }
 0xb70   : > { %4313 = vmatmul.mubr.msk.bf16.gmra.mxu1 %vm2479_vm6, %v3227_v3 }
 0xc20   : > { %v3272_v35 = vpop.f32.mrf.mxu1 }
 0xc21   : > { %v3294_v13 = vadd.f32 %v3272_v35, %v2769_v17 }
 0xc22   : > { %v4306_v16 = vpop.f32.mrf.mxu1 }
 0xc23   : > { %3299 = vst.msk [vmem:[%s521_s18] sm:$0xff] %vm530_vm1, %v3294_v13 }
 0xc24   : > { %v3275_v41 = vpop.f32.mrf.mxu1 }
 0xc25   : > { %v3295_v48 = vadd.f32 %v3275_v41, %v2770_v26 }
 0xc26   : > { %v4307_v11 = vpop.f32.mrf.mxu1 }
 0xc27   : > { %3300 = vst.msk [vmem:[%s521_s18 + $0x8] sm:$0xff] %vm530_vm1, %v3295_v48 }
 0xc28   : > { %v3280_v59 = vpop.f32.mrf.mxu1 }
 0xc29   : > { %v3296_v28 = vadd.f32 %v3280_v59, %v2771_v24 }
 0xc2a   : > { %v4310_v23 = vpop.f32.mrf.mxu1 }
 0xc2b   : > { %3301 = vst.msk [vmem:[%s521_s18 + $0x10] sm:$0xff] %vm530_vm1, %v3296_v28 }
 0xc2c   : > { %v3283_v56 = vpop.f32.mrf.mxu1 }
 0xc2d   : > { %v3297_v39 = vadd.f32 %v3283_v56, %v2772_v6 }
 0xc2e   : > { %v4311_v12 = vpop.f32.mrf.mxu1 }
 0xc2f   : > { %3302 = vst.msk [vmem:[%s521_s18 + $0x18] sm:$0xff] %vm530_vm1, %v3297_v39 }
 0xc30   : > { %v3288_v7 = vpop.f32.mrf.mxu1 }
 0xc31   : > { %v3298_v15 = vadd.f32 %v3288_v7, %v2773_v14 }
 0xc32   : > { %v4314_v31 = vpop.f32.mrf.mxu1 }
 0xc33   : > { %3303 = vst.msk [vmem:[%s521_s18 + $0x20] sm:$0xf] %vm543_vm0, %v3298_v15 }
 0xc34   : > { %v3291_v50 = vpop.f32.mrf.mxu1 }
 0xc36   : > { %v4315_v42 = vpop.f32.mrf.mxu1 }
 0xc37 PF: > { %s26_s21 = sadd.s32 1, %s4403_s21  }
 0xc38   : > { %p23_p4 = scmp.ge.s32.totalorder %s26_s21, 4  }
 0xc3a   :  { %25 = sbr.rel (!%p23_p4) target bundleno = 2 (0x2), region = 137 }

</bundles_post_ra>
